<compile_context>
chip_gen: v5e
topology: v5e:2x2
jax: 0.10.0
libtpu: 0.0.40
codegen_flags: <defaults>
</compile_context>

<pallas_src>
import jax
import jax.numpy as jnp
import numpy as np
from jax.experimental import pallas as pl
from jax.experimental.pallas import tpu as pltpu

EPS = 1e-5
H, W = 6, 7
PARAM_ORDER = ('w1', 's1', 't1', 'w2', 's2', 't2',
               'w3', 's3', 't3', 'w4', 's4', 't4', 'w5', 'b5')


# ---------------------------- fused Pallas kernel ----------------------------

def dqn_fused_kernel(x_ref,
                     w1_ref, s1_ref, t1_ref,
                     w2_ref, s2_ref, t2_ref,
                     w3_ref, s3_ref, t3_ref,
                     w4_ref, s4_ref, t4_ref,
                     w5_ref, b5_ref,
                     o_ref):
    """Five chained MXU matmuls; bf16 operands, f32 accumulation + f32 epilogue."""

    def dense_bn_relu(h, w_ref, s_ref, t_ref):
        y = jnp.dot(h.astype(jnp.bfloat16), w_ref[...],
                    preferred_element_type=jnp.float32)
        return jnp.maximum(y * s_ref[...] + t_ref[...], 0.0)

    h = dense_bn_relu(x_ref[...], w1_ref, s1_ref, t1_ref)   # conv1 + bn1 + relu
    h = dense_bn_relu(h, w2_ref, s2_ref, t2_ref)            # conv2 + bn2 + relu
    h = dense_bn_relu(h, w3_ref, s3_ref, t3_ref)            # fc1   + bn3 + relu
    # TODO(synk): dropout1/dropout2 (p=0.2) are identity in eval mode; train-mode RNG masks not implemented.
    h = dense_bn_relu(h, w4_ref, s4_ref, t4_ref)            # fc2   + bn4 + relu
    # fc3, written lane-dense into a 128-wide padded output slab.
    o_ref[...] = (jnp.dot(h.astype(jnp.bfloat16), w5_ref[...],
                          preferred_element_type=jnp.float32) + b5_ref[...])


# ---------------------------- pallas_call wrapper ----------------------------

def _round_up(n, m):
    return (n + m - 1) // m * m


def dqn_forward(x, pp, block_rows=512):
    """x: (B, 6, 7) float32; pp: output of prepare_params. Returns (B, 7)."""
    B = x.shape[0]
    # No jnp.pad of the batch: the grid uses cdiv and Pallas masks the partial
    # last tile (its garbage rows are independent and never sliced back out).
    xf = x.reshape(B, H * W).astype(jnp.float32)

    tb = min(_round_up(block_rows, 8), _round_up(B, 8))      # sublane-aligned row tile
    if B >= 16:
        # v7x megacore: keep >=2 grid steps so the "parallel" batch axis can
        # split across both TensorCores (harmless on single-TC v5e/v6e).
        tb = min(tb, _round_up((B + 1) // 2, 8))
    grid = (pl.cdiv(B, tb),)

    weights = [pp[k] for k in PARAM_ORDER]
    # Full-array blocks with a constant index_map -> weights stay VMEM-resident
    # across the batch grid, no re-DMA per step. (Optional v7x knob:
    # pipeline_mode=pl.Buffered(1) to drop the second weight buffer.)
    const_specs = [pl.BlockSpec(w.shape, lambda i: (0, 0)) for w in weights]

    out = pl.pallas_call(
        dqn_fused_kernel,
        out_shape=jax.ShapeDtypeStruct((B, 128), jnp.float32),
        grid=grid,
        in_specs=[pl.BlockSpec((tb, H * W), lambda i: (i, 0))] + const_specs,
        out_specs=pl.BlockSpec((tb, 128), lambda i: (i, 0)),
        compiler_params=pltpu.CompilerParams(
            dimension_semantics=("parallel",),          # megacore split on v7x
            vmem_limit_bytes=48 * 1024 * 1024,          # v7x(64 MiB)-safe, ample for tb=512
        ),
    )(xf, *weights)
    return out[:, :7]


# ---------------------------- one-time host-side parameter prep ----------------------------

def prepare_params(p):
    """Hoisted off the hot path: conv -> dense Toeplitz matmul matrices, BN folding,
    fc1 row permutation (PyTorch NCHW flatten vs our HWC row order), fc3 lane padding,
    and bf16 casting of all matmul weights (scales/shifts stay f32)."""

    def bn_fold(bn, bias, reps):
        scale = np.asarray(bn['g']) / np.sqrt(np.asarray(bn['v']) + EPS)
        shift = (np.asarray(bias) - np.asarray(bn['m'])) * scale + np.asarray(bn['b'])
        return (np.tile(scale, reps)[None, :].astype(np.float32),
                np.tile(shift, reps)[None, :].astype(np.float32))

    def conv_to_dense(w):
        # (Cout, Cin, 3, 3) SAME-padded conv over the fixed 6x7 board as a dense
        # (H*W*Cin, H*W*Cout) matrix on row-flattened HWC activations.
        w = np.asarray(w, np.float32)
        cout, cin = w.shape[0], w.shape[1]
        m = np.zeros((H * W * cin, H * W * cout), np.float32)
        for ho in range(H):
            for wo in range(W):
                o = (ho * W + wo) * cout
                for kh in range(3):
                    for kw in range(3):
                        hi, wi = ho + kh - 1, wo + kw - 1
                        if 0 <= hi < H and 0 <= wi < W:
                            i = (hi * W + wi) * cin
                            m[i:i + cin, o:o + cout] += w[:, :, kh, kw].T
        return m

    pp = {}
    pp['w1'] = conv_to_dense(p['conv1_w'])                              # (42, 672)
    pp['s1'], pp['t1'] = bn_fold(p['bn1'], p['conv1_b'], H * W)
    pp['w2'] = conv_to_dense(p['conv2_w'])                              # (672, 1344)
    pp['s2'], pp['t2'] = bn_fold(p['bn2'], p['conv2_b'], H * W)
    # fc1: PyTorch flattens (C, H, W); our rows are (H, W, C) -> permute weight rows once.
    w3 = np.asarray(p['fc1_w'], np.float32).T                           # (1344, 256), rows = c*42 + hw
    pp['w3'] = w3.reshape(32, H * W, 256).transpose(1, 0, 2).reshape(H * W * 32, 256)
    pp['s3'], pp['t3'] = bn_fold(p['bn3'], p['fc1_b'], 1)
    pp['w4'] = np.asarray(p['fc2_w'], np.float32).T                     # (256, 128)
    pp['s4'], pp['t4'] = bn_fold(p['bn4'], p['fc2_b'], 1)
    # fc3 padded from 7 to 128 output lanes (lane-dense store; sliced outside the kernel).
    w5 = np.zeros((128, 128), np.float32)
    w5[:, :7] = np.asarray(p['fc3_w'], np.float32).T
    b5 = np.zeros((1, 128), np.float32)
    b5[0, :7] = np.asarray(p['fc3_b'], np.float32)
    pp['w5'], pp['b5'] = w5, b5

    # Matmul weights -> bf16 (MXU-native on v5e/v6e/v7x); BN scale/shift stay f32.
    return {k: jnp.asarray(v, jnp.bfloat16 if k.startswith('w') else jnp.float32)
            for k, v in pp.items()}


# ---------------------------- deterministic parameter init ----------------------------

def init_params(key):
    keys = iter(jax.random.split(key, 32))

    def u(shape, bound):
        return jax.random.uniform(next(keys), shape, jnp.float32, -bound, bound)

    def bn_params(n):
        return dict(
            g=jax.random.uniform(next(keys), (n,), jnp.float32, 0.5, 1.5),
            b=u((n,), 0.5),
            m=u((n,), 0.5),
            v=jax.random.uniform(next(keys), (n,), jnp.float32, 0.5, 1.5),
        )

    p = {}
    p['conv1_w'] = u((16, 1, 3, 3), 1.0 / np.sqrt(1 * 9))
    p['conv1_b'] = u((16,), 1.0 / np.sqrt(1 * 9))
    p['bn1'] = bn_params(16)
    p['conv2_w'] = u((32, 16, 3, 3), 1.0 / np.sqrt(16 * 9))
    p['conv2_b'] = u((32,), 1.0 / np.sqrt(16 * 9))
    p['bn2'] = bn_params(32)
    p['fc1_w'] = u((256, 1344), 1.0 / np.sqrt(1344))
    p['fc1_b'] = u((256,), 1.0 / np.sqrt(1344))
    p['bn3'] = bn_params(256)
    p['fc2_w'] = u((128, 256), 1.0 / np.sqrt(256))
    p['fc2_b'] = u((128,), 1.0 / np.sqrt(256))
    p['bn4'] = bn_params(128)
    p['fc3_w'] = u((7, 128), 1.0 / np.sqrt(128))
    p['fc3_b'] = u((7,), 1.0 / np.sqrt(128))
    return p


# ---------------------------- pure-JAX reference (for verification) ----------------------------

def dqn_reference(x, p):
    def conv(h, w, b):
        y = jax.lax.conv_general_dilated(h, w, (1, 1), ((1, 1), (1, 1)),
                                         dimension_numbers=('NCHW', 'OIHW', 'NCHW'))
        return y + b[None, :, None, None]

    def bn2d(h, bn):
        return ((h - bn['m'][None, :, None, None])
                / jnp.sqrt(bn['v'][None, :, None, None] + EPS)
                * bn['g'][None, :, None, None] + bn['b'][None, :, None, None])

    def bn1d(h, bn):
        return (h - bn['m']) / jnp.sqrt(bn['v'] + EPS) * bn['g'] + bn['b']

    h = x[:, None, :, :]
    h = jax.nn.relu(bn2d(conv(h, p['conv1_w'], p['conv1_b']), p['bn1']))
    h = jax.nn.relu(bn2d(conv(h, p['conv2_w'], p['conv2_b']), p['bn2']))
    h = h.reshape(x.shape[0], -1)
    h = jax.nn.relu(bn1d(h @ p['fc1_w'].T + p['fc1_b'], p['bn3']))
    h = jax.nn.relu(bn1d(h @ p['fc2_w'].T + p['fc2_b'], p['bn4']))
    return h @ p['fc3_w'].T + p['fc3_b']


if __name__ == "__main__":
    key = jax.random.PRNGKey(0)
    kx, kx2, kp = jax.random.split(key, 3)
    params = init_params(kp)
    prepped = prepare_params(params)          # one-time host-side prep, off the hot path
    fwd = jax.jit(dqn_forward)

    # Tolerance reflects bf16 matmul operands (f32 accumulation) vs the f32 reference.
    TOL = 5e-2

    # Small serving-style batch (single grid step, partial tile masked by Pallas).
    x = jax.random.uniform(kx, (2, 6, 7), jnp.float32)
    out = jax.block_until_ready(fwd(x, prepped))
    assert out.shape == (2, 7), out.shape
    err = float(jnp.max(jnp.abs(out - dqn_reference(x, params))))
    assert err < TOL, err

    # Larger batch: exercises the multi-step "parallel" grid (v7x megacore path)
    # and the unpadded partial last tile.
    x2 = jax.random.uniform(kx2, (50, 6, 7), jnp.float32)
    out2 = jax.block_until_ready(fwd(x2, prepped))
    assert out2.shape == (50, 7), out2.shape
    err2 = float(jnp.max(jnp.abs(out2 - dqn_reference(x2, params))))
    assert err2 < TOL, err2

    print("KERNEL_OK")
</pallas_src>

<mosaic_0001>
module attributes {stable_mosaic.version = 11 : i64} {
  func.func @dqn_fused_kernel(%arg0: i32, %arg1: memref<8x42xf32, #tpu.memory_space<vmem>>, %arg2: memref<42x672xbf16, #tpu.memory_space<vmem>>, %arg3: memref<1x672xf32, #tpu.memory_space<vmem>>, %arg4: memref<1x672xf32, #tpu.memory_space<vmem>>, %arg5: memref<672x1344xbf16, #tpu.memory_space<vmem>>, %arg6: memref<1x1344xf32, #tpu.memory_space<vmem>>, %arg7: memref<1x1344xf32, #tpu.memory_space<vmem>>, %arg8: memref<1344x256xbf16, #tpu.memory_space<vmem>>, %arg9: memref<1x256xf32, #tpu.memory_space<vmem>>, %arg10: memref<1x256xf32, #tpu.memory_space<vmem>>, %arg11: memref<256x128xbf16, #tpu.memory_space<vmem>>, %arg12: memref<1x128xf32, #tpu.memory_space<vmem>>, %arg13: memref<1x128xf32, #tpu.memory_space<vmem>>, %arg14: memref<128x128xbf16, #tpu.memory_space<vmem>>, %arg15: memref<1x128xf32, #tpu.memory_space<vmem>>, %arg16: memref<8x128xf32, #tpu.memory_space<vmem>>) attributes {dimension_semantics = [#tpu.dimension_semantics<parallel>], iteration_bounds = array<i64: 1>, scalar_prefetch = 0 : i64, scratch_operands = 0 : i64, tpu.core_type = #tpu.core_type<tc>, window_params = [{transform_indices = @transform_0, window_bounds = array<i64: 8, 42>}, {pipeline_mode = #tpu.pipeline_mode<synchronous>, transform_indices = @transform_1, window_bounds = array<i64: 42, 672>}, {pipeline_mode = #tpu.pipeline_mode<synchronous>, transform_indices = @transform_2, window_bounds = array<i64: 1, 672>}, {pipeline_mode = #tpu.pipeline_mode<synchronous>, transform_indices = @transform_3, window_bounds = array<i64: 1, 672>}, {pipeline_mode = #tpu.pipeline_mode<synchronous>, transform_indices = @transform_4, window_bounds = array<i64: 672, 1344>}, {pipeline_mode = #tpu.pipeline_mode<synchronous>, transform_indices = @transform_5, window_bounds = array<i64: 1, 1344>}, {pipeline_mode = #tpu.pipeline_mode<synchronous>, transform_indices = @transform_6, window_bounds = array<i64: 1, 1344>}, {pipeline_mode = #tpu.pipeline_mode<synchronous>, transform_indices = @transform_7, window_bounds = array<i64: 1344, 256>}, {pipeline_mode = #tpu.pipeline_mode<synchronous>, transform_indices = @transform_8, window_bounds = array<i64: 1, 256>}, {pipeline_mode = #tpu.pipeline_mode<synchronous>, transform_indices = @transform_9, window_bounds = array<i64: 1, 256>}, {pipeline_mode = #tpu.pipeline_mode<synchronous>, transform_indices = @transform_10, window_bounds = array<i64: 256, 128>}, {pipeline_mode = #tpu.pipeline_mode<synchronous>, transform_indices = @transform_11, window_bounds = array<i64: 1, 128>}, {pipeline_mode = #tpu.pipeline_mode<synchronous>, transform_indices = @transform_12, window_bounds = array<i64: 1, 128>}, {pipeline_mode = #tpu.pipeline_mode<synchronous>, transform_indices = @transform_13, window_bounds = array<i64: 128, 128>}, {pipeline_mode = #tpu.pipeline_mode<synchronous>, transform_indices = @transform_14, window_bounds = array<i64: 1, 128>}, {transform_indices = @transform_15, window_bounds = array<i64: 8, 128>}]} {
    %c0 = arith.constant 0 : index
    %c0_0 = arith.constant 0 : index
    %0 = vector.load %arg1[%c0, %c0_0] : memref<8x42xf32, #tpu.memory_space<vmem>>, vector<8x42xf32>
    %1 = arith.truncf %0 : vector<8x42xf32> to vector<8x42xbf16>
    %c0_1 = arith.constant 0 : index
    %c0_2 = arith.constant 0 : index
    %2 = vector.load %arg2[%c0_1, %c0_2] : memref<42x672xbf16, #tpu.memory_space<vmem>>, vector<42x672xbf16>
    %cst = arith.constant dense<0.000000e+00> : vector<8x672xf32>
    %3 = tpu.matmul %1, %2, %cst {dimension_numbers = #tpu.dot_dimension_numbers<[1], [0], [0], [1], [0, 0, 1, 1], [], []>} : vector<8x42xbf16>, vector<42x672xbf16>, vector<8x672xf32> -> vector<8x672xf32>
    %c0_3 = arith.constant 0 : index
    %c0_4 = arith.constant 0 : index
    %4 = vector.load %arg3[%c0_3, %c0_4] : memref<1x672xf32, #tpu.memory_space<vmem>>, vector<1x672xf32>
    %5 = vector.broadcast %4 : vector<1x672xf32> to vector<8x672xf32>
    %6 = arith.mulf %3, %5 : vector<8x672xf32>
    %c0_5 = arith.constant 0 : index
    %c0_6 = arith.constant 0 : index
    %7 = vector.load %arg4[%c0_5, %c0_6] : memref<1x672xf32, #tpu.memory_space<vmem>>, vector<1x672xf32>
    %8 = vector.broadcast %7 : vector<1x672xf32> to vector<8x672xf32>
    %9 = arith.addf %6, %8 : vector<8x672xf32>
    %cst_7 = arith.constant 0.000000e+00 : f32
    %10 = vector.broadcast %cst_7 : f32 to vector<8x672xf32>
    %11 = arith.maximumf %9, %10 : vector<8x672xf32>
    %12 = arith.truncf %11 : vector<8x672xf32> to vector<8x672xbf16>
    %c0_8 = arith.constant 0 : index
    %c0_9 = arith.constant 0 : index
    %13 = vector.load %arg5[%c0_8, %c0_9] : memref<672x1344xbf16, #tpu.memory_space<vmem>>, vector<672x1344xbf16>
    %cst_10 = arith.constant dense<0.000000e+00> : vector<8x1344xf32>
    %14 = tpu.matmul %12, %13, %cst_10 {dimension_numbers = #tpu.dot_dimension_numbers<[1], [0], [0], [1], [0, 0, 1, 1], [], []>} : vector<8x672xbf16>, vector<672x1344xbf16>, vector<8x1344xf32> -> vector<8x1344xf32>
    %c0_11 = arith.constant 0 : index
    %c0_12 = arith.constant 0 : index
    %15 = vector.load %arg6[%c0_11, %c0_12] : memref<1x1344xf32, #tpu.memory_space<vmem>>, vector<1x1344xf32>
    %16 = vector.broadcast %15 : vector<1x1344xf32> to vector<8x1344xf32>
    %17 = arith.mulf %14, %16 : vector<8x1344xf32>
    %c0_13 = arith.constant 0 : index
    %c0_14 = arith.constant 0 : index
    %18 = vector.load %arg7[%c0_13, %c0_14] : memref<1x1344xf32, #tpu.memory_space<vmem>>, vector<1x1344xf32>
    %19 = vector.broadcast %18 : vector<1x1344xf32> to vector<8x1344xf32>
    %20 = arith.addf %17, %19 : vector<8x1344xf32>
    %cst_15 = arith.constant 0.000000e+00 : f32
    %21 = vector.broadcast %cst_15 : f32 to vector<8x1344xf32>
    %22 = arith.maximumf %20, %21 : vector<8x1344xf32>
    %23 = arith.truncf %22 : vector<8x1344xf32> to vector<8x1344xbf16>
    %c0_16 = arith.constant 0 : index
    %c0_17 = arith.constant 0 : index
    %24 = vector.load %arg8[%c0_16, %c0_17] : memref<1344x256xbf16, #tpu.memory_space<vmem>>, vector<1344x256xbf16>
    %cst_18 = arith.constant dense<0.000000e+00> : vector<8x256xf32>
    %25 = tpu.matmul %23, %24, %cst_18 {dimension_numbers = #tpu.dot_dimension_numbers<[1], [0], [0], [1], [0, 0, 1, 1], [], []>} : vector<8x1344xbf16>, vector<1344x256xbf16>, vector<8x256xf32> -> vector<8x256xf32>
    %c0_19 = arith.constant 0 : index
    %c0_20 = arith.constant 0 : index
    %26 = vector.load %arg9[%c0_19, %c0_20] : memref<1x256xf32, #tpu.memory_space<vmem>>, vector<1x256xf32>
    %27 = vector.broadcast %26 : vector<1x256xf32> to vector<8x256xf32>
    %28 = arith.mulf %25, %27 : vector<8x256xf32>
    %c0_21 = arith.constant 0 : index
    %c0_22 = arith.constant 0 : index
    %29 = vector.load %arg10[%c0_21, %c0_22] : memref<1x256xf32, #tpu.memory_space<vmem>>, vector<1x256xf32>
    %30 = vector.broadcast %29 : vector<1x256xf32> to vector<8x256xf32>
    %31 = arith.addf %28, %30 : vector<8x256xf32>
    %cst_23 = arith.constant 0.000000e+00 : f32
    %32 = vector.broadcast %cst_23 : f32 to vector<8x256xf32>
    %33 = arith.maximumf %31, %32 : vector<8x256xf32>
    %34 = arith.truncf %33 : vector<8x256xf32> to vector<8x256xbf16>
    %c0_24 = arith.constant 0 : index
    %c0_25 = arith.constant 0 : index
    %35 = vector.load %arg11[%c0_24, %c0_25] : memref<256x128xbf16, #tpu.memory_space<vmem>>, vector<256x128xbf16>
    %cst_26 = arith.constant dense<0.000000e+00> : vector<8x128xf32>
    %36 = tpu.matmul %34, %35, %cst_26 {dimension_numbers = #tpu.dot_dimension_numbers<[1], [0], [0], [1], [0, 0, 1, 1], [], []>} : vector<8x256xbf16>, vector<256x128xbf16>, vector<8x128xf32> -> vector<8x128xf32>
    %c0_27 = arith.constant 0 : index
    %c0_28 = arith.constant 0 : index
    %37 = vector.load %arg12[%c0_27, %c0_28] : memref<1x128xf32, #tpu.memory_space<vmem>>, vector<1x128xf32>
    %38 = vector.broadcast %37 : vector<1x128xf32> to vector<8x128xf32>
    %39 = arith.mulf %36, %38 : vector<8x128xf32>
    %c0_29 = arith.constant 0 : index
    %c0_30 = arith.constant 0 : index
    %40 = vector.load %arg13[%c0_29, %c0_30] : memref<1x128xf32, #tpu.memory_space<vmem>>, vector<1x128xf32>
    %41 = vector.broadcast %40 : vector<1x128xf32> to vector<8x128xf32>
    %42 = arith.addf %39, %41 : vector<8x128xf32>
    %cst_31 = arith.constant 0.000000e+00 : f32
    %43 = vector.broadcast %cst_31 : f32 to vector<8x128xf32>
    %44 = arith.maximumf %42, %43 : vector<8x128xf32>
    %45 = arith.truncf %44 : vector<8x128xf32> to vector<8x128xbf16>
    %c0_32 = arith.constant 0 : index
    %c0_33 = arith.constant 0 : index
    %46 = vector.load %arg14[%c0_32, %c0_33] : memref<128x128xbf16, #tpu.memory_space<vmem>>, vector<128x128xbf16>
    %cst_34 = arith.constant dense<0.000000e+00> : vector<8x128xf32>
    %47 = tpu.matmul %45, %46, %cst_34 {dimension_numbers = #tpu.dot_dimension_numbers<[1], [0], [0], [1], [0, 0, 1, 1], [], []>} : vector<8x128xbf16>, vector<128x128xbf16>, vector<8x128xf32> -> vector<8x128xf32>
    %c0_35 = arith.constant 0 : index
    %c0_36 = arith.constant 0 : index
    %48 = vector.load %arg15[%c0_35, %c0_36] : memref<1x128xf32, #tpu.memory_space<vmem>>, vector<1x128xf32>
    %49 = vector.broadcast %48 : vector<1x128xf32> to vector<8x128xf32>
    %50 = arith.addf %47, %49 : vector<8x128xf32>
    %c0_37 = arith.constant 0 : index
    %c0_38 = arith.constant 0 : index
    %51 = vector.load %arg16[%c0_37, %c0_38] : memref<8x128xf32, #tpu.memory_space<vmem>>, vector<8x128xf32>
    tpu.vector_store %arg16[%c0_37, %c0_38], %50 {strides = array<i32>} : memref<8x128xf32, #tpu.memory_space<vmem>>, vector<8x128xf32>,
    return
  }
  func.func @transform_0(%arg0: i32) -> (i32, i32) {
    %c0_i32 = arith.constant 0 : i32
    %c0_i32_0 = arith.constant 0 : i32
    return %arg0, %c0_i32 : i32, i32
  }
  func.func @transform_1(%arg0: i32) -> (i32, i32) {
    %c0_i32 = arith.constant 0 : i32
    %c0_i32_0 = arith.constant 0 : i32
    %c0_i32_1 = arith.constant 0 : i32
    return %c0_i32, %c0_i32_0 : i32, i32
  }
  func.func @transform_2(%arg0: i32) -> (i32, i32) {
    %c0_i32 = arith.constant 0 : i32
    %c0_i32_0 = arith.constant 0 : i32
    %c0_i32_1 = arith.constant 0 : i32
    return %c0_i32, %c0_i32_0 : i32, i32
  }
  func.func @transform_3(%arg0: i32) -> (i32, i32) {
    %c0_i32 = arith.constant 0 : i32
    %c0_i32_0 = arith.constant 0 : i32
    %c0_i32_1 = arith.constant 0 : i32
    return %c0_i32, %c0_i32_0 : i32, i32
  }
  func.func @transform_4(%arg0: i32) -> (i32, i32) {
    %c0_i32 = arith.constant 0 : i32
    %c0_i32_0 = arith.constant 0 : i32
    %c0_i32_1 = arith.constant 0 : i32
    return %c0_i32, %c0_i32_0 : i32, i32
  }
  func.func @transform_5(%arg0: i32) -> (i32, i32) {
    %c0_i32 = arith.constant 0 : i32
    %c0_i32_0 = arith.constant 0 : i32
    %c0_i32_1 = arith.constant 0 : i32
    return %c0_i32, %c0_i32_0 : i32, i32
  }
  func.func @transform_6(%arg0: i32) -> (i32, i32) {
    %c0_i32 = arith.constant 0 : i32
    %c0_i32_0 = arith.constant 0 : i32
    %c0_i32_1 = arith.constant 0 : i32
    return %c0_i32, %c0_i32_0 : i32, i32
  }
  func.func @transform_7(%arg0: i32) -> (i32, i32) {
    %c0_i32 = arith.constant 0 : i32
    %c0_i32_0 = arith.constant 0 : i32
    %c0_i32_1 = arith.constant 0 : i32
    return %c0_i32, %c0_i32_0 : i32, i32
  }
  func.func @transform_8(%arg0: i32) -> (i32, i32) {
    %c0_i32 = arith.constant 0 : i32
    %c0_i32_0 = arith.constant 0 : i32
    %c0_i32_1 = arith.constant 0 : i32
    return %c0_i32, %c0_i32_0 : i32, i32
  }
  func.func @transform_9(%arg0: i32) -> (i32, i32) {
    %c0_i32 = arith.constant 0 : i32
    %c0_i32_0 = arith.constant 0 : i32
    %c0_i32_1 = arith.constant 0 : i32
    return %c0_i32, %c0_i32_0 : i32, i32
  }
  func.func @transform_10(%arg0: i32) -> (i32, i32) {
    %c0_i32 = arith.constant 0 : i32
    %c0_i32_0 = arith.constant 0 : i32
    %c0_i32_1 = arith.constant 0 : i32
    return %c0_i32, %c0_i32_0 : i32, i32
  }
  func.func @transform_11(%arg0: i32) -> (i32, i32) {
    %c0_i32 = arith.constant 0 : i32
    %c0_i32_0 = arith.constant 0 : i32
    %c0_i32_1 = arith.constant 0 : i32
    return %c0_i32, %c0_i32_0 : i32, i32
  }
  func.func @transform_12(%arg0: i32) -> (i32, i32) {
    %c0_i32 = arith.constant 0 : i32
    %c0_i32_0 = arith.constant 0 : i32
    %c0_i32_1 = arith.constant 0 : i32
    return %c0_i32, %c0_i32_0 : i32, i32
  }
  func.func @transform_13(%arg0: i32) -> (i32, i32) {
    %c0_i32 = arith.constant 0 : i32
    %c0_i32_0 = arith.constant 0 : i32
    %c0_i32_1 = arith.constant 0 : i32
    return %c0_i32, %c0_i32_0 : i32, i32
  }
  func.func @transform_14(%arg0: i32) -> (i32, i32) {
    %c0_i32 = arith.constant 0 : i32
    %c0_i32_0 = arith.constant 0 : i32
    %c0_i32_1 = arith.constant 0 : i32
    return %c0_i32, %c0_i32_0 : i32, i32
  }
  func.func @transform_15(%arg0: i32) -> (i32, i32) {
    %c0_i32 = arith.constant 0 : i32
    %c0_i32_0 = arith.constant 0 : i32
    return %arg0, %c0_i32 : i32, i32
  }
}

</mosaic_0001>

<bundles_post_ra>
// kernel: dqn_forward.1
= control target key start
LH: loop header
LB: loop body
LE: loop exit
PB: predicated region body
PF: predicated region fallthrough
CT: control target
= control target key end

     0   :  { %20 = vsyncpa [#allocation3], 0  ;;  %s10162_s0 = inlined_call_operand.vmem [shape: f32[2,42], index: 0, kind: input, shape index: {}]   ;;  %s10163_s1 = inlined_call_operand.hbm [shape: bf16[42,672], index: 1, kind: input, shape index: {}]   ;;  %s10164_s2 = inlined_call_operand.hbm [shape: f32[1,672], index: 2, kind: input, shape index: {}]   ;;  %s10165_s3 = inlined_call_operand.hbm [shape: f32[1,672], index: 3, kind: input, shape index: {}]   ;;  %s10166_s4 = inlined_call_operand.hbm [shape: bf16[672,1344], index: 4, kind: input, shape index: {}]   ;;  %s10167_s5 = inlined_call_operand.hbm [shape: f32[1,1344], index: 5, kind: input, shape index: {}]   ;;  %s10168_s6 = inlined_call_operand.hbm [shape: f32[1,1344], index: 6, kind: input, shape index: {}]   ;;  %s10169_s7 = inlined_call_operand.hbm [shape: bf16[1344,256], index: 7, kind: input, shape index: {}]   ;;  %s10170_s8 = inlined_call_operand.hbm [shape: f32[1,256], index: 8, kind: input, shape index: {}]   ;;  %s10171_s9 = inlined_call_operand.hbm [shape: f32[1,256], index: 9, kind: input, shape index: {}]   ;;  %s10172_s10 = inlined_call_operand.hbm [shape: bf16[256,128], index: 10, kind: input, shape index: {}]   ;;  %s10173_s11 = inlined_call_operand.hbm [shape: f32[1,128], index: 11, kind: input, shape index: {}]   ;;  %s10174_s12 = inlined_call_operand.hbm [shape: f32[1,128], index: 12, kind: input, shape index: {}]   ;;  %s10175_s13 = inlined_call_operand.hbm [shape: bf16[128,128], index: 13, kind: input, shape index: {}]   ;;  %s10176_s14 = inlined_call_operand.hbm [shape: f32[1,128], index: 14, kind: input, shape index: {}]   ;;  %s10177_s15 = inlined_call_operand.hbm [shape: f32[2,128], index: 15, kind: output, shape index: {}]  }
   0x1   :  { %21 = vsyncpa [#allocation6], 0 }
   0x2   :  { %22 = vsyncpa [#allocation9], 0 }
   0x3   :  { %23 = vsyncpa [#allocation12], 0 }
   0x4   :  { %24 = vsyncpa [#allocation15], 0 }
   0x5   :  { %25 = vsyncpa [#allocation18], 0 }
   0x6   :  { %26 = vsyncpa [#allocation21], 0 }
   0x7   :  { %27 = vsyncpa [#allocation24], 0  ;;  %s49_s20 = sshll.u32 %s10164_s2, 4  ;;  %s50_s20 = int_to_ptr.hbm [resolvable:$true] %s49_s20 }
   0x8   :  { %28 = vsyncpa [#allocation4], 0  ;;  %s9700_s21 = smov [#allocation5]   ;;  %s70_s25 = sshll.u32 %s10166_s4, 4  ;;  %s71_s25 = int_to_ptr.hbm [resolvable:$true] %s70_s25 }
   0x9   :  { %s51_s22 = sshll.u32 %s9700_s21, 4  ;;  %s9701_s26 = smov [#allocation8]   ;;  %s52_s22 = int_to_ptr.vmem [resolvable:$true] %s51_s22 }
   0xa   :  { %54 = dma.hbm_to_vmem [thread:$0]  %s50_s20, 96, %s52_s22, [#allocation6]  }
   0xb   :  { %s72_s27 = sshll.u32 %s9701_s26, 4  ;;  %s9702_s28 = smov 704   ;;  %s73_s27 = int_to_ptr.vmem [resolvable:$true] %s72_s27 }
   0xc   :  { %s9703_s29 = smov 44   ;;  %s95_s2 = sshll.u32 %s10168_s6, 4  ;;  %s96_s2 = int_to_ptr.hbm [resolvable:$true] %s95_s2 }
   0xd   :  { %78 = dma.hbm_to_vmem [thread:$0]  %s71_s25, 59136, %s73_s27, [#allocation9], %s9702_s28, %s9702_s28, %s9703_s29  }
   0xe   :  { %s9704_s17 = smov [#allocation11]   ;;  %s119_s4 = sshll.u32 %s10170_s8, 4  ;;  %s120_s4 = int_to_ptr.hbm [resolvable:$true] %s119_s4 }
   0xf   :  { %s97_s18 = sshll.u32 %s9704_s17, 4  ;;  %s9705_s20 = smov [#allocation14]   ;;  %s98_s18 = int_to_ptr.vmem [resolvable:$true] %s97_s18 }
  0x10   :  { %100 = dma.hbm_to_vmem [thread:$0]  %s96_s2, 176, %s98_s18, [#allocation12]  }
  0x11   :  { %s121_s22 = sshll.u32 %s9705_s20, 4  ;;  %s140_s25 = sshll.u32 %s10172_s10, 4  ;;  %s122_s22 = int_to_ptr.vmem [resolvable:$true] %s121_s22  ;;  %s141_s25 = int_to_ptr.hbm [resolvable:$true] %s140_s25 }
  0x12   :  { %124 = dma.hbm_to_vmem [thread:$0]  %s120_s4, 32, %s122_s22, [#allocation15]  }
  0x13   :  { %s9706_s6 = smov [#allocation17]   ;;  %s165_s29 = sshll.u32 %s10174_s12, 4  ;;  %s166_s29 = int_to_ptr.hbm [resolvable:$true] %s165_s29 }
  0x14   :  { %s142_s26 = sshll.u32 %s9706_s6, 4  ;;  %s9707_s30 = smov 64   ;;  %s143_s26 = int_to_ptr.vmem [resolvable:$true] %s142_s26 }
  0x15   :  { %s9708_s8 = smov 4   ;;  %s9709_s16 = smov [#allocation20]  }
  0x16   :  { %148 = dma.hbm_to_vmem [thread:$0]  %s141_s25, 2048, %s143_s26, [#allocation18], %s9707_s30, %s9707_s30, %s9708_s8  }
  0x17   :  { %s167_s2 = sshll.u32 %s9709_s16, 4  ;;  %s35_s18 = sshll.u32 %s10163_s1, 4  ;;  %s168_s2 = int_to_ptr.vmem [resolvable:$true] %s167_s2  ;;  %s36_s18 = int_to_ptr.hbm [resolvable:$true] %s35_s18 }
  0x18   :  { %170 = dma.hbm_to_vmem [thread:$0]  %s166_s29, 16, %s168_s2, [#allocation21]  }
  0x19   :  { %s9710_s19 = smov [#allocation2]   ;;  %s60_s20 = sshll.u32 %s10165_s3, 4  ;;  %s61_s20 = int_to_ptr.hbm [resolvable:$true] %s60_s20 }
  0x1a   :  { %s37_s21 = sshll.u32 %s9710_s19, 4  ;;  %s9711_s22 = smov 384   ;;  %s38_s21 = int_to_ptr.vmem [resolvable:$true] %s37_s21 }
  0x1b   :  { %s9712_s23 = smov 24   ;;  %s9713_s24 = smov [#allocation7]  }
  0x1c   :  { %43 = dma.hbm_to_vmem [thread:$0]  %s36_s18, 2304, %s38_s21, [#allocation3], %s9711_s22, %s9711_s22, %s9712_s23  }
  0x1d   :  { %s62_s25 = sshll.u32 %s9713_s24, 4  ;;  %s84_s1 = sshll.u32 %s10167_s5, 4  ;;  %s63_s25 = int_to_ptr.vmem [resolvable:$true] %s62_s25  ;;  %s85_s1 = int_to_ptr.hbm [resolvable:$true] %s84_s1 }
  0x1e   :  { %65 = dma.hbm_to_vmem [thread:$0]  %s61_s20, 96, %s63_s25, [#allocation6]  }
  0x1f   :  { %s105_s29 = sshll.u32 %s10169_s7, 4  ;;  %s9714_s16 = smov [#allocation10]   ;;  %s106_s29 = int_to_ptr.hbm [resolvable:$true] %s105_s29 }
  0x20   :  { %s86_s2 = sshll.u32 %s9714_s16, 4  ;;  %s9715_s3 = smov [#allocation13]   ;;  %s87_s2 = int_to_ptr.vmem [resolvable:$true] %s86_s2 }
  0x21   :  { %89 = dma.hbm_to_vmem [thread:$0]  %s85_s1, 176, %s87_s2, [#allocation9]  }
  0x22   :  { %s107_s10 = sshll.u32 %s9715_s3, 4  ;;  %s9716_s17 = smov 128   ;;  %s108_s10 = int_to_ptr.vmem [resolvable:$true] %s107_s10 }
  0x23   :  { %s9717_s18 = smov 8   ;;  %s130_s21 = sshll.u32 %s10171_s9, 4  ;;  %s131_s21 = int_to_ptr.hbm [resolvable:$true] %s130_s21 }
  0x24   :  { %113 = dma.hbm_to_vmem [thread:$0]  %s106_s29, 21504, %s108_s10, [#allocation12], %s9716_s17, %s9716_s17, %s9717_s18  }
  0x25   :  { %s9718_s12 = smov [#allocation16]   ;;  %s154_s22 = sshll.u32 %s10173_s11, 4  ;;  %s155_s22 = int_to_ptr.hbm [resolvable:$true] %s154_s22 }
  0x26   :  { %s132_s4 = sshll.u32 %s9718_s12, 4  ;;  %s9719_s23 = smov [#allocation19]   ;;  %s133_s4 = int_to_ptr.vmem [resolvable:$true] %s132_s4 }
  0x27   :  { %135 = dma.hbm_to_vmem [thread:$0]  %s131_s21, 32, %s133_s4, [#allocation15]  }
  0x28   :  { %s156_s24 = sshll.u32 %s9719_s23, 4  ;;  %s175_s26 = sshll.u32 %s10175_s13, 4  ;;  %s157_s24 = int_to_ptr.vmem [resolvable:$true] %s156_s24  ;;  %s176_s26 = int_to_ptr.hbm [resolvable:$true] %s175_s26 }
  0x29   :  { %159 = dma.hbm_to_vmem [thread:$0]  %s155_s22, 16, %s157_s24, [#allocation18]  }
  0x2a   :  { %s189_s27 = sshll.u32 %s10176_s14, 4  ;;  %s9720_s28 = smov [#allocation22]   ;;  %s190_s27 = int_to_ptr.hbm [resolvable:$true] %s189_s27 }
  0x2b   :  { %s177_s29 = sshll.u32 %s9720_s28, 4  ;;  %s9721_s11 = smov [#allocation23]   ;;  %s178_s29 = int_to_ptr.vmem [resolvable:$true] %s177_s29 }
  0x2c   :  { %183 = dma.hbm_to_vmem [thread:$0]  %s176_s26, 1024, %s178_s29, [#allocation21], %s9707_s30, %s9707_s30, %s9708_s8  }
  0x2d   :  { %s191_s16 = sshll.u32 %s9721_s11, 4  ;;  %s192_s16 = int_to_ptr.vmem [resolvable:$true] %s191_s16 }
  0x2e   :  { %194 = dma.hbm_to_vmem [thread:$0]  %s190_s27, 16, %s192_s16, [#allocation24]  }
  0x2f   :  { %9682 = dma.done.wait [#allocation3], 2304  }
  0x30   :  { %9683 = vsyncadd [#allocation3], 4294964992 }
  0x31   :  { %9684 = dma.done.wait [#allocation6], 192  }
  0x32   :  { %9685 = vsyncadd [#allocation6], 4294967104 }
  0x33   :  { %9686 = dma.done.wait [#allocation9], 59312  }
  0x34   :  { %9687 = vsyncadd [#allocation9], 4294907984 }
  0x35   :  { %9688 = dma.done.wait [#allocation12], 21680  }
  0x36   :  { %9689 = vsyncadd [#allocation12], 4294945616 }
  0x37   :  { %9690 = dma.done.wait [#allocation15], 64  }
  0x38   :  { %9691 = vsyncadd [#allocation15], 4294967232 }
  0x39   :  { %9692 = dma.done.wait [#allocation18], 2064  }
  0x3a   :  { %9693 = vsyncadd [#allocation18], 4294965232 }
  0x3b   :  { %9694 = dma.done.wait [#allocation21], 1040  }
  0x3c   :  { %9695 = vsyncadd [#allocation21], 4294966256 }
  0x3d   :  { %9696 = dma.done.wait [#allocation24], 16  }
  0x3e   :  { %9697 = vsyncadd [#allocation24], 4294967280  ;;  %vm360_vm0 = vcmask 1044480   ;;  %v5965_v0 = vld [vmem:[#allocation2 + $0x60] sm:$0xf]  ;;  %vm356_vm1 = vcmask 343040  }
  0x3f   :  { %v8637_v1 = vld [vmem:[#allocation2 + $0x74] sm:$0x10]  ;;  %v8634_v2 = vld [vmem:[#allocation2 + $0x64] sm:$0xf]  ;;  %v5967_v4 = vld [vmem:[#allocation2 + $0x78] sm:$0x10] }
  0x40   :  { %v5966_v3 = vor.u32 %v8637_v1, %v5965_v0  ;;  %v5973_v5 = vld [vmem:[#allocation2 + $0x68] sm:$0xf]  ;;  %v8638_v6 = vld [vmem:[#allocation2 + $0x7c] sm:$0x10]  ;;  %v5970_v7 = vor.u32 %v8634_v2, %v5967_v4  ;;  %v8635_v9 = vld [vmem:[#allocation2 + $0x6c] sm:$0xf] }
  0x41   :  { %v5974_v8 = vor.u32 %v8638_v6, %v5973_v5  ;;  %v5975_v10 = vld [vmem:[#allocation2 + $0x80] sm:$0x10]  ;;  %v5941_v11 = vld [vmem:[#allocation2 + $0x30] sm:$0xf]  ;;  %v8631_v14 = vld [vmem:[#allocation2 + $0x44] sm:$0xf0] }
  0x42   :  { %v362_v12 = vsel %vm360_vm0, %v5966_v3, 0  ;;  %v5978_v13 = vor.u32 %v8635_v9, %v5975_v10  ;;  %v8628_v15 = vld [vmem:[#allocation2 + $0x34] sm:$0xf]  ;;  %v365_v16 = vsel %vm360_vm0, %v5970_v7, 0  ;;  %v5942_v18 = vor.u32 %v8631_v14, %v5941_v11  ;;  %v5943_v19 = vld [vmem:[#allocation2 + $0x48] sm:$0xf0] }
  0x43   :  { %384 = vmatpush.bf16.msra.mxu0 %v362_v12  ;;  %v368_v17 = vsel %vm360_vm0, %v5974_v8, 0  ;;  %v5949_v20 = vld [vmem:[#allocation2 + $0x38] sm:$0xf]  ;;  %397 = vmatpush.bf16.msra.mxu1 %v365_v16  ;;  %v5946_v22 = vor.u32 %v8628_v15, %v5943_v19  ;;  %v8632_v23 = vld [vmem:[#allocation2 + $0x4c] sm:$0xf0]  ;;  %v252_v29 = vld [vmem:[%s10162_s0] sm:$0xff] }
  0x44   :  { %410 = vmatpush.bf16.msra.mxu2 %v368_v17  ;;  %v371_v21 = vsel %vm360_vm0, %v5978_v13, 0  ;;  %v8629_v24 = vld [vmem:[#allocation2 + $0x3c] sm:$0xf]  ;;  %v5950_v25 = vor.u32 %v8632_v23, %v5949_v20  ;;  %v5951_v26 = vld [vmem:[#allocation2 + $0x50] sm:$0xf0]  ;;  %v9860_v46 = vpack.c.bf16 %v252_v29, %v252_v29  ;;  %vm3365_vm2 = vcmask 261120  }
  0x45   :  { %423 = vmatpush.bf16.msra.mxu3 %v371_v21  ;;  %v5917_v27 = vld [vmem:[#allocation2] sm:$0xf]  ;;  %v8625_v28 = vld [vmem:[#allocation2 + $0x14] sm:$0xf0]  ;;  %v5954_v30 = vor.u32 %v8629_v24, %v5951_v26  ;;  %v8622_v31 = vld [vmem:[#allocation2 + $0x4] sm:$0xf] }
  0x46   :  { %v5919_v32 = vld [vmem:[#allocation2 + $0x18] sm:$0xf0]  ;;  %v5925_v33 = vld [vmem:[#allocation2 + $0x8] sm:$0xf]  ;;  %v5918_v34 = vor.u32 %v8625_v28, %v5917_v27  ;;  %v8626_v35 = vld [vmem:[#allocation2 + $0x1c] sm:$0xf0] }
  0x47   :  { %385 = vmatpush.bf16.msra.mxu0 %v5942_v18  ;;  %v8623_v36 = vld [vmem:[#allocation2 + $0xc] sm:$0xf]  ;;  %v5927_v37 = vld [vmem:[#allocation2 + $0x20] sm:$0xf0]  ;;  %398 = vmatpush.bf16.msra.mxu1 %v5946_v22  ;;  %v5922_v38 = vor.u32 %v8622_v31, %v5919_v32  ;;  %v5926_v39 = vor.u32 %v8626_v35, %v5925_v33  ;;  %v5981_v40 = vld [vmem:[#allocation2 + $0x70] sm:$0xf] }
  0x48   :  { %411 = vmatpush.bf16.msra.mxu2 %v5950_v25  ;;  %v8639_v41 = vld [vmem:[#allocation2 + $0x84] sm:$0x10]  ;;  %v8636_v42 = vld [vmem:[#allocation2 + $0x74] sm:$0xf]  ;;  %v5930_v43 = vor.u32 %v8623_v36, %v5927_v37  ;;  %v5983_v45 = vld [vmem:[#allocation2 + $0x88] sm:$0x10] }
  0x49   :  { %424 = vmatpush.bf16.msra.mxu3 %v5954_v30  ;;  %v5982_v44 = vor.u32 %v8639_v41, %v5981_v40  ;;  %v5986_v47 = vor.u32 %v8636_v42, %v5983_v45  ;;  %v5957_v48 = vld [vmem:[#allocation2 + $0x40] sm:$0xf]  ;;  %v8633_v49 = vld [vmem:[#allocation2 + $0x54] sm:$0xf0]  ;;  %v8630_v51 = vld [vmem:[#allocation2 + $0x44] sm:$0xf] }
  0x4a   :  { %v5959_v52 = vld [vmem:[#allocation2 + $0x58] sm:$0xf0]  ;;  %v6303_v54 = vld [vmem:[#allocation8 + $0x268] sm:$0xf]  ;;  %v5958_v55 = vor.u32 %v8633_v49, %v5957_v48  ;;  %v8722_v56 = vld [vmem:[#allocation8 + $0x290] sm:$0xf0] }
  0x4b   :  { %386 = vmatpush.bf16.msra.mxu0 %v5918_v34  ;;  %v374_v50 = vsel %vm360_vm0, %v5982_v44, 0  ;;  %399 = vmatpush.bf16.msra.mxu1 %v5922_v38  ;;  %v377_v53 = vsel %vm360_vm0, %v5986_v47, 0  ;;  %v6259_v57 = vld [vmem:[#allocation8 + $0x210] sm:$0xf]  ;;  %v8711_v58 = vld [vmem:[#allocation8 + $0x238] sm:$0xf0]  ;;  %v5962_v59 = vor.u32 %v8630_v51, %v5959_v52  ;;  %v6304_v63 = vor.u32 %v8722_v56, %v6303_v54 }
  0x4c   :  { %412 = vmatpush.bf16.msra.mxu2 %v5926_v39  ;;  %v5933_v60 = vld [vmem:[#allocation2 + $0x10] sm:$0xf]  ;;  %v8627_v61 = vld [vmem:[#allocation2 + $0x24] sm:$0xf0]  ;;  %v8624_v62 = vld [vmem:[#allocation2 + $0x14] sm:$0xf]  ;;  %v6260_v3 = vor.u32 %v8711_v58, %v6259_v57 }
  0x4d   :  { %425 = vmatpush.bf16.msra.mxu3 %v5930_v43  ;;  %v5935_v0 = vld [vmem:[#allocation2 + $0x28] sm:$0xf0]  ;;  %v7007_v1 = vld [vmem:[#allocation8 + $0x7e8] sm:$0xf]  ;;  %v8898_v2 = vld [vmem:[#allocation8 + $0x810] sm:$0xf0]  ;;  %v5934_v4 = vor.u32 %v8627_v61, %v5933_v60 }
  0x4e   :  { %5987 = vmatmul.msk.bf16.vlgmr.msra.gmra.mxu0 %vm356_vm1, %v9860_v46  ;;  %5988 = vmatmul.msk.bf16.vlgmr.msra.gmra.mxu1 %vm356_vm1, %v9860_v46  ;;  %v6215_v5 = vld [vmem:[#allocation8 + $0x1b8] sm:$0xf]  ;;  %v8700_v6 = vld [vmem:[#allocation8 + $0x1e0] sm:$0xf0]  ;;  %v5938_v7 = vor.u32 %v8624_v62, %v5935_v0  ;;  %v7008_v8 = vor.u32 %v8898_v2, %v7007_v1  ;;  %v7359_v9 = vld [vmem:[#allocation8 + $0xaa8] sm:$0xf] }
  0x4f   :  { %436 = vmatpush.bf16.msrb.mxu0 %v374_v50  ;;  %449 = vmatpush.bf16.msrb.mxu1 %v377_v53  ;;  %v8986_v10 = vld [vmem:[#allocation8 + $0xad0] sm:$0xf0]  ;;  %v6963_v11 = vld [vmem:[#allocation8 + $0x790] sm:$0xf]  ;;  %v8887_v12 = vld [vmem:[#allocation8 + $0x7b8] sm:$0xf0]  ;;  %v6216_v14 = vor.u32 %v8700_v6, %v6215_v5 }
  0x50   :  { %5989 = vmatmul.msk.bf16.vlgmr.msra.gmra.mxu2 %vm356_vm1, %v9860_v46  ;;  %5990 = vmatmul.msk.bf16.vlgmr.msra.gmra.mxu3 %vm356_vm1, %v9860_v46  ;;  %v7360_v13 = vor.u32 %v8986_v10, %v7359_v9  ;;  %v7315_v15 = vld [vmem:[#allocation8 + $0xa50] sm:$0xf]  ;;  %v8975_v16 = vld [vmem:[#allocation8 + $0xa78] sm:$0xf0]  ;;  %v6171_v17 = vld [vmem:[#allocation8 + $0x160] sm:$0xf]  ;;  %v6964_v19 = vor.u32 %v8887_v12, %v6963_v11 }
  0x51   :  { %3369 = vmatpush.bf16.msrb.mxu2 %v6304_v63  ;;  %v8689_v18 = vld [vmem:[#allocation8 + $0x188] sm:$0xf0]  ;;  %v6655_v20 = vld [vmem:[#allocation8 + $0x528] sm:$0xf]  ;;  %v8810_v21 = vld [vmem:[#allocation8 + $0x550] sm:$0xf0]  ;;  %v7316_v24 = vor.u32 %v8975_v16, %v7315_v15 }
  0x52   :  { %v6919_v22 = vld [vmem:[#allocation8 + $0x738] sm:$0xf]  ;;  %v8876_v23 = vld [vmem:[#allocation8 + $0x760] sm:$0xf0]  ;;  %v6656_v25 = vor.u32 %v8810_v21, %v6655_v20  ;;  %v6172_v26 = vor.u32 %v8689_v18, %v6171_v17  ;;  %v6127_v27 = vld [vmem:[#allocation8 + $0x108] sm:$0xf] }
  0x53   :  { %437 = vmatpush.bf16.msrb.mxu0 %v5958_v55  ;;  %450 = vmatpush.bf16.msrb.mxu1 %v5962_v59  ;;  %v8678_v28 = vld [vmem:[#allocation8 + $0x130] sm:$0xf0]  ;;  %v6611_v29 = vld [vmem:[#allocation8 + $0x4d0] sm:$0xf]  ;;  %v7271_v30 = vld [vmem:[#allocation8 + $0x9f8] sm:$0xf]  ;;  %v6920_v34 = vor.u32 %v8876_v23, %v6919_v22 }
  0x54   :  { %3382 = vmatpush.bf16.msrb.mxu3 %v6656_v25  ;;  %v8964_v31 = vld [vmem:[#allocation8 + $0xa20] sm:$0xf0]  ;;  %v8799_v32 = vld [vmem:[#allocation8 + $0x4f8] sm:$0xf0]  ;;  %v6567_v35 = vld [vmem:[#allocation8 + $0x478] sm:$0xf]  ;;  %v6128_v37 = vor.u32 %v8678_v28, %v6127_v27 }
  0x55   :  { %3370 = vmatpush.bf16.msrb.mxu2 %v6260_v3  ;;  %v6612_v33 = vor.u32 %v8799_v32, %v6611_v29  ;;  %v8788_v36 = vld [vmem:[#allocation8 + $0x4a0] sm:$0xf0]  ;;  %v6875_v38 = vld [vmem:[#allocation8 + $0x6e0] sm:$0xf]  ;;  %v8865_v39 = vld [vmem:[#allocation8 + $0x708] sm:$0xf0]  ;;  %v7272_v41 = vor.u32 %v8964_v31, %v7271_v30 }
  0x56   :  { %v6083_v40 = vld [vmem:[#allocation8 + $0xb0] sm:$0xf]  ;;  %v8667_v42 = vld [vmem:[#allocation8 + $0xd8] sm:$0xf0]  ;;  %v7227_v43 = vld [vmem:[#allocation8 + $0x9a0] sm:$0xf]  ;;  %v6568_v45 = vor.u32 %v8788_v36, %v6567_v35  ;;  %v6876_v48 = vor.u32 %v8865_v39, %v6875_v38 }
  0x57   :  { %438 = vmatpush.bf16.msrb.mxu0 %v5934_v4  ;;  %451 = vmatpush.bf16.msrb.mxu1 %v5938_v7  ;;  %v8953_v44 = vld [vmem:[#allocation8 + $0x9c8] sm:$0xf0]  ;;  %v6523_v47 = vld [vmem:[#allocation8 + $0x420] sm:$0xf]  ;;  %v6084_v50 = vor.u32 %v8667_v42, %v6083_v40  ;;  %v6831_v51 = vld [vmem:[#allocation8 + $0x688] sm:$0xf] }
  0x58   :  { %3383 = vmatpush.bf16.msrb.mxu3 %v6612_v33  ;;  %v8777_v49 = vld [vmem:[#allocation8 + $0x448] sm:$0xf0]  ;;  %v8854_v52 = vld [vmem:[#allocation8 + $0x6b0] sm:$0xf0]  ;;  %v6039_v53 = vld [vmem:[#allocation8 + $0x58] sm:$0xf]  ;;  %v7228_v54 = vor.u32 %v8953_v44, %v7227_v43 }
  0x59   :  { %3371 = vmatpush.bf16.msrb.mxu2 %v6216_v14  ;;  %v8656_v55 = vld [vmem:[#allocation8 + $0x80] sm:$0xf0]  ;;  %v7183_v56 = vld [vmem:[#allocation8 + $0x948] sm:$0xf]  ;;  %v8942_v57 = vld [vmem:[#allocation8 + $0x970] sm:$0xf0]  ;;  %v6524_v58 = vor.u32 %v8777_v49, %v6523_v47  ;;  %v6832_v61 = vor.u32 %v8854_v52, %v6831_v51 }
  0x5a   :  { %v6479_v59 = vld [vmem:[#allocation8 + $0x3c8] sm:$0xf]  ;;  %v8766_v60 = vld [vmem:[#allocation8 + $0x3f0] sm:$0xf0]  ;;  %v6040_v62 = vor.u32 %v8656_v55, %v6039_v53  ;;  %v8843_v63 = vld [vmem:[#allocation8 + $0x658] sm:$0xf0]  ;;  %v7184_v2 = vor.u32 %v8942_v57, %v7183_v56 }
  0x5b   :  { %3395 = vmatpush.bf16.msra.mxu0 %v7008_v8  ;;  %3408 = vmatpush.bf16.msra.mxu1 %v7360_v13  ;;  %v5995_v0 = vld [vmem:[#allocation8] sm:$0xf]  ;;  %v8645_v1 = vld [vmem:[#allocation8 + $0x28] sm:$0xf0]  ;;  %v7711_v3 = vld [vmem:[#allocation8 + $0xd68] sm:$0xf]  ;;  %v6480_v6 = vor.u32 %v8766_v60, %v6479_v59 }
  0x5c   :  { %3384 = vmatpush.bf16.msrb.mxu3 %v6568_v45  ;;  %v7139_v4 = vld [vmem:[#allocation8 + $0x8f0] sm:$0xf]  ;;  %v8931_v5 = vld [vmem:[#allocation8 + $0x918] sm:$0xf0]  ;;  %v9074_v7 = vld [vmem:[#allocation8 + $0xd90] sm:$0xf0]  ;;  %v5996_v13 = vor.u32 %v8645_v1, %v5995_v0 }
  0x5d   :  { %3372 = vmatpush.bf16.msrb.mxu2 %v6172_v26  ;;  %v6435_v8 = vld [vmem:[#allocation8 + $0x370] sm:$0xf]  ;;  %v8755_v9 = vld [vmem:[#allocation8 + $0x398] sm:$0xf0]  ;;  %v6743_v11 = vld [vmem:[#allocation8 + $0x5d8] sm:$0xf]  ;;  %v7140_v14 = vor.u32 %v8931_v5, %v7139_v4  ;;  %v7712_v15 = vor.u32 %v9074_v7, %v7711_v3 }
  0x5e   :  { %5991 = vmatmul.msk.bf16.vlgmr.msrb.gmra.mxu0 %vm356_vm1, %v9860_v46  ;;  %5992 = vmatmul.msk.bf16.vlgmr.msrb.gmra.mxu1 %vm356_vm1, %v9860_v46  ;;  %v6787_v46 = vld [vmem:[#allocation8 + $0x630] sm:$0xf]  ;;  %v8832_v12 = vld [vmem:[#allocation8 + $0x600] sm:$0xf0]  ;;  %v7095_v17 = vld [vmem:[#allocation8 + $0x898] sm:$0xf] }
  0x5f   :  { %3396 = vmatpush.bf16.msra.mxu0 %v6964_v19  ;;  %3409 = vmatpush.bf16.msra.mxu1 %v7316_v24  ;;  %v6788_v10 = vor.u32 %v8843_v63, %v6787_v46  ;;  %v7667_v16 = vld [vmem:[#allocation8 + $0xd10] sm:$0xf]  ;;  %v8920_v18 = vld [vmem:[#allocation8 + $0x8c0] sm:$0xf0]  ;;  %v6436_v19 = vor.u32 %v8755_v9, %v6435_v8  ;;  %v9063_v20 = vld [vmem:[#allocation8 + $0xd38] sm:$0xf0]  ;;  %v6744_v23 = vor.u32 %v8832_v12, %v6743_v11 }
  0x60   :  { %3385 = vmatpush.bf16.msrb.mxu3 %v6524_v58  ;;  %v6391_v21 = vld [vmem:[#allocation8 + $0x318] sm:$0xf]  ;;  %v8744_v22 = vld [vmem:[#allocation8 + $0x340] sm:$0xf0]  ;;  %v6699_v24 = vld [vmem:[#allocation8 + $0x580] sm:$0xf]  ;;  %v7096_v28 = vor.u32 %v8920_v18, %v7095_v17  ;;  %v7668_v29 = vor.u32 %v9063_v20, %v7667_v16 }
  0x61   :  { %3373 = vmatpush.bf16.msrb.mxu2 %v6128_v37  ;;  %v8821_v25 = vld [vmem:[#allocation8 + $0x5a8] sm:$0xf0]  ;;  %v6305_v27 = vld [vmem:[#allocation8 + $0x294] sm:$0xf0]  ;;  %v7051_v31 = vld [vmem:[#allocation8 + $0x840] sm:$0xf]  ;;  %v6392_v33 = vor.u32 %v8744_v22, %v6391_v21 }
  0x62   :  { %v8717_v26 = vld [vmem:[#allocation8 + $0x26c] sm:$0xf]  ;;  %v7623_v30 = vld [vmem:[#allocation8 + $0xcb8] sm:$0xf]  ;;  %v6700_v37 = vor.u32 %v8821_v25, %v6699_v24  ;;  %v6261_v42 = vld [vmem:[#allocation8 + $0x23c] sm:$0xf0] }
  0x63   :  { %3397 = vmatpush.bf16.msra.mxu0 %v6920_v34  ;;  %3410 = vmatpush.bf16.msra.mxu1 %v7272_v41  ;;  %v8909_v32 = vld [vmem:[#allocation8 + $0x868] sm:$0xf0]  ;;  %v9052_v34 = vld [vmem:[#allocation8 + $0xce0] sm:$0xf0]  ;;  %v6657_v36 = vld [vmem:[#allocation8 + $0x554] sm:$0xf0]  ;;  %v6308_v38 = vor.u32 %v8717_v26, %v6305_v27 }
  0x64   :  { %3386 = vmatpush.bf16.msrb.mxu3 %v6480_v6  ;;  %v8805_v35 = vld [vmem:[#allocation8 + $0x52c] sm:$0xf]  ;;  %v7052_v39 = vor.u32 %v8909_v32, %v7051_v31  ;;  %v7624_v40 = vor.u32 %v9052_v34, %v7623_v30  ;;  %v8706_v41 = vld [vmem:[#allocation8 + $0x214] sm:$0xf]  ;;  %v7579_v44 = vld [vmem:[#allocation8 + $0xc60] sm:$0xf] }
  0x65   :  { %3374 = vmatpush.bf16.msrb.mxu2 %v6084_v50  ;;  %v6660_v43 = vor.u32 %v8805_v35, %v6657_v36  ;;  %v9041_v45 = vld [vmem:[#allocation8 + $0xc88] sm:$0xf0]  ;;  %v6264_v47 = vor.u32 %v8706_v41, %v6261_v42  ;;  %v8695_v49 = vld [vmem:[#allocation8 + $0x1bc] sm:$0xf]  ;;  %v6217_v50 = vld [vmem:[#allocation8 + $0x1e4] sm:$0xf0] }
  0x66   :  { %v7535_v51 = vld [vmem:[#allocation8 + $0xc08] sm:$0xf]  ;;  %v9030_v52 = vld [vmem:[#allocation8 + $0xc30] sm:$0xf0]  ;;  %v6220_v53 = vor.u32 %v8695_v49, %v6217_v50  ;;  %v8684_v55 = vld [vmem:[#allocation8 + $0x164] sm:$0xf] }
  0x67   :  { %3398 = vmatpush.bf16.msra.mxu0 %v6876_v48  ;;  %3411 = vmatpush.bf16.msra.mxu1 %v7228_v54  ;;  %v7580_v48 = vor.u32 %v9041_v45, %v7579_v44  ;;  %v7536_v54 = vor.u32 %v9030_v52, %v7535_v51  ;;  %v6173_v56 = vld [vmem:[#allocation8 + $0x18c] sm:$0xf0]  ;;  %v9019_v59 = vld [vmem:[#allocation8 + $0xbd8] sm:$0xf0]  ;;  %v6613_v46 = vld [vmem:[#allocation8 + $0x4fc] sm:$0xf0] }
  0x68   :  { %3387 = vmatpush.bf16.msrb.mxu3 %v6436_v19  ;;  %v6176_v57 = vor.u32 %v8684_v55, %v6173_v56  ;;  %v7491_v58 = vld [vmem:[#allocation8 + $0xbb0] sm:$0xf]  ;;  %v8673_v63 = vld [vmem:[#allocation8 + $0x10c] sm:$0xf]  ;;  %v6129_v0 = vld [vmem:[#allocation8 + $0x134] sm:$0xf0] }
  0x69   :  { %3375 = vmatpush.bf16.msrb.mxu2 %v6040_v62  ;;  %v7492_v60 = vor.u32 %v9019_v59, %v7491_v58  ;;  %v6347_v1 = vld [vmem:[#allocation8 + $0x2c0] sm:$0xf]  ;;  %v8733_v3 = vld [vmem:[#allocation8 + $0x2e8] sm:$0xf0]  ;;  %v7447_v4 = vld [vmem:[#allocation8 + $0xb58] sm:$0xf] }
  0x6a   :  { %v6348_v5 = vor.u32 %v8733_v3, %v6347_v1  ;;  %v9008_v6 = vld [vmem:[#allocation8 + $0xb80] sm:$0xf0]  ;;  %v7799_v7 = vld [vmem:[#allocation8 + $0xe18] sm:$0xf]  ;;  %v8783_v11 = vld [vmem:[#allocation8 + $0x47c] sm:$0xf] }
  0x6b   :  { %3399 = vmatpush.bf16.msra.mxu0 %v6832_v61  ;;  %3412 = vmatpush.bf16.msra.mxu1 %v7184_v2  ;;  %v8794_v61 = vld [vmem:[#allocation8 + $0x4d4] sm:$0xf]  ;;  %v6132_v2 = vor.u32 %v8673_v63, %v6129_v0  ;;  %v9096_v8 = vld [vmem:[#allocation8 + $0xe40] sm:$0xf0]  ;;  %v7448_v9 = vor.u32 %v9008_v6, %v7447_v4  ;;  %v6569_v12 = vld [vmem:[#allocation8 + $0x4a4] sm:$0xf0] }
  0x6c   :  { %3388 = vmatpush.bf16.msrb.mxu3 %v6392_v33  ;;  %v6616_v62 = vor.u32 %v8794_v61, %v6613_v46  ;;  %v7403_v17 = vld [vmem:[#allocation8 + $0xb00] sm:$0xf]  ;;  %v8997_v18 = vld [vmem:[#allocation8 + $0xb28] sm:$0xf0]  ;;  %v6525_v24 = vld [vmem:[#allocation8 + $0x44c] sm:$0xf0] }
  0x6d   :  { %3376 = vmatpush.bf16.msrb.mxu2 %v5996_v13  ;;  %v8662_v13 = vld [vmem:[#allocation8 + $0xb4] sm:$0xf]  ;;  %v7404_v19 = vor.u32 %v8997_v18, %v7403_v17  ;;  %v7755_v20 = vld [vmem:[#allocation8 + $0xdc0] sm:$0xf]  ;;  %v9085_v21 = vld [vmem:[#allocation8 + $0xde8] sm:$0xf0] }
  0x6e   :  { %v7756_v22 = vor.u32 %v9085_v21, %v7755_v20  ;;  %v8651_v26 = vld [vmem:[#allocation8 + $0x5c] sm:$0xf]  ;;  %v6041_v27 = vld [vmem:[#allocation8 + $0x84] sm:$0xf0]  ;;  %v6481_v30 = vld [vmem:[#allocation8 + $0x3f4] sm:$0xf0] }
  0x6f   :  { %3400 = vmatpush.bf16.msra.mxu0 %v6788_v10  ;;  %3413 = vmatpush.bf16.msra.mxu1 %v7140_v14  ;;  %v7800_v10 = vor.u32 %v9096_v8, %v7799_v7  ;;  %v6572_v14 = vor.u32 %v8783_v11, %v6569_v12  ;;  %v8640_v32 = vld [vmem:[#allocation8 + $0x4] sm:$0xf]  ;;  %v5997_v33 = vld [vmem:[#allocation8 + $0x2c] sm:$0xf0]  ;;  %v8750_v35 = vld [vmem:[#allocation8 + $0x374] sm:$0xf] }
  0x70   :  { %3389 = vmatpush.bf16.msrb.mxu3 %v6348_v5  ;;  %v6000_v34 = vor.u32 %v8640_v32, %v5997_v33  ;;  %v6437_v36 = vld [vmem:[#allocation8 + $0x39c] sm:$0xf0]  ;;  %v8728_v41 = vld [vmem:[#allocation8 + $0x2c4] sm:$0xf]  ;;  %v6349_v42 = vld [vmem:[#allocation8 + $0x2ec] sm:$0xf0] }
  0x71   :  { %3421 = vmatpush.bf16.msra.mxu2 %v7712_v15  ;;  %v6085_v15 = vld [vmem:[#allocation8 + $0xdc] sm:$0xf0]  ;;  %v9876_v44 = vld [vmem:[#allocation5] sm:$0x3f]  ;;  %v9878_v45 = vld [vmem:[#allocation7] sm:$0x3f] }
  0x72   :  { %v6088_v16 = vor.u32 %v8662_v13, %v6085_v15  ;;  %v479_v49 = vperm.slane %v9878_v45, 0  ;;  %v480_v51 = vperm.slane %v9878_v45, 1  ;;  %v8981_v56 = vld [vmem:[#allocation8 + $0xaac] sm:$0xf]  ;;  %v461_v59 = vperm.slane %v9876_v44, 2 }
  0x73   :  { %3401 = vmatpush.bf16.msra.mxu0 %v6744_v23  ;;  %3414 = vmatpush.bf16.msra.mxu1 %v7096_v28  ;;  %v8772_v23 = vld [vmem:[#allocation8 + $0x424] sm:$0xf]  ;;  %v6044_v28 = vor.u32 %v8651_v26, %v6041_v27  ;;  %v7009_v61 = vld [vmem:[#allocation8 + $0x814] sm:$0xf0]  ;;  %v481_v0 = vperm.slane %v9878_v45, 2  ;;  %v482_v4 = vperm.slane %v9878_v45, 3 }
  0x74   :  { %3440 = vmatpush.bf16.msra.mxu3 %v7800_v10  ;;  %v6528_v25 = vor.u32 %v8772_v23, %v6525_v24  ;;  %v8970_v6 = vld [vmem:[#allocation8 + $0xa54] sm:$0xf]  ;;  %v7317_v7 = vld [vmem:[#allocation8 + $0xa7c] sm:$0xf0]  ;;  %v7713_v17 = vld [vmem:[#allocation8 + $0xd94] sm:$0xf0] }
  0x75   :  { %3422 = vmatpush.bf16.msra.mxu2 %v7668_v29  ;;  %v8761_v29 = vld [vmem:[#allocation8 + $0x3cc] sm:$0xf]  ;;  %v8882_v12 = vld [vmem:[#allocation8 + $0x794] sm:$0xf]  ;;  %v6965_v13 = vld [vmem:[#allocation8 + $0x7bc] sm:$0xf0] }
  0x76   :  { %v6484_v31 = vor.u32 %v8761_v29, %v6481_v30  ;;  %v8959_v20 = vld [vmem:[#allocation8 + $0x9fc] sm:$0xf]  ;;  %v7273_v23 = vld [vmem:[#allocation8 + $0xa24] sm:$0xf0]  ;;  %v483_v32 = vperm.slane %v9878_v45, 4  ;;  %v464_v33 = vperm.slane %v9876_v44, 5 }
  0x77   :  { %3402 = vmatpush.bf16.msra.mxu0 %v6700_v37  ;;  %3415 = vmatpush.bf16.msra.mxu1 %v7052_v39  ;;  %v6440_v37 = vor.u32 %v8750_v35, %v6437_v36  ;;  %v6393_v39 = vld [vmem:[#allocation8 + $0x344] sm:$0xf0]  ;;  %v9091_v24 = vld [vmem:[#allocation8 + $0xe1c] sm:$0xf]  ;;  %v7276_v35 = vor.u32 %v8959_v20, %v7273_v23  ;;  %v9058_v36 = vld [vmem:[#allocation8 + $0xd14] sm:$0xf] }
  0x78   :  { %3441 = vmatpush.bf16.msra.mxu3 %v7756_v22  ;;  %v6968_v22 = vor.u32 %v8882_v12, %v6965_v13  ;;  %v6921_v29 = vld [vmem:[#allocation8 + $0x764] sm:$0xf0]  ;;  %v8926_v12 = vld [vmem:[#allocation8 + $0x8f4] sm:$0xf]  ;;  %v7141_v13 = vld [vmem:[#allocation8 + $0x91c] sm:$0xf0] }
  0x79   :  { %3423 = vmatpush.bf16.msra.mxu2 %v7624_v40  ;;  %v7144_v20 = vor.u32 %v8926_v12, %v7141_v13  ;;  %v6663_v23 = vld [vmem:[#allocation8 + $0x530] sm:$0xf]  ;;  %v8877_v12 = vld [vmem:[#allocation8 + $0x768] sm:$0xf0]  ;;  %vm5331_vm3 = vcmask 523264  }
  0x7b   :  { %3447 = vmatpush.bf16.msrb.mxu0 %v6308_v38  ;;  %3460 = vmatpush.bf16.msrb.mxu1 %v6660_v43  ;;  %v8739_v38 = vld [vmem:[#allocation8 + $0x31c] sm:$0xf]  ;;  %v6352_v43 = vor.u32 %v8728_v41, %v6349_v42  ;;  %v7229_v42 = vld [vmem:[#allocation8 + $0x9cc] sm:$0xf0] }
  0x7c   :  { %v6396_v40 = vor.u32 %v8739_v38, %v6393_v39  ;;  %v8948_v38 = vld [vmem:[#allocation8 + $0x9a4] sm:$0xf] }
  0x7d   :  { %3424 = vmatpush.bf16.msra.mxu2 %v7580_v48  ;;  %v460_v48 = vperm.slane %v9876_v44, 1 }
  0x7f   :  { %3448 = vmatpush.bf16.msrb.mxu0 %v6264_v47  ;;  %3461 = vmatpush.bf16.msrb.mxu1 %v6616_v62  ;;  %v459_v47 = vperm.slane %v9876_v44, 0  ;;  %v462_v62 = vperm.slane %v9876_v44, 3 }
  0x81   :  { %3425 = vmatpush.bf16.msra.mxu2 %v7536_v54 }
  0x83   :  { %3449 = vmatpush.bf16.msrb.mxu0 %v6220_v53  ;;  %3462 = vmatpush.bf16.msrb.mxu1 %v6572_v14 }
  0x85   :  { %3426 = vmatpush.bf16.msra.mxu2 %v7492_v60  ;;  %v8893_v60 = vld [vmem:[#allocation8 + $0x7ec] sm:$0xf] }
  0x86   :  { %v7012_v5 = vor.u32 %v8893_v60, %v7009_v61 }
  0x87   :  { %3450 = vmatpush.bf16.msrb.mxu0 %v6176_v57  ;;  %3463 = vmatpush.bf16.msrb.mxu1 %v6528_v25  ;;  %v7361_v57 = vld [vmem:[#allocation8 + $0xad4] sm:$0xf0]  ;;  %v7801_v25 = vld [vmem:[#allocation8 + $0xe44] sm:$0xf0] }
  0x88   :  { %v7364_v1 = vor.u32 %v8981_v56, %v7361_v57  ;;  %v7804_v39 = vor.u32 %v9091_v24, %v7801_v25  ;;  %v7232_v57 = vor.u32 %v8948_v38, %v7229_v42  ;;  %v8811_v25 = vld [vmem:[#allocation8 + $0x558] sm:$0xf0]  ;;  %v7053_v42 = vld [vmem:[#allocation8 + $0x86c] sm:$0xf0] }
  0x89   :  { %3427 = vmatpush.bf16.msra.mxu2 %v7448_v9 }
  0x8b   :  { %3451 = vmatpush.bf16.msrb.mxu0 %v6132_v2  ;;  %3464 = vmatpush.bf16.msrb.mxu1 %v6484_v31  ;;  %v463_v31 = vperm.slane %v9876_v44, 4  ;;  %v484_v44 = vperm.slane %v9878_v45, 5  ;;  %v8937_v45 = vld [vmem:[#allocation8 + $0x94c] sm:$0xf] }
  0x8d   :  { %3428 = vmatpush.bf16.msra.mxu2 %v7404_v19  ;;  %v7320_v19 = vor.u32 %v8970_v6, %v7317_v7  ;;  %v9036_v7 = vld [vmem:[#allocation8 + $0xc64] sm:$0xf] }
  0x8f   :  { %3452 = vmatpush.bf16.msrb.mxu0 %v6088_v16  ;;  %3465 = vmatpush.bf16.msrb.mxu1 %v6440_v37  ;;  %v9069_v16 = vld [vmem:[#allocation8 + $0xd6c] sm:$0xf]  ;;  %v7669_v37 = vld [vmem:[#allocation8 + $0xd3c] sm:$0xf0] }
  0x90   :  { %v7716_v27 = vor.u32 %v9069_v16, %v7713_v17  ;;  %v6789_v16 = vld [vmem:[#allocation8 + $0x65c] sm:$0xf0] }
  0x93   :  { %3453 = vmatpush.bf16.msrb.mxu0 %v6044_v28  ;;  %3466 = vmatpush.bf16.msrb.mxu1 %v6396_v40  ;;  %v8871_v28 = vld [vmem:[#allocation8 + $0x73c] sm:$0xf] }
  0x94   :  { %v6924_v41 = vor.u32 %v8871_v28, %v6921_v29  ;;  %v8827_v28 = vld [vmem:[#allocation8 + $0x5dc] sm:$0xf]  ;;  %v6745_v29 = vld [vmem:[#allocation8 + $0x604] sm:$0xf0] }
  0x95   :  { %v6748_v38 = vor.u32 %v8827_v28, %v6745_v29  ;;  %v8690_v28 = vld [vmem:[#allocation8 + $0x190] sm:$0xf0] }
  0x97   :  { %3454 = vmatpush.bf16.msrb.mxu0 %v6000_v34  ;;  %3467 = vmatpush.bf16.msrb.mxu1 %v6352_v43  ;;  %v9080_v43 = vld [vmem:[#allocation8 + $0xdc4] sm:$0xf] }
  0xcb   :  { %v388_v50 = vpop.f32.mrf.mxu0  ;;  %v401_v53 = vpop.f32.mrf.mxu1 }
  0xcc   :  { %v471_v52 = vmul.f32 %v459_v47, %v388_v50  ;;  %v472_v54 = vmul.f32 %v460_v48, %v401_v53  ;;  %v7757_v47 = vld [vmem:[#allocation8 + $0xdec] sm:$0xf0]  ;;  %v8860_v50 = vld [vmem:[#allocation8 + $0x6e4] sm:$0xf] }
  0xcd   :  { %v7760_v60 = vor.u32 %v9080_v43, %v7757_v47  ;;  %v6701_v43 = vld [vmem:[#allocation8 + $0x5ac] sm:$0xf0] }
  0xce   :  { %v491_v55 = vadd.f32 %v479_v49, %v471_v52  ;;  %v492_v58 = vadd.f32 %v480_v51, %v472_v54  ;;  %v6877_v51 = vld [vmem:[#allocation8 + $0x70c] sm:$0xf0] }
  0xcf   :  { %v7015_v47 = vld [vmem:[#allocation8 + $0x7f0] sm:$0xf] }
  0xd0   :  { %v497_v46 = vmax.f32 %v491_v55, 0.0  ;;  %v498_v63 = vmax.f32 %v492_v58, 0.0  ;;  %v7672_v55 = vor.u32 %v9058_v36, %v7669_v37  ;;  %v9047_v58 = vld [vmem:[#allocation8 + $0xcbc] sm:$0xf]  ;;  %v6619_v36 = vld [vmem:[#allocation8 + $0x4d8] sm:$0xf] }
  0xd1   :  { %v8800_v37 = vld [vmem:[#allocation8 + $0x500] sm:$0xf0] }
  0xd2   :  { %v9887_v2 = vpack.c.bf16 %v497_v46, %v497_v46  ;;  %v9890_v8 = vpack.c.bf16 %v498_v63, %v498_v63  ;;  %v6880_v46 = vor.u32 %v8860_v50, %v6877_v51  ;;  %v8723_v50 = vld [vmem:[#allocation8 + $0x298] sm:$0xf0]  ;;  %v6620_v51 = vor.u32 %v8800_v37, %v6619_v36  ;;  %v8965_v36 = vld [vmem:[#allocation8 + $0xa28] sm:$0xf0] }
  0xd3   :  { %v414_v3 = vpop.f32.mrf.mxu2  ;;  %v427_v10 = vpop.f32.mrf.mxu3 }
  0xd4   :  { %v473_v9 = vmul.f32 %v461_v59, %v414_v3  ;;  %v390_v11 = vpop.f32.mrf.mxu0  ;;  %v474_v14 = vmul.f32 %v462_v62, %v427_v10  ;;  %v403_v15 = vpop.f32.mrf.mxu1  ;;  %3377 = vmatmul.bf16.vlgmr.msrb.gmra.mxu2 %v9887_v2  ;;  %3390 = vmatmul.bf16.vlgmr.msrb.gmra.mxu3 %v9890_v8  ;;  %v7625_v59 = vld [vmem:[#allocation8 + $0xce4] sm:$0xf0]  ;;  %v7185_v62 = vld [vmem:[#allocation8 + $0x974] sm:$0xf0] }
  0xd5   :  { %3486 = vmatpush.bf16.msrb.mxu2 %v7364_v1  ;;  %3473 = vmatpush.bf16.msrb.mxu3 %v7012_v5  ;;  %v6833_v1 = vld [vmem:[#allocation8 + $0x6b4] sm:$0xf0]  ;;  %v7188_v6 = vor.u32 %v8937_v45, %v7185_v62  ;;  %v8838_v15 = vld [vmem:[#allocation8 + $0x634] sm:$0xf]  ;;  %v8712_v62 = vld [vmem:[#allocation8 + $0x240] sm:$0xf0] }
  0xd6   :  { %v493_v18 = vadd.f32 %v481_v0, %v473_v9  ;;  %v494_v21 = vadd.f32 %v482_v4, %v474_v14  ;;  %v8849_v0 = vld [vmem:[#allocation8 + $0x68c] sm:$0xf]  ;;  %v7628_v4 = vor.u32 %v9047_v58, %v7625_v59  ;;  %v7581_v9 = vld [vmem:[#allocation8 + $0xc8c] sm:$0xf0]  ;;  %v6792_v24 = vor.u32 %v8838_v15, %v6789_v16  ;;  %v6267_v45 = vld [vmem:[#allocation8 + $0x218] sm:$0xf] }
  0xd7   :  { %v6836_v11 = vor.u32 %v8849_v0, %v6833_v1  ;;  %v8789_v58 = vld [vmem:[#allocation8 + $0x4a8] sm:$0xf0]  ;;  %v8992_v0 = vld [vmem:[#allocation8 + $0xb04] sm:$0xf]  ;;  %v7405_v1 = vld [vmem:[#allocation8 + $0xb2c] sm:$0xf0] }
  0xd8   :  { %v499_v26 = vmax.f32 %v493_v18, 0.0  ;;  %v500_v30 = vmax.f32 %v494_v21, 0.0  ;;  %v7584_v18 = vor.u32 %v9036_v7, %v7581_v9  ;;  %v9025_v21 = vld [vmem:[#allocation8 + $0xc0c] sm:$0xf]  ;;  %v8987_v7 = vld [vmem:[#allocation8 + $0xad8] sm:$0xf0]  ;;  %v6268_v9 = vor.u32 %v8712_v62, %v6267_v45 }
  0xd9   :  { %3487 = vmatpush.bf16.msrb.mxu2 %v7320_v19  ;;  %3474 = vmatpush.bf16.msrb.mxu3 %v6968_v22  ;;  %v7537_v22 = vld [vmem:[#allocation8 + $0xc34] sm:$0xf0]  ;;  %v7408_v13 = vor.u32 %v8992_v0, %v7405_v1  ;;  %v6223_v15 = vld [vmem:[#allocation8 + $0x1c0] sm:$0xf]  ;;  %v8701_v16 = vld [vmem:[#allocation8 + $0x1e8] sm:$0xf0] }
  0xda   :  { %v9897_v34 = vpack.c.bf16 %v499_v26, %v499_v26  ;;  %v9899_v40 = vpack.c.bf16 %v500_v30, %v500_v30  ;;  %v8915_v26 = vld [vmem:[#allocation8 + $0x89c] sm:$0xf]  ;;  %v7540_v30 = vor.u32 %v9025_v21, %v7537_v22  ;;  %v7323_v22 = vld [vmem:[#allocation8 + $0xa58] sm:$0xf]  ;;  %v7807_v62 = vld [vmem:[#allocation8 + $0xe20] sm:$0xf] }
  0xdb   :  { %v416_v48 = vpop.f32.mrf.mxu2  ;;  %v429_v52 = vpop.f32.mrf.mxu3  ;;  %v8767_v21 = vld [vmem:[#allocation8 + $0x3f8] sm:$0xf0]  ;;  %v9097_v0 = vld [vmem:[#allocation8 + $0xe48] sm:$0xf0]  ;;  %v6751_v1 = vld [vmem:[#allocation8 + $0x5e0] sm:$0xf] }
  0xdc   :  { %3403 = vmatmul.bf16.vlgmr.msra.gmra.mxu0 %v9897_v34  ;;  %v440_v49 = vpop.f32.mrf.mxu0  ;;  %3416 = vmatmul.bf16.vlgmr.msra.gmra.mxu1 %v9899_v40  ;;  %v453_v54 = vpop.f32.mrf.mxu1  ;;  %v8899_v48 = vld [vmem:[#allocation8 + $0x818] sm:$0xf0] }
  0xdd   :  { %3499 = vmatpush.bf16.msra.mxu0 %v7716_v27  ;;  %v475_v53 = vmul.f32 %v463_v31, %v440_v49  ;;  %v476_v56 = vmul.f32 %v464_v33, %v453_v54  ;;  %3488 = vmatpush.bf16.msrb.mxu2 %v7276_v35  ;;  %v7097_v27 = vld [vmem:[#allocation8 + $0x8c4] sm:$0xf0]  ;;  %v9014_v31 = vld [vmem:[#allocation8 + $0xbb4] sm:$0xf]  ;;  %v7493_v35 = vld [vmem:[#allocation8 + $0xbdc] sm:$0xf0] }
  0xde   :  { %3518 = vmatpush.bf16.msra.mxu1 %v7804_v39  ;;  %3475 = vmatpush.bf16.msrb.mxu3 %v6924_v41  ;;  %v7100_v33 = vor.u32 %v8915_v26, %v7097_v27  ;;  %v8816_v39 = vld [vmem:[#allocation8 + $0x584] sm:$0xf]  ;;  %v7496_v49 = vor.u32 %v9014_v31, %v7493_v35  ;;  %v7449_v54 = vld [vmem:[#allocation8 + $0xb84] sm:$0xf0]  ;;  %v8866_v26 = vld [vmem:[#allocation8 + $0x710] sm:$0xf0] }
  0xdf   :  { %v495_v61 = vadd.f32 %v483_v32, %v475_v53  ;;  %v496_v63 = vadd.f32 %v484_v44, %v476_v56  ;;  %v6664_v32 = vor.u32 %v8811_v25, %v6663_v23  ;;  %v8904_v41 = vld [vmem:[#allocation8 + $0x844] sm:$0xf]  ;;  %v6311_v44 = vld [vmem:[#allocation8 + $0x270] sm:$0xf]  ;;  %v9003_v53 = vld [vmem:[#allocation8 + $0xb5c] sm:$0xf]  ;;  %v7016_v56 = vor.u32 %v8899_v48, %v7015_v47 }
  0xe0   :  { %v7056_v52 = vor.u32 %v8904_v41, %v7053_v42  ;;  %v6312_v59 = vor.u32 %v8723_v50, %v6311_v44  ;;  %v8976_v23 = vld [vmem:[#allocation8 + $0xa80] sm:$0xf0]  ;;  %v6883_v25 = vld [vmem:[#allocation8 + $0x6e8] sm:$0xf]  ;;  %v6443_v31 = vld [vmem:[#allocation8 + $0x378] sm:$0xf] }
  0xe1   :  { %v501_v3 = vmax.f32 %v495_v61, 0.0  ;;  %3500 = vmatpush.bf16.msra.mxu0 %v7672_v55  ;;  %v502_v5 = vmax.f32 %v496_v63, 0.0  ;;  %3489 = vmatpush.bf16.msrb.mxu2 %v7232_v57  ;;  %v6704_v55 = vor.u32 %v8816_v39, %v6701_v43  ;;  %v6575_v57 = vld [vmem:[#allocation8 + $0x480] sm:$0xf]  ;;  %v8888_v61 = vld [vmem:[#allocation8 + $0x7c0] sm:$0xf0] }
  0xe2   :  { %3519 = vmatpush.bf16.msra.mxu1 %v7760_v60  ;;  %3476 = vmatpush.bf16.msrb.mxu3 %v6880_v46  ;;  %v6971_v60 = vld [vmem:[#allocation8 + $0x798] sm:$0xf]  ;;  %v7452_v46 = vor.u32 %v9003_v53, %v7449_v54  ;;  %v6576_v63 = vor.u32 %v8789_v58, %v6575_v57  ;;  %v6179_v27 = vld [vmem:[#allocation8 + $0x168] sm:$0xf]  ;;  %v7279_v35 = vld [vmem:[#allocation8 + $0xa00] sm:$0xf] }
  0xe3   :  { %v9904_v10 = vpack.c.bf16 %v501_v3, %v501_v3  ;;  %v9906_v14 = vpack.c.bf16 %v502_v5, %v502_v5  ;;  %v6531_v3 = vld [vmem:[#allocation8 + $0x428] sm:$0xf]  ;;  %v8778_v5 = vld [vmem:[#allocation8 + $0x450] sm:$0xf0]  ;;  %v6180_v37 = vor.u32 %v8690_v28, %v6179_v27  ;;  %v8855_v39 = vld [vmem:[#allocation8 + $0x6b8] sm:$0xf0]  ;;  %v7280_v47 = vor.u32 %v8965_v36, %v7279_v35 }
  0xe4   :  { %v442_v17 = vpop.f32.mrf.mxu0  ;;  %v455_v19 = vpop.f32.mrf.mxu1  ;;  %v6135_v41 = vld [vmem:[#allocation8 + $0x110] sm:$0xf]  ;;  %v8679_v42 = vld [vmem:[#allocation8 + $0x138] sm:$0xf0]  ;;  %v6399_v48 = vld [vmem:[#allocation8 + $0x320] sm:$0xf] }
  0xe5   :  { %3501 = vmatpush.bf16.msra.mxu0 %v7628_v4  ;;  %3429 = vmatmul.bf16.vlgmr.msra.gmra.mxu2 %v9904_v10  ;;  %v6972_v4 = vor.u32 %v8888_v61, %v6971_v60  ;;  %v6532_v17 = vor.u32 %v8778_v5, %v6531_v3  ;;  %v6487_v19 = vld [vmem:[#allocation8 + $0x3d0] sm:$0xf]  ;;  %v8745_v44 = vld [vmem:[#allocation8 + $0x348] sm:$0xf0]  ;;  %v7235_v50 = vld [vmem:[#allocation8 + $0x9a8] sm:$0xf] }
  0xe6   :  { %7841 = vmatmul.msk.bf16.vlgmr.msra.gmra.mxu3 %vm3365_vm2, %v9906_v14  ;;  %3490 = vmatpush.bf16.msrb.mxu2 %v7188_v6  ;;  %v7367_v6 = vld [vmem:[#allocation8 + $0xab0] sm:$0xf]  ;;  %v6488_v29 = vor.u32 %v8767_v21, %v6487_v19  ;;  %v6795_v53 = vld [vmem:[#allocation8 + $0x638] sm:$0xf]  ;;  %v8844_v54 = vld [vmem:[#allocation8 + $0x660] sm:$0xf0]  ;;  %v6400_v57 = vor.u32 %v8745_v44, %v6399_v48 }
  0xe7   :  { %3477 = vmatpush.bf16.msrb.mxu3 %v6836_v11  ;;  %v6927_v11 = vld [vmem:[#allocation8 + $0x740] sm:$0xf]  ;;  %v8734_v60 = vld [vmem:[#allocation8 + $0x2f0] sm:$0xf0]  ;;  %v6796_v61 = vor.u32 %v8844_v54, %v6795_v53  ;;  %v8943_v45 = vld [vmem:[#allocation8 + $0x978] sm:$0xf0] }
  0xe8   :  { %v8833_v3 = vld [vmem:[#allocation8 + $0x608] sm:$0xf0]  ;;  %v7017_v19 = vld [vmem:[#allocation8 + $0x81c] sm:$0xf0]  ;;  %v8822_v21 = vld [vmem:[#allocation8 + $0x5b0] sm:$0xf0] }
  0xe9   :  { %3502 = vmatpush.bf16.msra.mxu0 %v7584_v18  ;;  %v7368_v18 = vor.u32 %v8987_v7, %v7367_v6  ;;  %v8657_v5 = vld [vmem:[#allocation8 + $0x88] sm:$0xf0]  ;;  %v8718_v27 = vld [vmem:[#allocation8 + $0x274] sm:$0xf]  ;;  %v6313_v28 = vld [vmem:[#allocation8 + $0x29c] sm:$0xf0] }
  0xea   :  { %3491 = vmatpush.bf16.msrb.mxu2 %v7144_v20  ;;  %v6928_v20 = vor.u32 %v8877_v12, %v6927_v11  ;;  %v8932_v11 = vld [vmem:[#allocation8 + $0x920] sm:$0xf0]  ;;  %v7808_v12 = vor.u32 %v9097_v0, %v7807_v62  ;;  %v6269_v48 = vld [vmem:[#allocation8 + $0x244] sm:$0xf0]  ;;  %v8910_v44 = vld [vmem:[#allocation8 + $0x870] sm:$0xf0] }
  0xeb   :  { %3478 = vmatpush.bf16.msrb.mxu3 %v6792_v24  ;;  %v6224_v24 = vor.u32 %v8701_v16, %v6223_v15  ;;  %v7763_v15 = vld [vmem:[#allocation8 + $0xdc8] sm:$0xf]  ;;  %v9086_v16 = vld [vmem:[#allocation8 + $0xdf0] sm:$0xf0]  ;;  %v8795_v62 = vld [vmem:[#allocation8 + $0x4dc] sm:$0xf] }
  0xec   :  { %3455 = vmatmul.bf16.vlgmr.msrb.gmra.mxu0 %v9887_v2  ;;  %3468 = vmatmul.bf16.vlgmr.msrb.gmra.mxu1 %v9890_v8 }
  0xed   :  { %3503 = vmatpush.bf16.msra.mxu0 %v7540_v30  ;;  %3538 = vmatpush.bf16.msrb.mxu1 %v6664_v32  ;;  %v7324_v30 = vor.u32 %v8976_v23, %v7323_v22  ;;  %v6884_v32 = vor.u32 %v8866_v26, %v6883_v25  ;;  %v6003_v22 = vld [vmem:[#allocation8 + $0x8] sm:$0xf]  ;;  %v8646_v23 = vld [vmem:[#allocation8 + $0x30] sm:$0xf0]  ;;  %v9075_v26 = vld [vmem:[#allocation8 + $0xd98] sm:$0xf0] }
  0xee   :  { %3492 = vmatpush.bf16.msrb.mxu2 %v7100_v33  ;;  %v8756_v33 = vld [vmem:[#allocation8 + $0x3a0] sm:$0xf0]  ;;  %v6004_v35 = vor.u32 %v8646_v23, %v6003_v22  ;;  %v8674_v23 = vld [vmem:[#allocation8 + $0x114] sm:$0xf] }
  0xef   :  { %3479 = vmatpush.bf16.msrb.mxu3 %v6748_v38  ;;  %v6839_v38 = vld [vmem:[#allocation8 + $0x690] sm:$0xf]  ;;  %v6444_v43 = vor.u32 %v8756_v33, %v6443_v31  ;;  %v7103_v31 = vld [vmem:[#allocation8 + $0x8a0] sm:$0xf] }
  0xf1   :  { %3504 = vmatpush.bf16.msra.mxu0 %v7496_v49  ;;  %3539 = vmatpush.bf16.msrb.mxu1 %v6620_v51  ;;  %v6840_v49 = vor.u32 %v8855_v39, %v6839_v38  ;;  %v8954_v51 = vld [vmem:[#allocation8 + $0x9d0] sm:$0xf0]  ;;  %v8883_v38 = vld [vmem:[#allocation8 + $0x79c] sm:$0xf]  ;;  %v6973_v39 = vld [vmem:[#allocation8 + $0x7c4] sm:$0xf0] }
  0xf2   :  { %3493 = vmatpush.bf16.msrb.mxu2 %v7056_v52  ;;  %v6136_v52 = vor.u32 %v8679_v42, %v6135_v41  ;;  %v7236_v58 = vor.u32 %v8954_v51, %v7235_v50  ;;  %v7675_v41 = vld [vmem:[#allocation8 + $0xd18] sm:$0xf]  ;;  %v6976_v50 = vor.u32 %v8883_v38, %v6973_v39  ;;  %v8806_v51 = vld [vmem:[#allocation8 + $0x534] sm:$0xf] }
  0xf3   :  { %3480 = vmatpush.bf16.msrb.mxu3 %v6704_v55  ;;  %v6091_v55 = vld [vmem:[#allocation8 + $0xb8] sm:$0xf]  ;;  %v8762_v39 = vld [vmem:[#allocation8 + $0x3d4] sm:$0xf] }
  0xf5   :  { %3505 = vmatpush.bf16.msra.mxu0 %v7452_v46  ;;  %3494 = vmatmul.bf16.vlgmr.msrb.gmra.mxu2 %v9899_v40  ;;  %v7191_v46 = vld [vmem:[#allocation8 + $0x950] sm:$0xf] }
  0xf6   :  { %3551 = vmatpush.bf16.msra.mxu2 %v7016_v56  ;;  %3540 = vmatpush.bf16.msrb.mxu1 %v6576_v63  ;;  %v8668_v56 = vld [vmem:[#allocation8 + $0xe0] sm:$0xf0]  ;;  %v7192_v7 = vor.u32 %v8943_v45, %v7191_v46  ;;  %v6225_v46 = vld [vmem:[#allocation8 + $0x1ec] sm:$0xf0] }
  0xf7   :  { %3525 = vmatpush.bf16.msra.mxu3 %v6312_v59  ;;  %v6355_v59 = vld [vmem:[#allocation8 + $0x2c8] sm:$0xf]  ;;  %v6092_v63 = vor.u32 %v8668_v56, %v6091_v55  ;;  %v8872_v55 = vld [vmem:[#allocation8 + $0x744] sm:$0xf]  ;;  %v6929_v56 = vld [vmem:[#allocation8 + $0x76c] sm:$0xf0] }
  0xf8   :  { %3481 = vmatmul.bf16.vlgmr.msrb.gmra.mxu3 %v9897_v34  ;;  %v6356_v6 = vor.u32 %v8734_v60, %v6355_v59  ;;  %v9053_v59 = vld [vmem:[#allocation8 + $0xce8] sm:$0xf0]  ;;  %v6932_v45 = vor.u32 %v8872_v55, %v6929_v56  ;;  %v6445_v55 = vld [vmem:[#allocation8 + $0x3a4] sm:$0xf0] }
  0xf9   :  { %3506 = vmatpush.bf16.msra.mxu0 %v7408_v13  ;;  %v6752_v13 = vor.u32 %v8833_v3, %v6751_v1  ;;  %v8861_v1 = vld [vmem:[#allocation8 + $0x6ec] sm:$0xf]  ;;  %v6885_v3 = vld [vmem:[#allocation8 + $0x714] sm:$0xf0] }
  0xfa   :  { %3552 = vmatpush.bf16.msra.mxu2 %v6972_v4  ;;  %3541 = vmatpush.bf16.msrb.mxu1 %v6532_v17  ;;  %v6047_v4 = vld [vmem:[#allocation8 + $0x60] sm:$0xf]  ;;  %v8894_v17 = vld [vmem:[#allocation8 + $0x7f4] sm:$0xf]  ;;  %v8817_v56 = vld [vmem:[#allocation8 + $0x58c] sm:$0xf] }
  0xfb   :  { %3526 = vmatpush.bf16.msra.mxu3 %v6268_v9  ;;  %v7147_v9 = vld [vmem:[#allocation8 + $0x8f8] sm:$0xf]  ;;  %v7020_v33 = vor.u32 %v8894_v17, %v7017_v19  ;;  %v8850_v17 = vld [vmem:[#allocation8 + $0x694] sm:$0xf] }
  0xfc   :  { %3507 = vmatmul.bf16.vlgmr.msra.gmra.mxu0 %v9904_v10  ;;  %7842 = vmatmul.msk.bf16.vlgmr.msra.gmra.mxu1 %vm3365_vm2, %v9906_v14  ;;  %v7148_v25 = vor.u32 %v8932_v11, %v7147_v9  ;;  %v8685_v9 = vld [vmem:[#allocation8 + $0x16c] sm:$0xf]  ;;  %v6181_v11 = vld [vmem:[#allocation8 + $0x194] sm:$0xf0] }
  0xfd   :  { %3564 = vmatpush.bf16.msrb.mxu0 %v7368_v18  ;;  %v6048_v18 = vor.u32 %v8657_v5, %v6047_v4  ;;  %v7587_v5 = vld [vmem:[#allocation8 + $0xc68] sm:$0xf]  ;;  %v6184_v19 = vor.u32 %v8685_v9, %v6181_v11  ;;  %v8740_v11 = vld [vmem:[#allocation8 + $0x324] sm:$0xf] }
  0xfe   :  { %3553 = vmatpush.bf16.msra.mxu2 %v6928_v20  ;;  %3542 = vmatpush.bf16.msrb.mxu1 %v6488_v29  ;;  %v6707_v20 = vld [vmem:[#allocation8 + $0x588] sm:$0xf]  ;;  %v7764_v29 = vor.u32 %v9086_v16, %v7763_v15  ;;  %v6577_v15 = vld [vmem:[#allocation8 + $0x4ac] sm:$0xf0] }
  0xff   :  { %3527 = vmatpush.bf16.msra.mxu3 %v6224_v24  ;;  %v7719_v24 = vld [vmem:[#allocation8 + $0xd70] sm:$0xf] }
 0x100   :  { %v7720_v36 = vor.u32 %v9075_v26, %v7719_v24  ;;  %v6137_v24 = vld [vmem:[#allocation8 + $0x13c] sm:$0xf0]  ;;  %v8773_v26 = vld [vmem:[#allocation8 + $0x42c] sm:$0xf] }
 0x101   :  { %3565 = vmatpush.bf16.msrb.mxu0 %v7324_v30  ;;  %v6708_v30 = vor.u32 %v8822_v21, %v6707_v20  ;;  %v7543_v20 = vld [vmem:[#allocation8 + $0xc10] sm:$0xf]  ;;  %v9031_v21 = vld [vmem:[#allocation8 + $0xc38] sm:$0xf0] }
 0x102   :  { %3554 = vmatpush.bf16.msra.mxu2 %v6884_v32  ;;  %3543 = vmatpush.bf16.msrb.mxu1 %v6444_v43  ;;  %v8921_v32 = vld [vmem:[#allocation8 + $0x8c8] sm:$0xf0]  ;;  %v9064_v43 = vld [vmem:[#allocation8 + $0xd40] sm:$0xf0] }
 0x103   :  { %3528 = vmatpush.bf16.msra.mxu3 %v6180_v37  ;;  %v6316_v37 = vor.u32 %v8718_v27, %v6313_v28  ;;  %v7104_v42 = vor.u32 %v8921_v32, %v7103_v31  ;;  %v7676_v53 = vor.u32 %v9064_v43, %v7675_v41  ;;  %v6533_v27 = vld [vmem:[#allocation8 + $0x454] sm:$0xf0]  ;;  %v7544_v28 = vor.u32 %v9031_v21, %v7543_v20  ;;  %v6489_v41 = vld [vmem:[#allocation8 + $0x3fc] sm:$0xf0]  ;;  %v8828_v43 = vld [vmem:[#allocation8 + $0x5e4] sm:$0xf] }
 0x104   :  { %v6140_v31 = vor.u32 %v8674_v23, %v6137_v24  ;;  %v7499_v32 = vld [vmem:[#allocation8 + $0xbb8] sm:$0xf]  ;;  %v7325_v20 = vld [vmem:[#allocation8 + $0xa84] sm:$0xf0] }
 0x105   :  { %3566 = vmatpush.bf16.msrb.mxu0 %v7280_v47  ;;  %v8707_v47 = vld [vmem:[#allocation8 + $0x21c] sm:$0xf]  ;;  %v7677_v23 = vld [vmem:[#allocation8 + $0xd44] sm:$0xf0] }
 0x106   :  { %3555 = vmatpush.bf16.msra.mxu2 %v6840_v49  ;;  %3544 = vmatpush.bf16.msrb.mxu1 %v6400_v57  ;;  %v7059_v49 = vld [vmem:[#allocation8 + $0x848] sm:$0xf]  ;;  %v6272_v54 = vor.u32 %v8707_v47, %v6269_v48  ;;  %v6753_v47 = vld [vmem:[#allocation8 + $0x60c] sm:$0xf0] }
 0x107   :  { %3529 = vmatpush.bf16.msra.mxu3 %v6136_v52  ;;  %v6665_v52 = vld [vmem:[#allocation8 + $0x55c] sm:$0xf0]  ;;  %v7060_v57 = vor.u32 %v8910_v44, %v7059_v49  ;;  %v9009_v44 = vld [vmem:[#allocation8 + $0xb88] sm:$0xf0] }
 0x108   :  { %v6668_v60 = vor.u32 %v8806_v51, %v6665_v52  ;;  %v7455_v49 = vld [vmem:[#allocation8 + $0xb60] sm:$0xf]  ;;  %v8652_v51 = vld [vmem:[#allocation8 + $0x64] sm:$0xf]  ;;  %v6049_v52 = vld [vmem:[#allocation8 + $0x8c] sm:$0xf0] }
 0x109   :  { %3567 = vmatpush.bf16.msrb.mxu0 %v7236_v58  ;;  %v7631_v58 = vld [vmem:[#allocation8 + $0xcc0] sm:$0xf] }
 0x10a   :  { %3556 = vmatpush.bf16.msra.mxu2 %v6796_v61  ;;  %3545 = vmatpush.bf16.msrb.mxu1 %v6356_v6  ;;  %v8696_v61 = vld [vmem:[#allocation8 + $0x1c4] sm:$0xf]  ;;  %v7632_v0 = vor.u32 %v9053_v59, %v7631_v58  ;;  %v9042_v6 = vld [vmem:[#allocation8 + $0xc90] sm:$0xf0]  ;;  %v6709_v58 = vld [vmem:[#allocation8 + $0x5b4] sm:$0xf0] }
 0x10b   :  { %3530 = vmatpush.bf16.msra.mxu3 %v6092_v63  ;;  %v6621_v63 = vld [vmem:[#allocation8 + $0x504] sm:$0xf0]  ;;  %v6228_v4 = vor.u32 %v8696_v61, %v6225_v46  ;;  %v7588_v16 = vor.u32 %v9042_v6, %v7587_v5  ;;  %v6319_v59 = vld [vmem:[#allocation8 + $0x278] sm:$0xf]  ;;  %v6052_v61 = vor.u32 %v8652_v51, %v6049_v52  ;;  %v9070_v5 = vld [vmem:[#allocation8 + $0xd74] sm:$0xf] }
 0x10c   :  { %v7411_v46 = vld [vmem:[#allocation8 + $0xb08] sm:$0xf]  ;;  %v7721_v6 = vld [vmem:[#allocation8 + $0xd9c] sm:$0xf0]  ;;  %v8900_v51 = vld [vmem:[#allocation8 + $0x820] sm:$0xf0] }
 0x10d   :  { %3568 = vmatpush.bf16.msrb.mxu0 %v7192_v7  ;;  %3546 = vmatmul.bf16.vlgmr.msrb.gmra.mxu1 %v9890_v8  ;;  %v6624_v7 = vor.u32 %v8795_v62, %v6621_v63  ;;  %v8641_v62 = vld [vmem:[#allocation8 + $0xc] sm:$0xf] }
 0x10e   :  { %3596 = vmatpush.bf16.msra.mxu1 %v7808_v12  ;;  %3557 = vmatpush.bf16.msra.mxu2 %v6752_v13  ;;  %v6888_v12 = vor.u32 %v8861_v1, %v6885_v3  ;;  %v8784_v13 = vld [vmem:[#allocation8 + $0x484] sm:$0xf]  ;;  %v8982_v1 = vld [vmem:[#allocation8 + $0xab4] sm:$0xf]  ;;  %v7369_v3 = vld [vmem:[#allocation8 + $0xadc] sm:$0xf0] }
 0x10f   :  { %3531 = vmatpush.bf16.msra.mxu3 %v6048_v18  ;;  %v6841_v18 = vld [vmem:[#allocation8 + $0x6bc] sm:$0xf0]  ;;  %v6580_v22 = vor.u32 %v8784_v13, %v6577_v15  ;;  %v7372_v15 = vor.u32 %v8982_v1, %v7369_v3  ;;  %v8949_v52 = vld [vmem:[#allocation8 + $0x9ac] sm:$0xf]  ;;  %v9026_v1 = vld [vmem:[#allocation8 + $0xc14] sm:$0xf] }
 0x110   :  { %v7545_v3 = vld [vmem:[#allocation8 + $0xc3c] sm:$0xf0] }
 0x111   :  { %3569 = vmatpush.bf16.msrb.mxu0 %v7148_v25  ;;  %v6844_v25 = vor.u32 %v8850_v17, %v6841_v18  ;;  %v8713_v17 = vld [vmem:[#allocation8 + $0x248] sm:$0xf0]  ;;  %v7724_v18 = vor.u32 %v9070_v5, %v7721_v6 }
 0x112   :  { %3597 = vmatpush.bf16.msra.mxu1 %v7764_v29  ;;  %3558 = vmatpush.bf16.msra.mxu2 %v6708_v30  ;;  %v8839_v29 = vld [vmem:[#allocation8 + $0x63c] sm:$0xf]  ;;  %v6797_v30 = vld [vmem:[#allocation8 + $0x664] sm:$0xf0] }
 0x113   :  { %3532 = vmatpush.bf16.msra.mxu3 %v6004_v35  ;;  %v6536_v35 = vor.u32 %v8773_v26, %v6533_v27  ;;  %v6800_v38 = vor.u32 %v8839_v29, %v6797_v30  ;;  %v6357_v26 = vld [vmem:[#allocation8 + $0x2f4] sm:$0xf0]  ;;  %v9092_v27 = vld [vmem:[#allocation8 + $0xe24] sm:$0xf]  ;;  %v7809_v29 = vld [vmem:[#allocation8 + $0xe4c] sm:$0xf0] }
 0x114   :  { %v6231_v30 = vld [vmem:[#allocation8 + $0x1c8] sm:$0xf] }
 0x115   :  { %3570 = vmatpush.bf16.msrb.mxu0 %v7104_v42  ;;  %3559 = vmatmul.bf16.vlgmr.msra.gmra.mxu2 %v9897_v34 }
 0x116   :  { %3629 = vmatpush.bf16.msrb.mxu1 %v7020_v33  ;;  %3603 = vmatpush.bf16.msrb.mxu2 %v6316_v37  ;;  %v9020_v33 = vld [vmem:[#allocation8 + $0xbe0] sm:$0xf0]  ;;  %v6093_v37 = vld [vmem:[#allocation8 + $0xe4] sm:$0xf0] }
 0x117   :  { %3577 = vmatpush.bf16.msrb.mxu3 %v7720_v36  ;;  %v8663_v36 = vld [vmem:[#allocation8 + $0xbc] sm:$0xf]  ;;  %v7500_v42 = vor.u32 %v9020_v33, %v7499_v32  ;;  %v8960_v33 = vld [vmem:[#allocation8 + $0xa04] sm:$0xf] }
 0x118   :  { %3533 = vmatmul.bf16.vlgmr.msra.gmra.mxu3 %v9887_v2  ;;  %v6096_v48 = vor.u32 %v8663_v36, %v6093_v37  ;;  %v9048_v37 = vld [vmem:[#allocation8 + $0xcc4] sm:$0xf] }
 0x119   :  { %3571 = vmatpush.bf16.msrb.mxu0 %v7060_v57  ;;  %v7456_v57 = vor.u32 %v9009_v44, %v7455_v49  ;;  %v8691_v49 = vld [vmem:[#allocation8 + $0x198] sm:$0xf0]  ;;  %v7023_v44 = vld [vmem:[#allocation8 + $0x7f8] sm:$0xf] }
 0x11a   :  { %3630 = vmatpush.bf16.msrb.mxu1 %v6976_v50  ;;  %3604 = vmatpush.bf16.msrb.mxu2 %v6272_v54  ;;  %v6492_v50 = vor.u32 %v8762_v39, %v6489_v41  ;;  %v8751_v54 = vld [vmem:[#allocation8 + $0x37c] sm:$0xf]  ;;  %v7812_v39 = vor.u32 %v9092_v27, %v7809_v29  ;;  %v8916_v27 = vld [vmem:[#allocation8 + $0x8a4] sm:$0xf] }
 0x11b   :  { %3578 = vmatpush.bf16.msrb.mxu3 %v7676_v53  ;;  %v6756_v53 = vor.u32 %v8828_v43, %v6753_v47  ;;  %v6448_v63 = vor.u32 %v8751_v54, %v6445_v55  ;;  %v7765_v43 = vld [vmem:[#allocation8 + $0xdf4] sm:$0xf0]  ;;  %v9037_v54 = vld [vmem:[#allocation8 + $0xc6c] sm:$0xf]  ;;  %v9004_v29 = vld [vmem:[#allocation8 + $0xb64] sm:$0xf] }
 0x11c   :  { %3572 = vmatmul.bf16.vlgmr.msrb.gmra.mxu0 %v9899_v40  ;;  %v7589_v55 = vld [vmem:[#allocation8 + $0xc94] sm:$0xf0] }
 0x11d   :  { %3616 = vmatpush.bf16.msra.mxu0 %v6668_v60  ;;  %7843 = vmatmul.msk.bf16.vlgmr.msra.gmra.mxu1 %vm3365_vm2, %v9906_v14  ;;  %v8724_v60 = vld [vmem:[#allocation8 + $0x2a0] sm:$0xf0] }
 0x11e   :  { %3631 = vmatpush.bf16.msrb.mxu1 %v6932_v45  ;;  %3605 = vmatpush.bf16.msrb.mxu2 %v6228_v4  ;;  %v8998_v45 = vld [vmem:[#allocation8 + $0xb30] sm:$0xf0]  ;;  %v6712_v4 = vor.u32 %v8817_v56, %v6709_v58  ;;  %v7024_v58 = vor.u32 %v8900_v51, %v7023_v44  ;;  %v8812_v51 = vld [vmem:[#allocation8 + $0x560] sm:$0xf0] }
 0x11f   :  { %3579 = vmatpush.bf16.msrb.mxu3 %v7632_v0  ;;  %v6005_v0 = vld [vmem:[#allocation8 + $0x34] sm:$0xf0]  ;;  %v7412_v9 = vor.u32 %v8998_v45, %v7411_v46  ;;  %v6979_v46 = vld [vmem:[#allocation8 + $0x7a0] sm:$0xf]  ;;  %v7592_v45 = vor.u32 %v9037_v54, %v7589_v55  ;;  %v8988_v55 = vld [vmem:[#allocation8 + $0xae0] sm:$0xf0] }
 0x120   :  { %v6008_v13 = vor.u32 %v8641_v62, %v6005_v0  ;;  %v8889_v62 = vld [vmem:[#allocation8 + $0x7c8] sm:$0xf0]  ;;  %v7193_v0 = vld [vmem:[#allocation8 + $0x97c] sm:$0xf0]  ;;  %v7375_v54 = vld [vmem:[#allocation8 + $0xab8] sm:$0xf] }
 0x121   :  { %3617 = vmatpush.bf16.msra.mxu0 %v6624_v7  ;;  %v6320_v7 = vor.u32 %v8724_v60, %v6319_v59  ;;  %v6143_v60 = vld [vmem:[#allocation8 + $0x118] sm:$0xf]  ;;  %v6980_v5 = vor.u32 %v8889_v62, %v6979_v46  ;;  %v9065_v46 = vld [vmem:[#allocation8 + $0xd48] sm:$0xf0]  ;;  %v6627_v62 = vld [vmem:[#allocation8 + $0x4e0] sm:$0xf] }
 0x122   :  { %3632 = vmatpush.bf16.msrb.mxu1 %v6888_v12  ;;  %3606 = vmatpush.bf16.msrb.mxu2 %v6184_v19  ;;  %v6401_v12 = vld [vmem:[#allocation8 + $0x34c] sm:$0xf0]  ;;  %v8971_v19 = vld [vmem:[#allocation8 + $0xa5c] sm:$0xf] }
 0x123   :  { %3580 = vmatpush.bf16.msrb.mxu3 %v7588_v16  ;;  %v6275_v16 = vld [vmem:[#allocation8 + $0x220] sm:$0xf]  ;;  %v6404_v21 = vor.u32 %v8740_v11, %v6401_v12  ;;  %v6935_v11 = vld [vmem:[#allocation8 + $0x748] sm:$0xf]  ;;  %v7548_v12 = vor.u32 %v9026_v1, %v7545_v3  ;;  %v8977_v1 = vld [vmem:[#allocation8 + $0xa88] sm:$0xf0] }
 0x124   :  { %v6276_v24 = vor.u32 %v8713_v17, %v6275_v16  ;;  %v7149_v16 = vld [vmem:[#allocation8 + $0x924] sm:$0xf0]  ;;  %v9015_v17 = vld [vmem:[#allocation8 + $0xbbc] sm:$0xf] }
 0x125   :  { %3618 = vmatpush.bf16.msra.mxu0 %v6580_v22  ;;  %v9059_v22 = vld [vmem:[#allocation8 + $0xd1c] sm:$0xf] }
 0x126   :  { %3633 = vmatpush.bf16.msrb.mxu1 %v6844_v25  ;;  %3607 = vmatpush.bf16.msrb.mxu2 %v6140_v31  ;;  %v8729_v25 = vld [vmem:[#allocation8 + $0x2cc] sm:$0xf]  ;;  %v8702_v31 = vld [vmem:[#allocation8 + $0x1f0] sm:$0xf0]  ;;  %v7680_v32 = vor.u32 %v9059_v22, %v7677_v23  ;;  %v6055_v22 = vld [vmem:[#allocation8 + $0x68] sm:$0xf] }
 0x127   :  { %3581 = vmatpush.bf16.msrb.mxu3 %v7544_v28  ;;  %v7328_v28 = vor.u32 %v8971_v19, %v7325_v20  ;;  %v6360_v36 = vor.u32 %v8729_v25, %v6357_v26  ;;  %v6232_v41 = vor.u32 %v8702_v31, %v6231_v30  ;;  %v8658_v23 = vld [vmem:[#allocation8 + $0x90] sm:$0xf0]  ;;  %v8867_v26 = vld [vmem:[#allocation8 + $0x718] sm:$0xf0]  ;;  %v7457_v30 = vld [vmem:[#allocation8 + $0xb8c] sm:$0xf0] }
 0x128   :  { %v6056_v31 = vor.u32 %v8658_v23, %v6055_v22  ;;  %v7595_v23 = vld [vmem:[#allocation8 + $0xc70] sm:$0xf] }
 0x129   :  { %3619 = vmatpush.bf16.msra.mxu0 %v6536_v35  ;;  %v7281_v35 = vld [vmem:[#allocation8 + $0xa2c] sm:$0xf0] }
 0x12a   :  { %3634 = vmatpush.bf16.msrb.mxu1 %v6800_v38  ;;  %3608 = vmatpush.bf16.msrb.mxu2 %v6096_v48  ;;  %v7633_v38 = vld [vmem:[#allocation8 + $0xcec] sm:$0xf0]  ;;  %v7284_v47 = vor.u32 %v8960_v33, %v7281_v35 }
 0x12b   :  { %3582 = vmatpush.bf16.msrb.mxu3 %v7500_v42  ;;  %v9081_v42 = vld [vmem:[#allocation8 + $0xdcc] sm:$0xf]  ;;  %v6187_v48 = vld [vmem:[#allocation8 + $0x170] sm:$0xf] }
 0x12c   :  { %v7768_v56 = vor.u32 %v9081_v42, %v7765_v43  ;;  %v9076_v42 = vld [vmem:[#allocation8 + $0xda0] sm:$0xf0]  ;;  %v8905_v43 = vld [vmem:[#allocation8 + $0x84c] sm:$0xf] }
 0x12d   :  { %3620 = vmatpush.bf16.msra.mxu0 %v6492_v50  ;;  %v7636_v50 = vor.u32 %v9048_v37, %v7633_v38  ;;  %v6847_v37 = vld [vmem:[#allocation8 + $0x698] sm:$0xf]  ;;  %v8856_v38 = vld [vmem:[#allocation8 + $0x6c0] sm:$0xf0] }
 0x12e   :  { %3635 = vmatpush.bf16.msrb.mxu1 %v6756_v53  ;;  %3609 = vmatpush.bf16.msrb.mxu2 %v6052_v61  ;;  %v7237_v53 = vld [vmem:[#allocation8 + $0x9d4] sm:$0xf0]  ;;  %v8680_v61 = vld [vmem:[#allocation8 + $0x140] sm:$0xf0] }
 0x12f   :  { %3583 = vmatpush.bf16.msrb.mxu3 %v7456_v57  ;;  %v6188_v57 = vor.u32 %v8691_v49, %v6187_v48  ;;  %v7240_v59 = vor.u32 %v8949_v52, %v7237_v53  ;;  %v8993_v48 = vld [vmem:[#allocation8 + $0xb0c] sm:$0xf]  ;;  %v7413_v49 = vld [vmem:[#allocation8 + $0xb34] sm:$0xf0]  ;;  %v6848_v52 = vor.u32 %v8856_v38, %v6847_v37  ;;  %v9032_v38 = vld [vmem:[#allocation8 + $0xc40] sm:$0xf0] }
 0x130   :  { %v7551_v37 = vld [vmem:[#allocation8 + $0xc18] sm:$0xf] }
 0x131   :  { %3621 = vmatpush.bf16.msra.mxu0 %v6448_v63  ;;  %v8938_v63 = vld [vmem:[#allocation8 + $0x954] sm:$0xf] }
 0x132   :  { %3636 = vmatpush.bf16.msrb.mxu1 %v6712_v4  ;;  %3610 = vmatpush.bf16.msrb.mxu2 %v6008_v13  ;;  %v6144_v4 = vor.u32 %v8680_v61, %v6143_v60  ;;  %v7196_v6 = vor.u32 %v8938_v63, %v7193_v0  ;;  %v8878_v13 = vld [vmem:[#allocation8 + $0x770] sm:$0xf0]  ;;  %v8845_v60 = vld [vmem:[#allocation8 + $0x668] sm:$0xf0]  ;;  %v7683_v61 = vld [vmem:[#allocation8 + $0xd20] sm:$0xf] }
 0x133   :  { %3584 = vmatpush.bf16.msrb.mxu3 %v7412_v9  ;;  %v8669_v9 = vld [vmem:[#allocation8 + $0xe8] sm:$0xf0]  ;;  %v6936_v20 = vor.u32 %v8878_v13, %v6935_v11  ;;  %v7331_v0 = vld [vmem:[#allocation8 + $0xa60] sm:$0xf]  ;;  %v9054_v11 = vld [vmem:[#allocation8 + $0xcf0] sm:$0xf0] }
 0x134   :  { %v8801_v63 = vld [vmem:[#allocation8 + $0x508] sm:$0xf0]  ;;  %v6583_v13 = vld [vmem:[#allocation8 + $0x488] sm:$0xf] }
 0x135   :  { %3637 = vmatmul.bf16.vlgmr.msrb.gmra.mxu1 %v9897_v34  ;;  %3622 = vmatpush.bf16.msra.mxu0 %v6404_v21 }
 0x136   :  { %3681 = vmatpush.bf16.msra.mxu1 %v6320_v7  ;;  %3655 = vmatpush.bf16.msra.mxu2 %v7724_v18  ;;  %v6099_v7 = vld [vmem:[#allocation8 + $0xc0] sm:$0xf]  ;;  %v7501_v18 = vld [vmem:[#allocation8 + $0xbe4] sm:$0xf0] }
 0x137   :  { %3642 = vmatpush.bf16.msra.mxu3 %v7372_v15  ;;  %3611 = vmatmul.bf16.vlgmr.msrb.gmra.mxu2 %v9887_v2  ;;  %v8927_v15 = vld [vmem:[#allocation8 + $0x8fc] sm:$0xf]  ;;  %v6100_v19 = vor.u32 %v8669_v9, %v6099_v7  ;;  %v7504_v25 = vor.u32 %v9015_v17, %v7501_v18  ;;  %v8834_v7 = vld [vmem:[#allocation8 + $0x610] sm:$0xf0]  ;;  %v7639_v9 = vld [vmem:[#allocation8 + $0xcc8] sm:$0xf] }
 0x138   :  { %3585 = vmatmul.bf16.vlgmr.msrb.gmra.mxu3 %v9904_v10  ;;  %v7152_v21 = vor.u32 %v8927_v15, %v7149_v16  ;;  %v8790_v15 = vld [vmem:[#allocation8 + $0x4b0] sm:$0xf0]  ;;  %v7287_v16 = vld [vmem:[#allocation8 + $0xa08] sm:$0xf] }
 0x139   :  { %3623 = vmatpush.bf16.msra.mxu0 %v6360_v36  ;;  %v8647_v36 = vld [vmem:[#allocation8 + $0x38] sm:$0xf0]  ;;  %v8966_v17 = vld [vmem:[#allocation8 + $0xa30] sm:$0xf0]  ;;  %v6584_v22 = vor.u32 %v8790_v15, %v6583_v13 }
 0x13a   :  { %3682 = vmatpush.bf16.msra.mxu1 %v6276_v24  ;;  %3656 = vmatpush.bf16.msra.mxu2 %v7680_v32  ;;  %v6891_v24 = vld [vmem:[#allocation8 + $0x6f0] sm:$0xf]  ;;  %v8746_v13 = vld [vmem:[#allocation8 + $0x350] sm:$0xf0] }
 0x13b   :  { %3643 = vmatpush.bf16.msra.mxu3 %v7328_v28  ;;  %v7105_v28 = vld [vmem:[#allocation8 + $0x8cc] sm:$0xf0]  ;;  %v6892_v33 = vor.u32 %v8867_v26, %v6891_v24  ;;  %v9043_v24 = vld [vmem:[#allocation8 + $0xc98] sm:$0xf0]  ;;  %v7288_v26 = vor.u32 %v8966_v17, %v7287_v16  ;;  %v7111_v16 = vld [vmem:[#allocation8 + $0x8a8] sm:$0xf] }
 0x13c   :  { %3624 = vmatmul.bf16.vlgmr.msra.gmra.mxu0 %v9890_v8  ;;  %v6011_v32 = vld [vmem:[#allocation8 + $0x10] sm:$0xf]  ;;  %v7108_v35 = vor.u32 %v8916_v27, %v7105_v28  ;;  %v6321_v27 = vld [vmem:[#allocation8 + $0x2a4] sm:$0xf0]  ;;  %v8922_v17 = vld [vmem:[#allocation8 + $0x8d0] sm:$0xf0] }
 0x13d   :  { %3674 = vmatpush.bf16.msrb.mxu0 %v7812_v39  ;;  %v7460_v39 = vor.u32 %v9004_v29, %v7457_v30  ;;  %v6012_v44 = vor.u32 %v8647_v36, %v6011_v32  ;;  %v6539_v28 = vld [vmem:[#allocation8 + $0x430] sm:$0xf]  ;;  %v8779_v29 = vld [vmem:[#allocation8 + $0x458] sm:$0xf0] }
 0x13e   :  { %3683 = vmatpush.bf16.msra.mxu1 %v6232_v41  ;;  %3657 = vmatpush.bf16.msra.mxu2 %v7636_v50  ;;  %v7727_v41 = vld [vmem:[#allocation8 + $0xd78] sm:$0xf]  ;;  %v7243_v30 = vld [vmem:[#allocation8 + $0x9b0] sm:$0xf]  ;;  %v6540_v36 = vor.u32 %v8779_v29, %v6539_v28  ;;  %v7112_v28 = vor.u32 %v8922_v17, %v7111_v16  ;;  %v8983_v29 = vld [vmem:[#allocation8 + $0xabc] sm:$0xf] }
 0x13f   :  { %3644 = vmatpush.bf16.msra.mxu3 %v7284_v47  ;;  %v7061_v47 = vld [vmem:[#allocation8 + $0x874] sm:$0xf0]  ;;  %v7728_v53 = vor.u32 %v9076_v42, %v7727_v41  ;;  %v6277_v42 = vld [vmem:[#allocation8 + $0x24c] sm:$0xf0]  ;;  %v8884_v17 = vld [vmem:[#allocation8 + $0x7a4] sm:$0xf] }
 0x140   :  { %v6671_v50 = vld [vmem:[#allocation8 + $0x538] sm:$0xf] }
 0x141   :  { %3675 = vmatpush.bf16.msrb.mxu0 %v7768_v56  ;;  %v7064_v56 = vor.u32 %v8905_v43, %v7061_v47  ;;  %v6495_v43 = vld [vmem:[#allocation8 + $0x3d8] sm:$0xf]  ;;  %v8768_v47 = vld [vmem:[#allocation8 + $0x400] sm:$0xf0] }
 0x142   :  { %3684 = vmatpush.bf16.msra.mxu1 %v6188_v57  ;;  %3658 = vmatpush.bf16.msra.mxu2 %v7592_v45  ;;  %v7416_v57 = vor.u32 %v8993_v48, %v7413_v49  ;;  %v7376_v45 = vor.u32 %v8988_v55, %v7375_v54  ;;  %v7199_v48 = vld [vmem:[#allocation8 + $0x958] sm:$0xf]  ;;  %v8944_v49 = vld [vmem:[#allocation8 + $0x980] sm:$0xf0]  ;;  %v9021_v54 = vld [vmem:[#allocation8 + $0xbe8] sm:$0xf0] }
 0x143   :  { %3645 = vmatpush.bf16.msra.mxu3 %v7240_v59  ;;  %v6672_v59 = vor.u32 %v8812_v51, %v6671_v50  ;;  %v8697_v55 = vld [vmem:[#allocation8 + $0x1cc] sm:$0xf]  ;;  %v6585_v16 = vld [vmem:[#allocation8 + $0x4b4] sm:$0xf0] }
 0x145   :  { %3707 = vmatpush.bf16.msra.mxu0 %v7024_v58  ;;  %v6803_v58 = vld [vmem:[#allocation8 + $0x640] sm:$0xf] }
 0x146   :  { %3685 = vmatpush.bf16.msra.mxu1 %v6144_v4  ;;  %3659 = vmatpush.bf16.msra.mxu2 %v7548_v12  ;;  %v6804_v3 = vor.u32 %v8845_v60, %v6803_v58  ;;  %v7684_v4 = vor.u32 %v9065_v46, %v7683_v61  ;;  %v7332_v12 = vor.u32 %v8977_v1, %v7331_v0  ;;  %v6451_v60 = vld [vmem:[#allocation8 + $0x380] sm:$0xf]  ;;  %v8757_v61 = vld [vmem:[#allocation8 + $0x3a8] sm:$0xf0] }
 0x147   :  { %3646 = vmatpush.bf16.msra.mxu3 %v7196_v6  ;;  %v6628_v6 = vor.u32 %v8801_v63, %v6627_v62  ;;  %v7200_v58 = vor.u32 %v8944_v49, %v7199_v48  ;;  %v7155_v62 = vld [vmem:[#allocation8 + $0x900] sm:$0xf]  ;;  %v8933_v63 = vld [vmem:[#allocation8 + $0x928] sm:$0xf0] }
 0x149   :  { %3708 = vmatpush.bf16.msra.mxu0 %v6980_v5  ;;  %v6759_v5 = vld [vmem:[#allocation8 + $0x5e8] sm:$0xf] }
 0x14a   :  { %3686 = vmatpush.bf16.msra.mxu1 %v6100_v19  ;;  %3660 = vmatpush.bf16.msra.mxu2 %v7504_v25  ;;  %v6760_v18 = vor.u32 %v8834_v7, %v6759_v5  ;;  %v7640_v19 = vor.u32 %v9054_v11, %v7639_v9  ;;  %v8719_v25 = vld [vmem:[#allocation8 + $0x27c] sm:$0xf]  ;;  %v7463_v5 = vld [vmem:[#allocation8 + $0xb68] sm:$0xf]  ;;  %v8686_v7 = vld [vmem:[#allocation8 + $0x174] sm:$0xf]  ;;  %v7156_v9 = vor.u32 %v8933_v63, %v7155_v62 }
 0x14b   :  { %3647 = vmatpush.bf16.msra.mxu3 %v7152_v21  ;;  %v8823_v21 = vld [vmem:[#allocation8 + $0x5b8] sm:$0xf0]  ;;  %v6189_v11 = vld [vmem:[#allocation8 + $0x19c] sm:$0xf0] }
 0x14c   :  { %7844 = vmatmul.msk.bf16.vlgmr.msrb.gmra.mxu0 %vm3365_vm2, %v9906_v14 }
 0x14d   :  { %3709 = vmatpush.bf16.msra.mxu0 %v6936_v20  ;;  %v6715_v20 = vld [vmem:[#allocation8 + $0x590] sm:$0xf] }
 0x14e   :  { %3687 = vmatpush.bf16.msra.mxu1 %v6056_v31  ;;  %3661 = vmatpush.bf16.msra.mxu2 %v7460_v39  ;;  %v8955_v31 = vld [vmem:[#allocation8 + $0x9d8] sm:$0xf0]  ;;  %v6716_v32 = vor.u32 %v8823_v21, %v6715_v20  ;;  %v8708_v39 = vld [vmem:[#allocation8 + $0x224] sm:$0xf]  ;;  %v6192_v21 = vor.u32 %v8686_v7, %v6189_v11  ;;  %v7289_v7 = vld [vmem:[#allocation8 + $0xa34] sm:$0xf0] }
 0x14f   :  { %3648 = vmatpush.bf16.msra.mxu3 %v7108_v35  ;;  %v6324_v35 = vor.u32 %v8719_v25, %v6321_v27  ;;  %v7244_v41 = vor.u32 %v8955_v31, %v7243_v30  ;;  %v6280_v51 = vor.u32 %v8708_v39, %v6277_v42  ;;  %v6145_v25 = vld [vmem:[#allocation8 + $0x144] sm:$0xf0]  ;;  %v6363_v31 = vld [vmem:[#allocation8 + $0x2d0] sm:$0xf]  ;;  %v9098_v39 = vld [vmem:[#allocation8 + $0xe50] sm:$0xf0] }
 0x150   :  { %v7377_v30 = vld [vmem:[#allocation8 + $0xae4] sm:$0xf0] }
 0x151   :  { %3710 = vmatpush.bf16.msra.mxu0 %v6892_v33  ;;  %v7596_v33 = vor.u32 %v9043_v24, %v7595_v23  ;;  %v8999_v23 = vld [vmem:[#allocation8 + $0xb38] sm:$0xf0]  ;;  %v7380_v42 = vor.u32 %v8983_v29, %v7377_v30  ;;  %v8774_v29 = vld [vmem:[#allocation8 + $0x434] sm:$0xf] }
 0x152   :  { %3688 = vmatpush.bf16.msra.mxu1 %v6012_v44  ;;  %3662 = vmatpush.bf16.msra.mxu2 %v7416_v57  ;;  %v7552_v44 = vor.u32 %v9032_v38, %v7551_v37  ;;  %v8675_v24 = vld [vmem:[#allocation8 + $0x11c] sm:$0xf]  ;;  %v7815_v38 = vld [vmem:[#allocation8 + $0xe28] sm:$0xf] }
 0x153   :  { %3649 = vmatpush.bf16.msra.mxu3 %v7064_v56 }
 0x155   :  { %3711 = vmatpush.bf16.msra.mxu0 %v6848_v52  ;;  %3689 = vmatmul.bf16.vlgmr.msra.gmra.mxu1 %v9887_v2  ;;  %v6496_v52 = vor.u32 %v8768_v47, %v6495_v43  ;;  %v8807_v43 = vld [vmem:[#allocation8 + $0x53c] sm:$0xf]  ;;  %v6673_v47 = vld [vmem:[#allocation8 + $0x564] sm:$0xf0] }
 0x156   :  { %3733 = vmatpush.bf16.msrb.mxu1 %v7728_v53  ;;  %3720 = vmatpush.bf16.msrb.mxu2 %v7376_v45  ;;  %v7507_v53 = vld [vmem:[#allocation8 + $0xbc0] sm:$0xf] }
 0x157   :  { %3694 = vmatpush.bf16.msrb.mxu3 %v6672_v59  ;;  %3663 = vmatmul.bf16.vlgmr.msra.gmra.mxu2 %v9904_v10  ;;  %v3378_v50 = vpop.f32.mrf.mxu2  ;;  %v3391_v56 = vpop.f32.mrf.mxu3  ;;  %v6233_v59 = vld [vmem:[#allocation8 + $0x1f4] sm:$0xf0]  ;;  %v7508_v0 = vor.u32 %v9021_v54, %v7507_v53  ;;  %v7333_v53 = vld [vmem:[#allocation8 + $0xa8c] sm:$0xf0]  ;;  %v6676_v54 = vor.u32 %v8807_v43, %v6673_v47  ;;  %v7201_v43 = vld [vmem:[#allocation8 + $0x984] sm:$0xf0] }
 0x158   :  { %3650 = vmatmul.bf16.vlgmr.msra.gmra.mxu3 %v9899_v40  ;;  %v3392_v46 = vadd.f32 %v3391_v56, %v3378_v50  ;;  %v7816_v50 = vor.u32 %v9098_v39, %v7815_v38  ;;  %v9087_v56 = vld [vmem:[#allocation8 + $0xdf8] sm:$0xf0] }
 0x159   :  { %3712 = vmatpush.bf16.msra.mxu0 %v6804_v3  ;;  %v3404_v57 = vpop.f32.mrf.mxu0  ;;  %v3417_v45 = vpop.f32.mrf.mxu1  ;;  %v6236_v3 = vor.u32 %v8697_v55, %v6233_v59  ;;  %v7771_v55 = vld [vmem:[#allocation8 + $0xdd0] sm:$0xf] }
 0x15a   :  { %3734 = vmatpush.bf16.msrb.mxu1 %v7684_v4  ;;  %3721 = vmatpush.bf16.msrb.mxu2 %v7332_v12  ;;  %v3405_v1 = vadd.f32 %v3404_v57, %v3392_v46  ;;  %v6452_v4 = vor.u32 %v8757_v61, %v6451_v60  ;;  %v6407_v12 = vld [vmem:[#allocation8 + $0x328] sm:$0xf]  ;;  %v8796_v57 = vld [vmem:[#allocation8 + $0x4e4] sm:$0xf]  ;;  %v6629_v59 = vld [vmem:[#allocation8 + $0x50c] sm:$0xf0] }
 0x15b   :  { %3695 = vmatpush.bf16.msrb.mxu3 %v6628_v6  ;;  %v9010_v6 = vld [vmem:[#allocation8 + $0xb90] sm:$0xf0]  ;;  %v8895_v60 = vld [vmem:[#allocation8 + $0x7fc] sm:$0xf]  ;;  %v7025_v61 = vld [vmem:[#allocation8 + $0x824] sm:$0xf0] }
 0x15c   :  { %v3418_v15 = vadd.f32 %v3417_v45, %v3405_v1  ;;  %v8653_v1 = vld [vmem:[#allocation8 + $0x6c] sm:$0xf] }
 0x15d   :  { %3713 = vmatpush.bf16.msra.mxu0 %v6760_v18  ;;  %v7464_v18 = vor.u32 %v9010_v6, %v7463_v5  ;;  %v6057_v5 = vld [vmem:[#allocation8 + $0x94] sm:$0xf0]  ;;  %v8961_v6 = vld [vmem:[#allocation8 + $0xa0c] sm:$0xf] }
 0x15e   :  { %3735 = vmatpush.bf16.msrb.mxu1 %v7640_v19  ;;  %3722 = vmatpush.bf16.msrb.mxu2 %v7288_v26  ;;  %v7419_v19 = vld [vmem:[#allocation8 + $0xb10] sm:$0xf] }
 0x15f   :  { %3696 = vmatpush.bf16.msrb.mxu3 %v6584_v22  ;;  %v3380_v20 = vpop.f32.mrf.mxu2  ;;  %v6408_v22 = vor.u32 %v8746_v13, %v6407_v12  ;;  %v3393_v26 = vpop.f32.mrf.mxu3  ;;  %v7420_v37 = vor.u32 %v8999_v23, %v7419_v19  ;;  %v6632_v12 = vor.u32 %v8796_v57, %v6629_v59  ;;  %v7028_v13 = vor.u32 %v8895_v60, %v7025_v61  ;;  %v8950_v23 = vld [vmem:[#allocation8 + $0x9b4] sm:$0xf]  ;;  %v7157_v57 = vld [vmem:[#allocation8 + $0x92c] sm:$0xf0]  ;;  %v9049_v60 = vld [vmem:[#allocation8 + $0xccc] sm:$0xf] }
 0x160   :  { %v6060_v19 = vor.u32 %v8653_v1, %v6057_v5  ;;  %v7292_v20 = vor.u32 %v8961_v6, %v7289_v7  ;;  %v7641_v61 = vld [vmem:[#allocation8 + $0xcf4] sm:$0xf0] }
 0x161   :  { %3714 = vmatpush.bf16.msra.mxu0 %v6716_v32  ;;  %v3406_v27 = vpop.f32.mrf.mxu0  ;;  %v3419_v32 = vpop.f32.mrf.mxu1  ;;  %v7644_v7 = vor.u32 %v9049_v60, %v7641_v61  ;;  %v6717_v60 = vld [vmem:[#allocation8 + $0x5bc] sm:$0xf0]  ;;  %v9082_v61 = vld [vmem:[#allocation8 + $0xdd4] sm:$0xf] }
 0x162   :  { %3736 = vmatpush.bf16.msrb.mxu1 %v7596_v33  ;;  %3723 = vmatpush.bf16.msrb.mxu2 %v7244_v41  ;;  %v8735_v33 = vld [vmem:[#allocation8 + $0x2f8] sm:$0xf0]  ;;  %v6148_v41 = vor.u32 %v8675_v24, %v6145_v25  ;;  %v7245_v24 = vld [vmem:[#allocation8 + $0x9dc] sm:$0xf0]  ;;  %v8873_v32 = vld [vmem:[#allocation8 + $0x74c] sm:$0xf] }
 0x163   :  { %3697 = vmatpush.bf16.msrb.mxu3 %v6540_v36  ;;  %v8911_v36 = vld [vmem:[#allocation8 + $0x878] sm:$0xf0]  ;;  %v6364_v48 = vor.u32 %v8735_v33, %v6363_v31  ;;  %v6541_v31 = vld [vmem:[#allocation8 + $0x45c] sm:$0xf0]  ;;  %v6937_v33 = vld [vmem:[#allocation8 + $0x774] sm:$0xf0]  ;;  %v7248_v38 = vor.u32 %v8950_v23, %v7245_v24 }
 0x164   :  { %3715 = vmatmul.bf16.vlgmr.msra.gmra.mxu0 %v9897_v34  ;;  %v9071_v27 = vld [vmem:[#allocation8 + $0xd7c] sm:$0xf]  ;;  %v6544_v47 = vor.u32 %v8774_v29, %v6541_v31  ;;  %v6805_v23 = vld [vmem:[#allocation8 + $0x66c] sm:$0xf0]  ;;  %v8906_v24 = vld [vmem:[#allocation8 + $0x854] sm:$0xf] }
 0x165   :  { %3759 = vmatpush.bf16.msrb.mxu0 %v6324_v35  ;;  %v7067_v35 = vld [vmem:[#allocation8 + $0x850] sm:$0xf]  ;;  %v7553_v29 = vld [vmem:[#allocation8 + $0xc44] sm:$0xf0] }
 0x166   :  { %3737 = vmatpush.bf16.msrb.mxu1 %v7552_v44  ;;  %3724 = vmatpush.bf16.msrb.mxu2 %v7200_v58  ;;  %v7068_v49 = vor.u32 %v8911_v36, %v7067_v35  ;;  %v8664_v44 = vld [vmem:[#allocation8 + $0xc4] sm:$0xf] }
 0x167   :  { %3698 = vmatpush.bf16.msrb.mxu3 %v6496_v52  ;;  %v8972_v52 = vld [vmem:[#allocation8 + $0xa64] sm:$0xf] }
 0x168   :  { %v3430_v58 = vpop.f32.mrf.mxu2 }
 0x169   :  { %3760 = vmatpush.bf16.msrb.mxu0 %v6280_v51  ;;  %v6101_v51 = vld [vmem:[#allocation8 + $0xec] sm:$0xf0]  ;;  %v3431_v46 = vadd.f32 %v3430_v58, %v3418_v15  ;;  %v3443_v45 = vpop.f32.mrf.mxu3  ;;  %v3456_v62 = vpop.f32.mrf.mxu0  ;;  %v8785_v15 = vld [vmem:[#allocation8 + $0x48c] sm:$0xf] }
 0x16a   :  { %3738 = vmatpush.bf16.msrb.mxu1 %v7508_v0  ;;  %3725 = vmatpush.bf16.msrb.mxu2 %v7156_v9  ;;  %v6104_v63 = vor.u32 %v8664_v44, %v6101_v51  ;;  %v7336_v0 = vor.u32 %v8972_v52, %v7333_v53  ;;  %v6588_v25 = vor.u32 %v8785_v15, %v6585_v16  ;;  %v7685_v44 = vld [vmem:[#allocation8 + $0xd4c] sm:$0xf0]  ;;  %v6497_v51 = vld [vmem:[#allocation8 + $0x404] sm:$0xf0]  ;;  %v8862_v52 = vld [vmem:[#allocation8 + $0x6f4] sm:$0xf] }
 0x16b   :  { %3699 = vmatpush.bf16.msrb.mxu3 %v6452_v4  ;;  %v7772_v4 = vor.u32 %v9087_v56, %v7771_v55  ;;  %v9935_v9 = vadd.f32 %v3443_v45, %v3431_v46  ;;  %v6893_v53 = vld [vmem:[#allocation8 + $0x71c] sm:$0xf0]  ;;  %v8928_v56 = vld [vmem:[#allocation8 + $0x904] sm:$0xf] }
 0x16c   :  { %v6896_v59 = vor.u32 %v8862_v52, %v6893_v53  ;;  %v8752_v46 = vld [vmem:[#allocation8 + $0x384] sm:$0xf] }
 0x16d   :  { %3761 = vmatpush.bf16.msrb.mxu0 %v6236_v3  ;;  %v3469_v3 = vpop.f32.mrf.mxu1  ;;  %v9016_v52 = vld [vmem:[#allocation8 + $0xbc4] sm:$0xf] }
 0x16e   :  { %3739 = vmatpush.bf16.msrb.mxu1 %v7464_v18  ;;  %3726 = vmatpush.bf16.msrb.mxu2 %v7112_v28  ;;  %v9937_v11 = vadd.f32 %v3469_v3, %v3456_v62  ;;  %v6981_v18 = vld [vmem:[#allocation8 + $0x7cc] sm:$0xf0]  ;;  %v7729_v28 = vld [vmem:[#allocation8 + $0xda4] sm:$0xf0]  ;;  %v7160_v3 = vor.u32 %v8928_v56, %v7157_v57  ;;  %v8802_v57 = vld [vmem:[#allocation8 + $0x510] sm:$0xf0] }
 0x16f   :  { %3700 = vmatpush.bf16.msrb.mxu3 %v6408_v22  ;;  %v6013_v22 = vld [vmem:[#allocation8 + $0x3c] sm:$0xf0]  ;;  %v6984_v26 = vor.u32 %v8884_v17, %v6981_v18  ;;  %v6453_v62 = vld [vmem:[#allocation8 + $0x3ac] sm:$0xf0]  ;;  %v9038_v17 = vld [vmem:[#allocation8 + $0xc74] sm:$0xf] }
 0x170   :  { %v3432_v30 = vpop.f32.mrf.mxu2  ;;  %v6456_v15 = vor.u32 %v8752_v46, %v6453_v62  ;;  %v7597_v18 = vld [vmem:[#allocation8 + $0xc9c] sm:$0xf0]  ;;  %v6635_v56 = vld [vmem:[#allocation8 + $0x4e8] sm:$0xf]  ;;  %v8725_v62 = vld [vmem:[#allocation8 + $0x2a8] sm:$0xf0] }
 0x171   :  { %3762 = vmatpush.bf16.msrb.mxu0 %v6192_v21  ;;  %v8642_v21 = vld [vmem:[#allocation8 + $0x14] sm:$0xf]  ;;  %v3445_v35 = vpop.f32.mrf.mxu3  ;;  %v3458_v36 = vpop.f32.mrf.mxu0  ;;  %v7773_v46 = vld [vmem:[#allocation8 + $0xdfc] sm:$0xf0] }
 0x172   :  { %3740 = vmatpush.bf16.msrb.mxu1 %v7420_v37  ;;  %3727 = vmatpush.bf16.msrb.mxu2 %v7068_v49  ;;  %v6016_v37 = vor.u32 %v8642_v21, %v6013_v22  ;;  %v9060_v49 = vld [vmem:[#allocation8 + $0xd24] sm:$0xf]  ;;  %v6409_v21 = vld [vmem:[#allocation8 + $0x354] sm:$0xf0]  ;;  %v8730_v35 = vld [vmem:[#allocation8 + $0x2d4] sm:$0xf] }
 0x173   :  { %3701 = vmatpush.bf16.msrb.mxu3 %v6364_v48  ;;  %v6940_v48 = vor.u32 %v8873_v32, %v6937_v33  ;;  %v7688_v55 = vor.u32 %v9060_v49, %v7685_v44  ;;  %v8840_v22 = vld [vmem:[#allocation8 + $0x644] sm:$0xf]  ;;  %v6679_v32 = vld [vmem:[#allocation8 + $0x540] sm:$0xf]  ;;  %v8813_v33 = vld [vmem:[#allocation8 + $0x568] sm:$0xf0] }
 0x174   :  { %v6808_v31 = vor.u32 %v8840_v22, %v6805_v23  ;;  %v8890_v22 = vld [vmem:[#allocation8 + $0x7d0] sm:$0xf0] }
 0x175   :  { %3763 = vmatpush.bf16.msrb.mxu0 %v6148_v41  ;;  %3741 = vmatmul.bf16.vlgmr.msrb.gmra.mxu1 %v9904_v10  ;;  %v3471_v39 = vpop.f32.mrf.mxu1  ;;  %v7732_v41 = vor.u32 %v9071_v27, %v7729_v28  ;;  %v7069_v27 = vld [vmem:[#allocation8 + $0x87c] sm:$0xf0]  ;;  %v9027_v28 = vld [vmem:[#allocation8 + $0xc1c] sm:$0xf] }
 0x176   :  { %3798 = vmatpush.bf16.msra.mxu1 %v7380_v42  ;;  %3772 = vmatpush.bf16.msra.mxu2 %v6676_v54  ;;  %v8939_v42 = vld [vmem:[#allocation8 + $0x95c] sm:$0xf]  ;;  %v8829_v39 = vld [vmem:[#allocation8 + $0x5ec] sm:$0xf] }
 0x177   :  { %3752 = vmatpush.bf16.msra.mxu3 %v7816_v50  ;;  %3728 = vmatmul.bf16.vlgmr.msrb.gmra.mxu2 %v9899_v40  ;;  %v8763_v50 = vld [vmem:[#allocation8 + $0x3dc] sm:$0xf]  ;;  %v7204_v54 = vor.u32 %v8939_v42, %v7201_v43  ;;  %v7072_v43 = vor.u32 %v8906_v24, %v7069_v27  ;;  %v7421_v24 = vld [vmem:[#allocation8 + $0xb3c] sm:$0xf0]  ;;  %v8780_v27 = vld [vmem:[#allocation8 + $0x460] sm:$0xf0] }
 0x178   :  { %3702 = vmatmul.bf16.vlgmr.msrb.gmra.mxu3 %v9890_v8  ;;  %v6500_v58 = vor.u32 %v8763_v50, %v6497_v51  ;;  %v3495_v45 = vpop.f32.mrf.mxu2  ;;  %v7556_v50 = vor.u32 %v9027_v28, %v7553_v29  ;;  %v6680_v51 = vor.u32 %v8813_v33, %v6679_v32  ;;  %v7383_v28 = vld [vmem:[#allocation8 + $0xac0] sm:$0xf]  ;;  %v8989_v29 = vld [vmem:[#allocation8 + $0xae8] sm:$0xf0]  ;;  %v8703_v32 = vld [vmem:[#allocation8 + $0x1f8] sm:$0xf0] }
 0x179   :  { %3764 = vmatpush.bf16.msrb.mxu0 %v6104_v63  ;;  %v8851_v63 = vld [vmem:[#allocation8 + $0x69c] sm:$0xf] }
 0x17a   :  { %3799 = vmatpush.bf16.msra.mxu1 %v7336_v0  ;;  %3773 = vmatpush.bf16.msra.mxu2 %v6632_v12  ;;  %v6849_v0 = vld [vmem:[#allocation8 + $0x6c4] sm:$0xf0]  ;;  %v8917_v12 = vld [vmem:[#allocation8 + $0x8ac] sm:$0xf] }
 0x17b   :  { %3753 = vmatpush.bf16.msra.mxu3 %v7772_v4  ;;  %v3482_v1 = vpop.f32.mrf.mxu3  ;;  %v3508_v4 = vpop.f32.mrf.mxu0  ;;  %v6852_v16 = vor.u32 %v8851_v63, %v6849_v0  ;;  %v7031_v0 = vld [vmem:[#allocation8 + $0x800] sm:$0xf] }
 0x17c   :  { %v3483_v5 = vadd.f32 %v3482_v1, %v9937_v11  ;;  %v8901_v1 = vld [vmem:[#allocation8 + $0x828] sm:$0xf0] }
 0x17d   :  { %3765 = vmatpush.bf16.msrb.mxu0 %v6060_v19  ;;  %v3521_v6 = vpop.f32.mrf.mxu1  ;;  %v8741_v19 = vld [vmem:[#allocation8 + $0x32c] sm:$0xf] }
 0x17e   :  { %3800 = vmatpush.bf16.msra.mxu1 %v7292_v20  ;;  %3774 = vmatpush.bf16.msra.mxu2 %v6588_v25  ;;  %v3496_v20 = vadd.f32 %v3495_v45, %v3483_v5  ;;  %v6412_v30 = vor.u32 %v8741_v19, %v6409_v21  ;;  %v6327_v45 = vld [vmem:[#allocation8 + $0x280] sm:$0xf]  ;;  %v9005_v5 = vld [vmem:[#allocation8 + $0xb6c] sm:$0xf]  ;;  %v6987_v21 = vld [vmem:[#allocation8 + $0x7a8] sm:$0xf] }
 0x17f   :  { %3785 = vmatpush.bf16.msrb.mxu3 %v7028_v13  ;;  %v7113_v13 = vld [vmem:[#allocation8 + $0x8d4] sm:$0xf0] }
 0x180   :  { %v7116_v11 = vor.u32 %v8917_v12, %v7113_v13  ;;  %v3509_v25 = vadd.f32 %v3508_v4, %v3496_v20  ;;  %v6328_v12 = vor.u32 %v8725_v62, %v6327_v45  ;;  %v6591_v13 = vld [vmem:[#allocation8 + $0x490] sm:$0xf]  ;;  %v6151_v45 = vld [vmem:[#allocation8 + $0x120] sm:$0xf]  ;;  %v8681_v62 = vld [vmem:[#allocation8 + $0x148] sm:$0xf0] }
 0x181   :  { %3766 = vmatpush.bf16.msrb.mxu0 %v6016_v37  ;;  %v3497_v37 = vpop.f32.mrf.mxu2 }
 0x182   :  { %3801 = vmatpush.bf16.msra.mxu1 %v7248_v38  ;;  %3775 = vmatpush.bf16.msra.mxu2 %v6544_v47  ;;  %v9945_v36 = vadd.f32 %v3521_v6, %v3509_v25  ;;  %v6365_v38 = vld [vmem:[#allocation8 + $0x2fc] sm:$0xf0]  ;;  %v9093_v47 = vld [vmem:[#allocation8 + $0xe2c] sm:$0xf]  ;;  %v7465_v6 = vld [vmem:[#allocation8 + $0xb94] sm:$0xf0] }
 0x183   :  { %3786 = vmatpush.bf16.msrb.mxu3 %v6984_v26  ;;  %v7600_v26 = vor.u32 %v9038_v17, %v7597_v18  ;;  %v3484_v42 = vpop.f32.mrf.mxu3  ;;  %v3510_v49 = vpop.f32.mrf.mxu0  ;;  %v6368_v53 = vor.u32 %v8730_v35, %v6365_v38  ;;  %v6283_v17 = vld [vmem:[#allocation8 + $0x228] sm:$0xf]  ;;  %v8714_v18 = vld [vmem:[#allocation8 + $0x250] sm:$0xf0]  ;;  %v7468_v20 = vor.u32 %v9005_v5, %v7465_v6  ;;  %v6547_v25 = vld [vmem:[#allocation8 + $0x438] sm:$0xf] }
 0x184   :  { %3767 = vmatmul.bf16.vlgmr.msrb.gmra.mxu0 %v9887_v2  ;;  %v6943_v35 = vld [vmem:[#allocation8 + $0x750] sm:$0xf]  ;;  %v8879_v37 = vld [vmem:[#allocation8 + $0x778] sm:$0xf0]  ;;  %v6548_v38 = vor.u32 %v8780_v27, %v6547_v25  ;;  %v8736_v27 = vld [vmem:[#allocation8 + $0x300] sm:$0xf0] }
 0x185   :  { %3811 = vmatpush.bf16.msra.mxu0 %v7732_v41  ;;  %v6761_v41 = vld [vmem:[#allocation8 + $0x614] sm:$0xf0]  ;;  %v3523_v44 = vpop.f32.mrf.mxu1  ;;  %v6944_v49 = vor.u32 %v8879_v37, %v6943_v35  ;;  %v9099_v35 = vld [vmem:[#allocation8 + $0xe58] sm:$0xf0]  ;;  %v6063_v37 = vld [vmem:[#allocation8 + $0x70] sm:$0xf] }
 0x186   :  { %3802 = vmatpush.bf16.msra.mxu1 %v7204_v54  ;;  %3776 = vmatpush.bf16.msra.mxu2 %v6500_v58  ;;  %v6764_v54 = vor.u32 %v8829_v39, %v6761_v41  ;;  %v7384_v39 = vor.u32 %v8989_v29, %v7383_v28  ;;  %v6503_v41 = vld [vmem:[#allocation8 + $0x3e0] sm:$0xf]  ;;  %v6195_v44 = vld [vmem:[#allocation8 + $0x178] sm:$0xf] }
 0x187   :  { %3787 = vmatpush.bf16.msrb.mxu3 %v6940_v48  ;;  %v7817_v48 = vld [vmem:[#allocation8 + $0xe54] sm:$0xf0]  ;;  %v7207_v29 = vld [vmem:[#allocation8 + $0x960] sm:$0xf] }
 0x188   :  { %7845 = vmatmul.msk.bf16.vlgmr.msra.gmra.mxu3 %vm3365_vm2, %v9906_v14  ;;  %v7820_v58 = vor.u32 %v9093_v47, %v7817_v48  ;;  %v7339_v47 = vld [vmem:[#allocation8 + $0xa68] sm:$0xf]  ;;  %v8978_v48 = vld [vmem:[#allocation8 + $0xa90] sm:$0xf0] }
 0x189   :  { %3812 = vmatpush.bf16.msra.mxu0 %v7688_v55  ;;  %v7509_v55 = vld [vmem:[#allocation8 + $0xbec] sm:$0xf0] }
 0x18a   :  { %3803 = vmatpush.bf16.msra.mxu1 %v7160_v3  ;;  %3777 = vmatpush.bf16.msra.mxu2 %v6456_v15  ;;  %v7512_v63 = vor.u32 %v9016_v52, %v7509_v55  ;;  %v6636_v3 = vor.u32 %v8802_v57, %v6635_v56  ;;  %v8791_v15 = vld [vmem:[#allocation8 + $0x4b8] sm:$0xf0]  ;;  %v6899_v52 = vld [vmem:[#allocation8 + $0x6f8] sm:$0xf]  ;;  %v7340_v55 = vor.u32 %v8978_v48, %v7339_v47  ;;  %v6459_v56 = vld [vmem:[#allocation8 + $0x388] sm:$0xf] }
 0x18b   :  { %3788 = vmatpush.bf16.msrb.mxu3 %v6896_v59  ;;  %v8818_v59 = vld [vmem:[#allocation8 + $0x594] sm:$0xf]  ;;  %v6592_v23 = vor.u32 %v8791_v15, %v6591_v13  ;;  %v8747_v13 = vld [vmem:[#allocation8 + $0x358] sm:$0xf0]  ;;  %v7251_v15 = vld [vmem:[#allocation8 + $0x9b8] sm:$0xf] }
 0x18c   :  { %v6720_v4 = vor.u32 %v8818_v59, %v6717_v60  ;;  %v7295_v59 = vld [vmem:[#allocation8 + $0xa10] sm:$0xf]  ;;  %v8967_v60 = vld [vmem:[#allocation8 + $0xa38] sm:$0xf0] }
 0x18d   :  { %3813 = vmatpush.bf16.msra.mxu0 %v7644_v7  ;;  %v7776_v7 = vor.u32 %v9082_v61, %v7773_v46  ;;  %v9949_v19 = vpop.f32.mrf.mxu1  ;;  %v7296_v6 = vor.u32 %v8967_v60, %v7295_v59  ;;  %v6723_v60 = vld [vmem:[#allocation8 + $0x598] sm:$0xf] }
 0x18e   :  { %3804 = vmatpush.bf16.msra.mxu1 %v7116_v11  ;;  %3778 = vmatpush.bf16.msra.mxu2 %v6412_v30  ;;  %v8994_v11 = vld [vmem:[#allocation8 + $0xb14] sm:$0xf]  ;;  %v6988_v30 = vor.u32 %v8890_v22, %v6987_v21 }
 0x18f   :  { %3789 = vmatpush.bf16.msrb.mxu3 %v6852_v16  ;;  %v7032_v16 = vor.u32 %v8901_v1, %v7031_v0  ;;  %v7424_v33 = vor.u32 %v8994_v11, %v7421_v24  ;;  %v6855_v1 = vld [vmem:[#allocation8 + $0x6a0] sm:$0xf]  ;;  %v8670_v21 = vld [vmem:[#allocation8 + $0xf0] sm:$0xf0] }
 0x191   :  { %3814 = vmatpush.bf16.msra.mxu0 %v7600_v26  ;;  %v6284_v26 = vor.u32 %v8714_v18, %v6283_v17 }
 0x192   :  { %3805 = vmatpush.bf16.msra.mxu1 %v7072_v43  ;;  %3779 = vmatpush.bf16.msra.mxu2 %v6368_v53  ;;  %v8769_v43 = vld [vmem:[#allocation8 + $0x408] sm:$0xf0]  ;;  %v8868_v53 = vld [vmem:[#allocation8 + $0x720] sm:$0xf0] }
 0x193   :  { %3790 = vmatpush.bf16.msrb.mxu3 %v6808_v31  ;;  %v6239_v31 = vld [vmem:[#allocation8 + $0x1d0] sm:$0xf]  ;;  %v6900_v46 = vor.u32 %v8868_v53, %v6899_v52  ;;  %v7779_v52 = vld [vmem:[#allocation8 + $0xdd8] sm:$0xf]  ;;  %v9088_v53 = vld [vmem:[#allocation8 + $0xe00] sm:$0xf0] }
 0x194   :  { %v6240_v42 = vor.u32 %v8703_v32, %v6239_v31  ;;  %v7823_v31 = vld [vmem:[#allocation8 + $0xe30] sm:$0xf] }
 0x195   :  { %3815 = vmatpush.bf16.msra.mxu0 %v7556_v50  ;;  %3806 = vmatmul.bf16.vlgmr.msra.gmra.mxu1 %v9899_v40  ;;  %v8692_v50 = vld [vmem:[#allocation8 + $0x1a0] sm:$0xf0] }
 0x196   :  { %3850 = vmatpush.bf16.msrb.mxu1 %v6680_v51  ;;  %3830 = vmatpush.bf16.msrb.mxu2 %v7820_v58  ;;  %v3549_v51 = vpop.f32.mrf.mxu1  ;;  %v6196_v57 = vor.u32 %v8692_v50, %v6195_v44  ;;  %v8758_v58 = vld [vmem:[#allocation8 + $0x3b0] sm:$0xf0]  ;;  %v7824_v50 = vor.u32 %v9099_v35, %v7823_v31  ;;  %v6945_v31 = vld [vmem:[#allocation8 + $0x77c] sm:$0xf0]  ;;  %v9055_v35 = vld [vmem:[#allocation8 + $0xcf8] sm:$0xf0] }
 0x197   :  { %3791 = vmatpush.bf16.msrb.mxu3 %v6764_v54  ;;  %3780 = vmatmul.bf16.vlgmr.msra.gmra.mxu2 %v9890_v8  ;;  %v6504_v54 = vor.u32 %v8769_v43, %v6503_v41  ;;  %v6460_v5 = vor.u32 %v8758_v58, %v6459_v56  ;;  %v8835_v43 = vld [vmem:[#allocation8 + $0x618] sm:$0xf0]  ;;  %v8934_v44 = vld [vmem:[#allocation8 + $0x930] sm:$0xf0]  ;;  %v7033_v56 = vld [vmem:[#allocation8 + $0x82c] sm:$0xf0] }
 0x198   :  { %v3560_v61 = vpop.f32.mrf.mxu2  ;;  %v8648_v58 = vld [vmem:[#allocation8 + $0x40] sm:$0xf0] }
 0x199   :  { %3816 = vmatpush.bf16.msra.mxu0 %v7512_v63  ;;  %v3573_v0 = vpop.f32.mrf.mxu0 }
 0x19a   :  { %3851 = vmatpush.bf16.msrb.mxu1 %v6636_v3  ;;  %3831 = vmatpush.bf16.msrb.mxu2 %v7776_v7  ;;  %v8857_v3 = vld [vmem:[#allocation8 + $0x6c8] sm:$0xf0]  ;;  %v6415_v7 = vld [vmem:[#allocation8 + $0x330] sm:$0xf] }
 0x19b   :  { %3792 = vmatpush.bf16.msrb.mxu3 %v6720_v4  ;;  %v3534_v63 = vpop.f32.mrf.mxu3  ;;  %v6856_v18 = vor.u32 %v8857_v3, %v6855_v1  ;;  %v6416_v24 = vor.u32 %v8747_v13, %v6415_v7  ;;  %v7780_v1 = vor.u32 %v9088_v53, %v7779_v52  ;;  %v9044_v52 = vld [vmem:[#allocation8 + $0xca0] sm:$0xf0] }
 0x19c   :  { %v3548_v4 = vadd.f32 %v9949_v19, %v3534_v63  ;;  %v8846_v19 = vld [vmem:[#allocation8 + $0x670] sm:$0xf0]  ;;  %v8720_v63 = vld [vmem:[#allocation8 + $0x284] sm:$0xf] }
 0x19d   :  { %3817 = vmatpush.bf16.msra.mxu0 %v7468_v20  ;;  %v6107_v20 = vld [vmem:[#allocation8 + $0xc8] sm:$0xf] }
 0x19e   :  { %3863 = vmatpush.bf16.msra.mxu2 %v7032_v16  ;;  %3793 = vmatmul.bf16.vlgmr.msrb.gmra.mxu3 %v9897_v34  ;;  %v8956_v16 = vld [vmem:[#allocation8 + $0x9e0] sm:$0xf0]  ;;  %v3561_v17 = vadd.f32 %v3560_v61, %v3548_v4  ;;  %v9956_v22 = vpop.f32.mrf.mxu1  ;;  %v6108_v28 = vor.u32 %v8670_v21, %v6107_v20  ;;  %v7119_v4 = vld [vmem:[#allocation8 + $0x8b0] sm:$0xf]  ;;  %v9066_v20 = vld [vmem:[#allocation8 + $0xd50] sm:$0xf0] }
 0x19f   :  { %3837 = vmatpush.bf16.msra.mxu3 %v6328_v12  ;;  %3852 = vmatpush.bf16.msrb.mxu1 %v6592_v23  ;;  %v6152_v12 = vor.u32 %v8681_v62, %v6151_v45  ;;  %v6811_v23 = vld [vmem:[#allocation8 + $0x648] sm:$0xf]  ;;  %v7252_v25 = vor.u32 %v8956_v16, %v7251_v15  ;;  %v8824_v61 = vld [vmem:[#allocation8 + $0x5c0] sm:$0xf0]  ;;  %v9077_v62 = vld [vmem:[#allocation8 + $0xda8] sm:$0xf0] }
 0x1a0   :  { %v9958_v11 = vadd.f32 %v3573_v0, %v3561_v17  ;;  %v3562_v32 = vpop.f32.mrf.mxu2  ;;  %v6329_v0 = vld [vmem:[#allocation8 + $0x2ac] sm:$0xf0]  ;;  %v6724_v7 = vor.u32 %v8824_v61, %v6723_v60  ;;  %v8885_v15 = vld [vmem:[#allocation8 + $0x7ac] sm:$0xf]  ;;  %v6989_v16 = vld [vmem:[#allocation8 + $0x7d4] sm:$0xf0] }
 0x1a1   :  { %3818 = vmatpush.bf16.msra.mxu0 %v7424_v33  ;;  %v6812_v33 = vor.u32 %v8846_v19, %v6811_v23  ;;  %v3575_v41 = vpop.f32.mrf.mxu0  ;;  %v6332_v13 = vor.u32 %v8720_v63, %v6329_v0  ;;  %v7691_v17 = vld [vmem:[#allocation8 + $0xd28] sm:$0xf]  ;;  %v8709_v21 = vld [vmem:[#allocation8 + $0x22c] sm:$0xf]  ;;  %v6285_v23 = vld [vmem:[#allocation8 + $0x254] sm:$0xf0] }
 0x1a2   :  { %3864 = vmatpush.bf16.msra.mxu2 %v6988_v30  ;;  %v8945_v30 = vld [vmem:[#allocation8 + $0x988] sm:$0xf0]  ;;  %v7075_v19 = vld [vmem:[#allocation8 + $0x858] sm:$0xf]  ;;  %v6241_v41 = vld [vmem:[#allocation8 + $0x1fc] sm:$0xf0] }
 0x1a3   :  { %3838 = vmatpush.bf16.msra.mxu3 %v6284_v26  ;;  %3853 = vmatpush.bf16.msrb.mxu1 %v6548_v38  ;;  %v6371_v26 = vld [vmem:[#allocation8 + $0x2d8] sm:$0xf]  ;;  %v8659_v38 = vld [vmem:[#allocation8 + $0x98] sm:$0xf0]  ;;  %v7208_v48 = vor.u32 %v8945_v30, %v7207_v29  ;;  %v6288_v29 = vor.u32 %v8709_v21, %v6285_v23  ;;  %v8874_v30 = vld [vmem:[#allocation8 + $0x754] sm:$0xf] }
 0x1a4   :  { %3819 = vmatmul.bf16.vlgmr.msra.gmra.mxu0 %v9904_v10  ;;  %v6372_v47 = vor.u32 %v8736_v27, %v6371_v26  ;;  %v6064_v51 = vor.u32 %v8659_v38, %v6063_v37  ;;  %v8808_v26 = vld [vmem:[#allocation8 + $0x544] sm:$0xf]  ;;  %v6681_v27 = vld [vmem:[#allocation8 + $0x56c] sm:$0xf0]  ;;  %v9033_v63 = vld [vmem:[#allocation8 + $0xc48] sm:$0xf0] }
 0x1a5   :  { %3876 = vmatpush.bf16.msrb.mxu0 %v7384_v39  ;;  %v3536_v39 = vpop.f32.mrf.mxu3  ;;  %v6684_v38 = vor.u32 %v8808_v26, %v6681_v27  ;;  %v8852_v60 = vld [vmem:[#allocation8 + $0x6a4] sm:$0xf]  ;;  %v6857_v61 = vld [vmem:[#allocation8 + $0x6cc] sm:$0xf0]  ;;  %v7515_v23 = vld [vmem:[#allocation8 + $0xbc8] sm:$0xf] }
 0x1a6   :  { %3865 = vmatpush.bf16.msra.mxu2 %v6944_v49  ;;  %v7163_v49 = vld [vmem:[#allocation8 + $0x908] sm:$0xf]  ;;  %v3601_v59 = vpop.f32.mrf.mxu1  ;;  %v8698_v39 = vld [vmem:[#allocation8 + $0x1d4] sm:$0xf]  ;;  %v8665_v26 = vld [vmem:[#allocation8 + $0xcc] sm:$0xf] }
 0x1a7   :  { %3839 = vmatpush.bf16.msra.mxu3 %v6240_v42  ;;  %3854 = vmatpush.bf16.msrb.mxu1 %v6504_v54  ;;  %v6767_v42 = vld [vmem:[#allocation8 + $0x5f0] sm:$0xf]  ;;  %v8896_v54 = vld [vmem:[#allocation8 + $0x804] sm:$0xf]  ;;  %v7164_v45 = vor.u32 %v8934_v44, %v7163_v49  ;;  %v8863_v49 = vld [vmem:[#allocation8 + $0x6fc] sm:$0xf] }
 0x1a8   :  { %7846 = vmatmul.msk.bf16.vlgmr.msrb.gmra.mxu2 %vm3365_vm2, %v9906_v14  ;;  %v6901_v44 = vld [vmem:[#allocation8 + $0x724] sm:$0xf0]  ;;  %v6109_v27 = vld [vmem:[#allocation8 + $0xf4] sm:$0xf0] }
 0x1a9   :  { %3877 = vmatpush.bf16.msrb.mxu0 %v7340_v55  ;;  %v6768_v55 = vor.u32 %v8835_v43, %v6767_v42  ;;  %v6948_v42 = vor.u32 %v8874_v30, %v6945_v31  ;;  %v8797_v43 = vld [vmem:[#allocation8 + $0x4ec] sm:$0xf]  ;;  %v6505_v30 = vld [vmem:[#allocation8 + $0x40c] sm:$0xf0]  ;;  %v8830_v31 = vld [vmem:[#allocation8 + $0x5f4] sm:$0xf] }
 0x1aa   :  { %3866 = vmatpush.bf16.msra.mxu2 %v6900_v46  ;;  %v7735_v46 = vld [vmem:[#allocation8 + $0xd80] sm:$0xf] }
 0x1ab   :  { %3840 = vmatpush.bf16.msra.mxu3 %v6196_v57  ;;  %3855 = vmatpush.bf16.msrb.mxu1 %v6460_v5  ;;  %v6019_v57 = vld [vmem:[#allocation8 + $0x18] sm:$0xf]  ;;  %v8923_v5 = vld [vmem:[#allocation8 + $0x8d8] sm:$0xf0] }
 0x1ac   :  { %v6020_v3 = vor.u32 %v8648_v58, %v6019_v57  ;;  %v8786_v57 = vld [vmem:[#allocation8 + $0x494] sm:$0xf]  ;;  %v6593_v58 = vld [vmem:[#allocation8 + $0x4bc] sm:$0xf0] }
 0x1ad   :  { %3878 = vmatpush.bf16.msrb.mxu0 %v7296_v6  ;;  %v7036_v6 = vor.u32 %v8896_v54, %v7033_v56  ;;  %v8687_v54 = vld [vmem:[#allocation8 + $0x17c] sm:$0xf]  ;;  %v6904_v56 = vor.u32 %v8863_v49, %v6901_v44  ;;  %v8753_v49 = vld [vmem:[#allocation8 + $0x38c] sm:$0xf]  ;;  %v6461_v44 = vld [vmem:[#allocation8 + $0x3b4] sm:$0xf0] }
 0x1ae   :  { %3867 = vmatpush.bf16.msra.mxu2 %v6856_v18  ;;  %v7120_v18 = vor.u32 %v8923_v5, %v7119_v4  ;;  %v6596_v4 = vor.u32 %v8786_v57, %v6593_v58  ;;  %v8676_v5 = vld [vmem:[#allocation8 + $0x124] sm:$0xf]  ;;  %v8643_v58 = vld [vmem:[#allocation8 + $0x1c] sm:$0xf] }
 0x1af   :  { %3841 = vmatpush.bf16.msra.mxu3 %v6152_v12  ;;  %3856 = vmatpush.bf16.msrb.mxu1 %v6416_v24  ;;  %v7736_v12 = vor.u32 %v9077_v62, %v7735_v46  ;;  %v8912_v24 = vld [vmem:[#allocation8 + $0x880] sm:$0xf0]  ;;  %v7559_v62 = vld [vmem:[#allocation8 + $0xc20] sm:$0xf] }
 0x1b0   :  { %v7076_v32 = vor.u32 %v8912_v24, %v7075_v19  ;;  %v9022_v19 = vld [vmem:[#allocation8 + $0xbf0] sm:$0xf0]  ;;  %v9000_v57 = vld [vmem:[#allocation8 + $0xb40] sm:$0xf0] }
 0x1b1   :  { %3879 = vmatpush.bf16.msrb.mxu0 %v7252_v25  ;;  %v6992_v25 = vor.u32 %v8885_v15, %v6989_v16  ;;  %v8775_v15 = vld [vmem:[#allocation8 + $0x43c] sm:$0xf]  ;;  %v6549_v16 = vld [vmem:[#allocation8 + $0x464] sm:$0xf0] }
 0x1b2   :  { %3868 = vmatpush.bf16.msra.mxu2 %v6812_v33  ;;  %v7647_v33 = vld [vmem:[#allocation8 + $0xcd0] sm:$0xf]  ;;  %v3638_v37 = vpop.f32.mrf.mxu1 }
 0x1b3   :  { %3842 = vmatpush.bf16.msra.mxu3 %v6108_v28  ;;  %3857 = vmatpush.bf16.msrb.mxu1 %v6372_v47  ;;  %v7692_v28 = vor.u32 %v9066_v20, %v7691_v17  ;;  %v6637_v47 = vld [vmem:[#allocation8 + $0x514] sm:$0xf0] }
 0x1b4   :  { %v6640_v53 = vor.u32 %v8797_v43, %v6637_v47  ;;  %v6813_v20 = vld [vmem:[#allocation8 + $0x674] sm:$0xf0]  ;;  %v8654_v43 = vld [vmem:[#allocation8 + $0x74] sm:$0xf]  ;;  %v6065_v47 = vld [vmem:[#allocation8 + $0x9c] sm:$0xf0] }
 0x1b5   :  { %3880 = vmatpush.bf16.msrb.mxu0 %v7208_v48  ;;  %v7648_v48 = vor.u32 %v9055_v35, %v7647_v33  ;;  %v6112_v35 = vor.u32 %v8665_v26, %v6109_v27  ;;  %v9094_v26 = vld [vmem:[#allocation8 + $0xe34] sm:$0xf] }
 0x1b6   :  { %3869 = vmatpush.bf16.msra.mxu2 %v6768_v55  ;;  %3858 = vmatmul.bf16.vlgmr.msrb.gmra.mxu1 %v9890_v8  ;;  %v6197_v55 = vld [vmem:[#allocation8 + $0x1a4] sm:$0xf0] }
 0x1b7   :  { %3908 = vmatpush.bf16.msra.mxu1 %v7824_v50  ;;  %3843 = vmatpush.bf16.msra.mxu3 %v6064_v51  ;;  %v6244_v50 = vor.u32 %v8698_v39, %v6241_v41  ;;  %v7603_v51 = vld [vmem:[#allocation8 + $0xc78] sm:$0xf]  ;;  %v9011_v39 = vld [vmem:[#allocation8 + $0xb98] sm:$0xf0] }
 0x1b8   :  { %v7604_v59 = vor.u32 %v9044_v52, %v7603_v51  ;;  %v6725_v52 = vld [vmem:[#allocation8 + $0x5c4] sm:$0xf0] }
 0x1b9   :  { %3881 = vmatpush.bf16.msrb.mxu0 %v7164_v45  ;;  %v6200_v45 = vor.u32 %v8687_v54, %v6197_v55  ;;  %v8726_v54 = vld [vmem:[#allocation8 + $0x2b0] sm:$0xf0]  ;;  %v6068_v55 = vor.u32 %v8654_v43, %v6065_v47  ;;  %v7781_v43 = vld [vmem:[#allocation8 + $0xe04] sm:$0xf0] }
 0x1ba   :  { %3870 = vmatpush.bf16.msra.mxu2 %v6724_v7 }
 0x1bb   :  { %3909 = vmatpush.bf16.msra.mxu1 %v7780_v1  ;;  %3844 = vmatpush.bf16.msra.mxu3 %v6020_v3  ;;  %v3586_v46 = vpop.f32.mrf.mxu3  ;;  %v3612_v1 = vpop.f32.mrf.mxu2 }
 0x1bc   :  { %v3587_v0 = vadd.f32 %v3586_v46, %v9958_v11  ;;  %v3625_v3 = vpop.f32.mrf.mxu0  ;;  %v8841_v11 = vld [vmem:[#allocation8 + $0x64c] sm:$0xf]  ;;  %v7385_v46 = vld [vmem:[#allocation8 + $0xaec] sm:$0xf0] }
 0x1bd   :  { %3882 = vmatpush.bf16.msrb.mxu0 %v7120_v18  ;;  %3871 = vmatmul.bf16.vlgmr.msra.gmra.mxu2 %v9897_v34  ;;  %v3626_v7 = vadd.f32 %v3625_v3, %v3612_v1  ;;  %v7560_v18 = vor.u32 %v9033_v63, %v7559_v62  ;;  %v9072_v62 = vld [vmem:[#allocation8 + $0xd84] sm:$0xf]  ;;  %v7737_v63 = vld [vmem:[#allocation8 + $0xdac] sm:$0xf0]  ;;  %v8742_v3 = vld [vmem:[#allocation8 + $0x334] sm:$0xf] }
 0x1be   :  { %3915 = vmatpush.bf16.msrb.mxu2 %v6332_v13  ;;  %3845 = vmatmul.bf16.vlgmr.msra.gmra.mxu3 %v9887_v2  ;;  %v6860_v13 = vor.u32 %v8852_v60, %v6857_v61  ;;  %v9968_v17 = vadd.f32 %v9956_v22, %v3587_v0  ;;  %v7516_v22 = vor.u32 %v9022_v19, %v7515_v23  ;;  %v6021_v60 = vld [vmem:[#allocation8 + $0x44] sm:$0xf0]  ;;  %v8984_v61 = vld [vmem:[#allocation8 + $0xac4] sm:$0xf]  ;;  %v8731_v19 = vld [vmem:[#allocation8 + $0x2dc] sm:$0xf] }
 0x1bf   :  { %3941 = vmatpush.bf16.msrb.mxu1 %v7036_v6  ;;  %3889 = vmatpush.bf16.msrb.mxu3 %v7736_v12  ;;  %v6153_v6 = vld [vmem:[#allocation8 + $0x14c] sm:$0xf0]  ;;  %v3640_v12 = vpop.f32.mrf.mxu1  ;;  %v9970_v24 = vadd.f32 %v3638_v37, %v3626_v7 }
 0x1c0   :  { %v6156_v21 = vor.u32 %v8676_v5, %v6153_v6  ;;  %v6024_v5 = vor.u32 %v8643_v58, %v6021_v60  ;;  %v7388_v6 = vor.u32 %v8984_v61, %v7385_v46  ;;  %v6291_v7 = vld [vmem:[#allocation8 + $0x230] sm:$0xf]  ;;  %v8715_v12 = vld [vmem:[#allocation8 + $0x258] sm:$0xf0]  ;;  %v6159_v61 = vld [vmem:[#allocation8 + $0x128] sm:$0xf] }
 0x1c1   :  { %3883 = vmatpush.bf16.msrb.mxu0 %v7076_v32  ;;  %v6769_v32 = vld [vmem:[#allocation8 + $0x61c] sm:$0xf0]  ;;  %v6292_v23 = vor.u32 %v8715_v12, %v6291_v7  ;;  %v8682_v46 = vld [vmem:[#allocation8 + $0x150] sm:$0xf0] }
 0x1c2   :  { %3916 = vmatpush.bf16.msrb.mxu2 %v6288_v29  ;;  %v8764_v29 = vld [vmem:[#allocation8 + $0x3e4] sm:$0xf] }
 0x1c3   :  { %3942 = vmatpush.bf16.msrb.mxu1 %v6992_v25  ;;  %3890 = vmatpush.bf16.msrb.mxu3 %v7692_v28  ;;  %v6552_v25 = vor.u32 %v8775_v15, %v6549_v16  ;;  %v6816_v28 = vor.u32 %v8841_v11, %v6813_v20  ;;  %v3588_v33 = vpop.f32.mrf.mxu3  ;;  %v3614_v37 = vpop.f32.mrf.mxu2  ;;  %v7740_v15 = vor.u32 %v9072_v62, %v7737_v63  ;;  %v8973_v16 = vld [vmem:[#allocation8 + $0xa6c] sm:$0xf]  ;;  %v8891_v63 = vld [vmem:[#allocation8 + $0x7d8] sm:$0xf0] }
 0x1c4   :  { %3884 = vmatmul.bf16.vlgmr.msrb.gmra.mxu0 %v9899_v40  ;;  %v3627_v41 = vpop.f32.mrf.mxu0  ;;  %v9061_v20 = vld [vmem:[#allocation8 + $0xd2c] sm:$0xf] }
 0x1c5   :  { %3928 = vmatpush.bf16.msra.mxu0 %v6684_v38  ;;  %v7471_v38 = vld [vmem:[#allocation8 + $0xb70] sm:$0xf] }
 0x1c6   :  { %3917 = vmatpush.bf16.msrb.mxu2 %v6244_v50  ;;  %7847 = vmatmul.msk.bf16.vlgmr.msra.gmra.mxu1 %vm3365_vm2, %v9906_v14  ;;  %v8819_v50 = vld [vmem:[#allocation8 + $0x59c] sm:$0xf]  ;;  %v7472_v51 = vor.u32 %v9011_v39, %v7471_v38  ;;  %v9050_v38 = vld [vmem:[#allocation8 + $0xcd4] sm:$0xf]  ;;  %v7649_v39 = vld [vmem:[#allocation8 + $0xcfc] sm:$0xf0] }
 0x1c7   :  { %3943 = vmatpush.bf16.msrb.mxu1 %v6948_v42  ;;  %3891 = vmatpush.bf16.msrb.mxu3 %v7648_v48  ;;  %v6508_v42 = vor.u32 %v8764_v29, %v6505_v30  ;;  %v6772_v48 = vor.u32 %v8830_v31, %v6769_v32  ;;  %v6247_v29 = vld [vmem:[#allocation8 + $0x1d8] sm:$0xf]  ;;  %v8704_v30 = vld [vmem:[#allocation8 + $0x200] sm:$0xf0]  ;;  %v8962_v31 = vld [vmem:[#allocation8 + $0xa14] sm:$0xf] }
 0x1c8   :  { %v7297_v32 = vld [vmem:[#allocation8 + $0xa3c] sm:$0xf0]  ;;  %v6248_v41 = vor.u32 %v8704_v30, %v6247_v29  ;;  %v7517_v29 = vld [vmem:[#allocation8 + $0xbf4] sm:$0xf0] }
 0x1c9   :  { %3929 = vmatpush.bf16.msra.mxu0 %v6640_v53  ;;  %v6335_v53 = vld [vmem:[#allocation8 + $0x288] sm:$0xf]  ;;  %v7300_v47 = vor.u32 %v8962_v31, %v7297_v32 }
 0x1ca   :  { %3918 = vmatpush.bf16.msrb.mxu2 %v6200_v45  ;;  %v6728_v45 = vor.u32 %v8819_v50, %v6725_v52  ;;  %v6336_v0 = vor.u32 %v8726_v54, %v6335_v53  ;;  %v8902_v52 = vld [vmem:[#allocation8 + $0x830] sm:$0xf0]  ;;  %v8951_v53 = vld [vmem:[#allocation8 + $0x9bc] sm:$0xf]  ;;  %v7253_v54 = vld [vmem:[#allocation8 + $0x9e4] sm:$0xf0] }
 0x1cb   :  { %3944 = vmatpush.bf16.msrb.mxu1 %v6904_v56  ;;  %3892 = vmatpush.bf16.msrb.mxu3 %v7604_v59  ;;  %v7427_v56 = vld [vmem:[#allocation8 + $0xb18] sm:$0xf]  ;;  %v6464_v59 = vor.u32 %v8753_v49, %v6461_v44  ;;  %v8693_v49 = vld [vmem:[#allocation8 + $0x1a8] sm:$0xf0]  ;;  %v7039_v44 = vld [vmem:[#allocation8 + $0x808] sm:$0xf]  ;;  %v7256_v60 = vor.u32 %v8951_v53, %v7253_v54 }
 0x1cc   :  { %v7428_v1 = vor.u32 %v9000_v57, %v7427_v56  ;;  %v7605_v56 = vld [vmem:[#allocation8 + $0xca4] sm:$0xf0]  ;;  %v8649_v53 = vld [vmem:[#allocation8 + $0x48] sm:$0xf0] }
 0x1cd   :  { %3930 = vmatpush.bf16.msra.mxu0 %v6596_v4  ;;  %v6417_v4 = vld [vmem:[#allocation8 + $0x35c] sm:$0xf0]  ;;  %v6863_v54 = vld [vmem:[#allocation8 + $0x6a8] sm:$0xf] }
 0x1ce   :  { %3919 = vmatpush.bf16.msrb.mxu2 %v6156_v21  ;;  %v6420_v11 = vor.u32 %v8742_v3, %v6417_v4  ;;  %v7693_v21 = vld [vmem:[#allocation8 + $0xd54] sm:$0xf0] }
 0x1cf   :  { %3945 = vmatpush.bf16.msrb.mxu1 %v6860_v13  ;;  %3893 = vmatpush.bf16.msrb.mxu3 %v7560_v18  ;;  %v9972_v13 = vpop.f32.mrf.mxu0  ;;  %v7341_v18 = vld [vmem:[#allocation8 + $0xa94] sm:$0xf0] }
 0x1d0   :  { %v7344_v27 = vor.u32 %v8973_v16, %v7341_v18 }
 0x1d1   :  { %3931 = vmatpush.bf16.msra.mxu0 %v6552_v25  ;;  %v6373_v25 = vld [vmem:[#allocation8 + $0x304] sm:$0xf0] }
 0x1d2   :  { %3920 = vmatpush.bf16.msrb.mxu2 %v6112_v35  ;;  %v9976_v33 = vpop.f32.mrf.mxu1  ;;  %v6376_v35 = vor.u32 %v8731_v19, %v6373_v25  ;;  %v8880_v25 = vld [vmem:[#allocation8 + $0x780] sm:$0xf0] }
 0x1d3   :  { %3946 = vmatpush.bf16.msrb.mxu1 %v6816_v28  ;;  %3894 = vmatpush.bf16.msrb.mxu3 %v7516_v22  ;;  %v7825_v28 = vld [vmem:[#allocation8 + $0xe5c] sm:$0xf0]  ;;  %v7696_v22 = vor.u32 %v9061_v20, %v7693_v21  ;;  %v8671_v20 = vld [vmem:[#allocation8 + $0xf8] sm:$0xf0]  ;;  %v6951_v21 = vld [vmem:[#allocation8 + $0x758] sm:$0xf] }
 0x1d4   :  { %v7828_v37 = vor.u32 %v9094_v26, %v7825_v28  ;;  %v8929_v26 = vld [vmem:[#allocation8 + $0x90c] sm:$0xf]  ;;  %v6952_v31 = vor.u32 %v8880_v25, %v6951_v21  ;;  %v6643_v21 = vld [vmem:[#allocation8 + $0x4f0] sm:$0xf]  ;;  %v8979_v25 = vld [vmem:[#allocation8 + $0xa98] sm:$0xf0] }
 0x1d5   :  { %3932 = vmatpush.bf16.msra.mxu0 %v6508_v42  ;;  %v9083_v42 = vld [vmem:[#allocation8 + $0xddc] sm:$0xf]  ;;  %v9017_v28 = vld [vmem:[#allocation8 + $0xbcc] sm:$0xf] }
 0x1d6   :  { %3921 = vmatpush.bf16.msrb.mxu2 %v6068_v55  ;;  %v9039_v55 = vld [vmem:[#allocation8 + $0xc7c] sm:$0xf]  ;;  %v7784_v57 = vor.u32 %v9083_v42, %v7781_v43  ;;  %v8918_v42 = vld [vmem:[#allocation8 + $0x8b4] sm:$0xf]  ;;  %v7121_v43 = vld [vmem:[#allocation8 + $0x8dc] sm:$0xf0] }
 0x1d7   :  { %3947 = vmatpush.bf16.msrb.mxu1 %v6772_v48  ;;  %3895 = vmatpush.bf16.msrb.mxu3 %v7472_v51  ;;  %v6203_v48 = vld [vmem:[#allocation8 + $0x180] sm:$0xf]  ;;  %v3679_v50 = vpop.f32.mrf.mxu0  ;;  %v7652_v51 = vor.u32 %v9050_v38, %v7649_v39  ;;  %v7608_v62 = vor.u32 %v9039_v55, %v7605_v56  ;;  %v8660_v38 = vld [vmem:[#allocation8 + $0xa0] sm:$0xf0]  ;;  %v8858_v55 = vld [vmem:[#allocation8 + $0x6d0] sm:$0xf0] }
 0x1d8   :  { %v6204_v58 = vor.u32 %v8693_v49, %v6203_v48  ;;  %v6907_v39 = vld [vmem:[#allocation8 + $0x700] sm:$0xf] }
 0x1d9   :  { %3933 = vmatpush.bf16.msra.mxu0 %v6464_v59  ;;  %v7040_v59 = vor.u32 %v8902_v52, %v7039_v44  ;;  %v7473_v49 = vld [vmem:[#allocation8 + $0xb9c] sm:$0xf0]  ;;  %v7124_v52 = vor.u32 %v8918_v42, %v7121_v43  ;;  %v8968_v42 = vld [vmem:[#allocation8 + $0xa40] sm:$0xf0] }
 0x1da   :  { %3922 = vmatpush.bf16.msrb.mxu2 %v6024_v5  ;;  %v3664_v4 = vpop.f32.mrf.mxu2  ;;  %v9028_v5 = vld [vmem:[#allocation8 + $0xc24] sm:$0xf]  ;;  %v3692_v12 = vpop.f32.mrf.mxu1  ;;  %v6027_v50 = vld [vmem:[#allocation8 + $0x20] sm:$0xf] }
 0x1db   :  { %3948 = vmatpush.bf16.msrb.mxu1 %v6728_v45  ;;  %3896 = vmatpush.bf16.msrb.mxu3 %v7428_v1  ;;  %v6995_v45 = vld [vmem:[#allocation8 + $0x7b0] sm:$0xf]  ;;  %v3651_v3 = vpop.f32.mrf.mxu3 }
 0x1dc   :  { %v7209_v1 = vld [vmem:[#allocation8 + $0x98c] sm:$0xf0]  ;;  %v3652_v7 = vadd.f32 %v3651_v3, %v9970_v24  ;;  %v6996_v16 = vor.u32 %v8891_v63, %v6995_v45  ;;  %v6028_v45 = vor.u32 %v8649_v53, %v6027_v50  ;;  %v8814_v63 = vld [vmem:[#allocation8 + $0x570] sm:$0xf0]  ;;  %v9045_v50 = vld [vmem:[#allocation8 + $0xca8] sm:$0xf0] }
 0x1dd   :  { %3934 = vmatpush.bf16.msra.mxu0 %v6420_v11  ;;  %3923 = vmatmul.bf16.vlgmr.msrb.gmra.mxu2 %v9887_v2  ;;  %v6115_v11 = vld [vmem:[#allocation8 + $0xd0] sm:$0xf]  ;;  %v6337_v53 = vld [vmem:[#allocation8 + $0x2b4] sm:$0xf0] }
 0x1de   :  { %3949 = vmatmul.bf16.vlgmr.msrb.gmra.mxu1 %v9897_v34  ;;  %3967 = vmatpush.bf16.msra.mxu2 %v7740_v15  ;;  %v6160_v15 = vor.u32 %v8682_v46, %v6159_v61  ;;  %v6116_v24 = vor.u32 %v8671_v20, %v6115_v11  ;;  %v8995_v61 = vld [vmem:[#allocation8 + $0xb1c] sm:$0xf]  ;;  %v7429_v46 = vld [vmem:[#allocation8 + $0xb44] sm:$0xf0]  ;;  %v6819_v12 = vld [vmem:[#allocation8 + $0x650] sm:$0xf] }
 0x1df   :  { %3993 = vmatpush.bf16.msra.mxu1 %v6336_v0  ;;  %3954 = vmatpush.bf16.msra.mxu3 %v7388_v6  ;;  %v8940_v0 = vld [vmem:[#allocation8 + $0x964] sm:$0xf]  ;;  %v7561_v6 = vld [vmem:[#allocation8 + $0xc4c] sm:$0xf0]  ;;  %v9067_v11 = vld [vmem:[#allocation8 + $0xd58] sm:$0xf0] }
 0x1e0   :  { %3897 = vmatmul.bf16.vlgmr.msrb.gmra.mxu3 %v9904_v10  ;;  %v7212_v18 = vor.u32 %v8940_v0, %v7209_v1  ;;  %v7564_v19 = vor.u32 %v9028_v5, %v7561_v6  ;;  %v6864_v1 = vor.u32 %v8858_v55, %v6863_v54  ;;  %v8990_v5 = vld [vmem:[#allocation8 + $0xaf0] sm:$0xf0]  ;;  %v6555_v54 = vld [vmem:[#allocation8 + $0x440] sm:$0xf]  ;;  %v8781_v55 = vld [vmem:[#allocation8 + $0x468] sm:$0xf0] }
 0x1e1   :  { %3935 = vmatpush.bf16.msra.mxu0 %v6376_v35  ;;  %v6071_v35 = vld [vmem:[#allocation8 + $0x78] sm:$0xf] }
 0x1e2   :  { %3968 = vmatpush.bf16.msra.mxu2 %v7696_v22  ;;  %v9984_v22 = vpop.f32.mrf.mxu0  ;;  %v3666_v48 = vpop.f32.mrf.mxu2  ;;  %v6072_v44 = vor.u32 %v8660_v38, %v6071_v35  ;;  %v6599_v38 = vld [vmem:[#allocation8 + $0x498] sm:$0xf] }
 0x1e3   :  { %3994 = vmatpush.bf16.msra.mxu1 %v6292_v23  ;;  %3955 = vmatpush.bf16.msra.mxu3 %v7344_v27  ;;  %v3665_v23 = vadd.f32 %v3664_v4, %v3652_v7  ;;  %v7165_v27 = vld [vmem:[#allocation8 + $0x934] sm:$0xf0]  ;;  %v7391_v4 = vld [vmem:[#allocation8 + $0xac8] sm:$0xf]  ;;  %v7432_v7 = vor.u32 %v8995_v61, %v7429_v46  ;;  %v6731_v48 = vld [vmem:[#allocation8 + $0x5a0] sm:$0xf]  ;;  %v6556_v61 = vor.u32 %v8781_v55, %v6555_v54 }
 0x1e4   :  { %3936 = vmatmul.bf16.vlgmr.msra.gmra.mxu0 %v9890_v8  ;;  %v7168_v32 = vor.u32 %v8929_v26, %v7165_v27  ;;  %v7392_v20 = vor.u32 %v8990_v5, %v7391_v4  ;;  %v7567_v46 = vld [vmem:[#allocation8 + $0xc28] sm:$0xf] }
 0x1e5   :  { %3986 = vmatpush.bf16.msrb.mxu0 %v7828_v37  ;;  %v9982_v30 = vadd.f32 %v9972_v13, %v3665_v23  ;;  %v7520_v37 = vor.u32 %v9017_v28, %v7517_v29  ;;  %v9006_v13 = vld [vmem:[#allocation8 + $0xb74] sm:$0xf]  ;;  %v8803_v23 = vld [vmem:[#allocation8 + $0x518] sm:$0xf0]  ;;  %v6775_v28 = vld [vmem:[#allocation8 + $0x5f8] sm:$0xf] }
 0x1e6   :  { %3969 = vmatpush.bf16.msra.mxu2 %v7652_v51  ;;  %v7476_v56 = vor.u32 %v9006_v13, %v7473_v49  ;;  %v6644_v29 = vor.u32 %v8803_v23, %v6643_v21  ;;  %v8825_v13 = vld [vmem:[#allocation8 + $0x5c8] sm:$0xf0]  ;;  %v9023_v21 = vld [vmem:[#allocation8 + $0xbf8] sm:$0xf0] }
 0x1e7   :  { %3995 = vmatpush.bf16.msra.mxu1 %v6248_v41  ;;  %3956 = vmatpush.bf16.msra.mxu3 %v7300_v47  ;;  %v8869_v41 = vld [vmem:[#allocation8 + $0x728] sm:$0xf0]  ;;  %v3653_v47 = vpop.f32.mrf.mxu3  ;;  %v8699_v23 = vld [vmem:[#allocation8 + $0x1dc] sm:$0xf] }
 0x1e8   :  { %v6908_v51 = vor.u32 %v8869_v41, %v6907_v39  ;;  %v8792_v39 = vld [vmem:[#allocation8 + $0x4c0] sm:$0xf0]  ;;  %v7303_v41 = vld [vmem:[#allocation8 + $0xa18] sm:$0xf] }
 0x1e9   :  { %3987 = vmatpush.bf16.msrb.mxu0 %v7784_v57  ;;  %v7743_v57 = vld [vmem:[#allocation8 + $0xd88] sm:$0xf]  ;;  %v6600_v49 = vor.u32 %v8792_v39, %v6599_v38  ;;  %v7479_v39 = vld [vmem:[#allocation8 + $0xb78] sm:$0xf] }
 0x1ea   :  { %3970 = vmatpush.bf16.msra.mxu2 %v7608_v62  ;;  %v6687_v62 = vld [vmem:[#allocation8 + $0x548] sm:$0xf]  ;;  %v3718_v0 = vpop.f32.mrf.mxu0 }
 0x1eb   :  { %3996 = vmatpush.bf16.msra.mxu1 %v6204_v58  ;;  %3957 = vmatpush.bf16.msra.mxu3 %v7256_v60  ;;  %v9078_v58 = vld [vmem:[#allocation8 + $0xdb0] sm:$0xf0]  ;;  %v7077_v60 = vld [vmem:[#allocation8 + $0x884] sm:$0xf0]  ;;  %v6293_v0 = vld [vmem:[#allocation8 + $0x25c] sm:$0xf0] }
 0x1ec   :  { %v7744_v3 = vor.u32 %v9078_v58, %v7743_v57  ;;  %v8957_v57 = vld [vmem:[#allocation8 + $0x9e8] sm:$0xf0]  ;;  %v6732_v58 = vor.u32 %v8825_v13, %v6731_v48  ;;  %v8748_v48 = vld [vmem:[#allocation8 + $0x360] sm:$0xf0] }
 0x1ed   :  { %4019 = vmatpush.bf16.msra.mxu0 %v7040_v59  ;;  %v8907_v59 = vld [vmem:[#allocation8 + $0x85c] sm:$0xf] }
 0x1ee   :  { %3971 = vmatpush.bf16.msra.mxu2 %v7564_v19  ;;  %v7080_v6 = vor.u32 %v8907_v59, %v7077_v60  ;;  %v7347_v19 = vld [vmem:[#allocation8 + $0xa70] sm:$0xf] }
 0x1ef   :  { %3997 = vmatpush.bf16.msra.mxu1 %v6160_v15  ;;  %3958 = vmatpush.bf16.msra.mxu3 %v7212_v18  ;;  %v6688_v15 = vor.u32 %v8814_v63, %v6687_v62  ;;  %v7699_v18 = vld [vmem:[#allocation8 + $0xd30] sm:$0xf]  ;;  %v7348_v35 = vor.u32 %v8979_v25, %v7347_v19  ;;  %v8710_v62 = vld [vmem:[#allocation8 + $0x234] sm:$0xf] }
 0x1f0   :  { %v7700_v27 = vor.u32 %v9067_v11, %v7699_v18  ;;  %v6296_v18 = vor.u32 %v8710_v62, %v6293_v0  ;;  %v8913_v62 = vld [vmem:[#allocation8 + $0x888] sm:$0xf0]  ;;  %v7831_v0 = vld [vmem:[#allocation8 + $0xe38] sm:$0xf] }
 0x1f1   :  { %4020 = vmatpush.bf16.msra.mxu0 %v6996_v16  ;;  %v8847_v16 = vld [vmem:[#allocation8 + $0x678] sm:$0xf0] }
 0x1f2   :  { %3972 = vmatpush.bf16.msra.mxu2 %v7520_v37  ;;  %v6820_v26 = vor.u32 %v8847_v16, %v6819_v12  ;;  %v9991_v37 = vpop.f32.mrf.mxu1 }
 0x1f3   :  { %3998 = vmatpush.bf16.msra.mxu1 %v6116_v24  ;;  %3959 = vmatpush.bf16.msra.mxu3 %v7168_v32  ;;  %v8836_v24 = vld [vmem:[#allocation8 + $0x620] sm:$0xf0] }
 0x1f4   :  { %7848 = vmatmul.msk.bf16.vlgmr.msrb.gmra.mxu0 %vm3365_vm2, %v9906_v14  ;;  %v9056_v32 = vld [vmem:[#allocation8 + $0xd00] sm:$0xf0]  ;;  %v6776_v43 = vor.u32 %v8836_v24, %v6775_v28  ;;  %v8759_v28 = vld [vmem:[#allocation8 + $0x3b8] sm:$0xf0] }
 0x1f5   :  { %4021 = vmatpush.bf16.msra.mxu0 %v6952_v31  ;;  %v7655_v31 = vld [vmem:[#allocation8 + $0xcd8] sm:$0xf] }
 0x1f6   :  { %3973 = vmatpush.bf16.msra.mxu2 %v7476_v56  ;;  %v7656_v47 = vor.u32 %v9056_v32, %v7655_v31  ;;  %v7259_v56 = vld [vmem:[#allocation8 + $0x9c0] sm:$0xf] }
 0x1f7   :  { %3999 = vmatpush.bf16.msra.mxu1 %v6072_v44  ;;  %3960 = vmatpush.bf16.msra.mxu3 %v7124_v52  ;;  %v7611_v44 = vld [vmem:[#allocation8 + $0xc80] sm:$0xf]  ;;  %v7304_v52 = vor.u32 %v8968_v42, %v7303_v41  ;;  %v7260_v63 = vor.u32 %v8957_v57, %v7259_v56  ;;  %v8688_v41 = vld [vmem:[#allocation8 + $0x184] sm:$0xf]  ;;  %v9001_v56 = vld [vmem:[#allocation8 + $0xb48] sm:$0xf0] }
 0x1f8   :  { %v7612_v59 = vor.u32 %v9045_v50, %v7611_v44  ;;  %v7127_v50 = vld [vmem:[#allocation8 + $0x8b8] sm:$0xf]  ;;  %v8677_v57 = vld [vmem:[#allocation8 + $0x12c] sm:$0xf] }
 0x1f9   :  { %4022 = vmatpush.bf16.msra.mxu0 %v6908_v51  ;;  %v8721_v51 = vld [vmem:[#allocation8 + $0x28c] sm:$0xf] }
 0x1fa   :  { %3974 = vmatpush.bf16.msra.mxu2 %v7432_v7  ;;  %v6340_v60 = vor.u32 %v8721_v51, %v6337_v53  ;;  %v3729_v5 = vpop.f32.mrf.mxu2  ;;  %v8946_v7 = vld [vmem:[#allocation8 + $0x990] sm:$0xf0]  ;;  %v8924_v51 = vld [vmem:[#allocation8 + $0x8e0] sm:$0xf0]  ;;  %v7435_v53 = vld [vmem:[#allocation8 + $0xb20] sm:$0xf] }
 0x1fb   :  { %4000 = vmatpush.bf16.msra.mxu1 %v6028_v45  ;;  %3961 = vmatpush.bf16.msra.mxu3 %v7080_v6  ;;  %v9034_v45 = vld [vmem:[#allocation8 + $0xc50] sm:$0xf0]  ;;  %v3703_v4 = vpop.f32.mrf.mxu3  ;;  %v7215_v6 = vld [vmem:[#allocation8 + $0x968] sm:$0xf] }
 0x1fc   :  { %v3704_v12 = vadd.f32 %v3703_v4, %v9976_v33  ;;  %v7568_v16 = vor.u32 %v9034_v45, %v7567_v46  ;;  %v7216_v25 = vor.u32 %v8946_v7, %v7215_v6  ;;  %v8935_v33 = vld [vmem:[#allocation8 + $0x938] sm:$0xf0]  ;;  %v6379_v46 = vld [vmem:[#allocation8 + $0x2e0] sm:$0xf]  ;;  %v8809_v6 = vld [vmem:[#allocation8 + $0x54c] sm:$0xf] }
 0x1fd   :  { %4023 = vmatpush.bf16.msra.mxu0 %v6864_v1  ;;  %3975 = vmatmul.bf16.vlgmr.msra.gmra.mxu2 %v9904_v10  ;;  %v6511_v1 = vld [vmem:[#allocation8 + $0x3e8] sm:$0xf]  ;;  %v7083_v45 = vld [vmem:[#allocation8 + $0x860] sm:$0xf]  ;;  %v6689_v7 = vld [vmem:[#allocation8 + $0x574] sm:$0xf0] }
 0x1fe   :  { %4001 = vmatmul.bf16.vlgmr.msra.gmra.mxu1 %v9887_v2  ;;  %4032 = vmatpush.bf16.msrb.mxu2 %v7392_v20  ;;  %v7523_v20 = vld [vmem:[#allocation8 + $0xbd0] sm:$0xf]  ;;  %v3717_v19 = vadd.f32 %v9984_v22, %v3704_v12  ;;  %v9012_v22 = vld [vmem:[#allocation8 + $0xba0] sm:$0xf0] }
 0x1ff   :  { %4045 = vmatpush.bf16.msrb.mxu1 %v7744_v3  ;;  %4006 = vmatpush.bf16.msrb.mxu3 %v6688_v15  ;;  %v8770_v3 = vld [vmem:[#allocation8 + $0x410] sm:$0xf0]  ;;  %v3744_v15 = vpop.f32.mrf.mxu1  ;;  %v7524_v31 = vor.u32 %v9023_v21, %v7523_v20  ;;  %v6117_v20 = vld [vmem:[#allocation8 + $0xfc] sm:$0xf0] }
 0x200   :  { %3962 = vmatmul.bf16.vlgmr.msra.gmra.mxu3 %v9899_v40  ;;  %v6512_v11 = vor.u32 %v8770_v3, %v6511_v1  ;;  %v3730_v24 = vadd.f32 %v3729_v5, %v3717_v19  ;;  %v9100_v1 = vld [vmem:[#allocation8 + $0xe60] sm:$0xf0]  ;;  %v7084_v15 = vor.u32 %v8913_v62, %v7083_v45  ;;  %v8974_v21 = vld [vmem:[#allocation8 + $0xa74] sm:$0xf]  ;;  %v8875_v45 = vld [vmem:[#allocation8 + $0x75c] sm:$0xf] }
 0x201   :  { %4024 = vmatpush.bf16.msra.mxu0 %v6820_v26  ;;  %v6249_v26 = vld [vmem:[#allocation8 + $0x204] sm:$0xf0]  ;;  %v9996_v32 = vpop.f32.mrf.mxu0 }
 0x202   :  { %4033 = vmatpush.bf16.msrb.mxu2 %v7348_v35  ;;  %v6252_v35 = vor.u32 %v8699_v23, %v6249_v26  ;;  %v3743_v13 = vadd.f32 %v9991_v37, %v3730_v24  ;;  %v3731_v44 = vpop.f32.mrf.mxu2  ;;  %v8737_v37 = vld [vmem:[#allocation8 + $0x308] sm:$0xf0]  ;;  %v7349_v23 = vld [vmem:[#allocation8 + $0xa9c] sm:$0xf0]  ;;  %v7041_v24 = vld [vmem:[#allocation8 + $0x834] sm:$0xf0] }
 0x203   :  { %4046 = vmatpush.bf16.msrb.mxu1 %v7700_v27  ;;  %4007 = vmatpush.bf16.msrb.mxu3 %v6644_v29  ;;  %v6467_v27 = vld [vmem:[#allocation8 + $0x390] sm:$0xf]  ;;  %v6380_v12 = vor.u32 %v8737_v37, %v6379_v46  ;;  %v7787_v26 = vld [vmem:[#allocation8 + $0xde0] sm:$0xf]  ;;  %v8886_v44 = vld [vmem:[#allocation8 + $0x7b4] sm:$0xf] }
 0x204   :  { %v7171_v29 = vld [vmem:[#allocation8 + $0x910] sm:$0xf]  ;;  %v6468_v38 = vor.u32 %v8759_v28, %v6467_v27  ;;  %v9089_v27 = vld [vmem:[#allocation8 + $0xe08] sm:$0xf0]  ;;  %v8798_v28 = vld [vmem:[#allocation8 + $0x4f4] sm:$0xf] }
 0x205   :  { %4025 = vmatpush.bf16.msra.mxu0 %v6776_v43  ;;  %v7172_v42 = vor.u32 %v8935_v33, %v7171_v29  ;;  %v6205_v43 = vld [vmem:[#allocation8 + $0x1ac] sm:$0xf0]  ;;  %v6645_v29 = vld [vmem:[#allocation8 + $0x51c] sm:$0xf0]  ;;  %v8897_v33 = vld [vmem:[#allocation8 + $0x80c] sm:$0xf] }
 0x206   :  { %4034 = vmatpush.bf16.msrb.mxu2 %v7304_v52  ;;  %v7480_v52 = vor.u32 %v9012_v22, %v7479_v39  ;;  %v6208_v54 = vor.u32 %v8688_v41, %v6205_v43  ;;  %v7788_v39 = vor.u32 %v9089_v27, %v7787_v26  ;;  %v6073_v22 = vld [vmem:[#allocation8 + $0xa4] sm:$0xf0]  ;;  %v8963_v41 = vld [vmem:[#allocation8 + $0xa1c] sm:$0xf]  ;;  %v6648_v43 = vor.u32 %v8798_v28, %v6645_v29  ;;  %v8776_v46 = vld [vmem:[#allocation8 + $0x444] sm:$0xf] }
 0x207   :  { %4047 = vmatpush.bf16.msrb.mxu1 %v7656_v47  ;;  %4008 = vmatpush.bf16.msrb.mxu3 %v6600_v49  ;;  %v6423_v47 = vld [vmem:[#allocation8 + $0x338] sm:$0xf]  ;;  %v3705_v49 = vpop.f32.mrf.mxu3  ;;  %v6557_v37 = vld [vmem:[#allocation8 + $0x46c] sm:$0xf0]  ;;  %v6953_v62 = vld [vmem:[#allocation8 + $0x784] sm:$0xf0] }
 0x208   :  { %v6424_v55 = vor.u32 %v8748_v48, %v6423_v47  ;;  %v7044_v47 = vor.u32 %v8897_v33, %v7041_v24  ;;  %v8787_v48 = vld [vmem:[#allocation8 + $0x49c] sm:$0xf]  ;;  %v6601_v49 = vld [vmem:[#allocation8 + $0x4c4] sm:$0xf0]  ;;  %v8930_v27 = vld [vmem:[#allocation8 + $0x914] sm:$0xf] }
 0x209   :  { %4026 = vmatpush.bf16.msra.mxu0 %v6732_v58  ;;  %v6161_v58 = vld [vmem:[#allocation8 + $0x154] sm:$0xf0]  ;;  %v3770_v3 = vpop.f32.mrf.mxu0  ;;  %v7173_v28 = vld [vmem:[#allocation8 + $0x93c] sm:$0xf0]  ;;  %v9051_v24 = vld [vmem:[#allocation8 + $0xcdc] sm:$0xf] }
 0x20a   :  { %4035 = vmatpush.bf16.msrb.mxu2 %v7260_v63  ;;  %v7436_v63 = vor.u32 %v9001_v56, %v7435_v53  ;;  %v6164_v4 = vor.u32 %v8677_v57, %v6161_v58  ;;  %v8644_v53 = vld [vmem:[#allocation8 + $0x24] sm:$0xf]  ;;  %v7261_v57 = vld [vmem:[#allocation8 + $0x9ec] sm:$0xf0]  ;;  %v6604_v58 = vor.u32 %v8787_v48, %v6601_v49  ;;  %v8941_v3 = vld [vmem:[#allocation8 + $0x96c] sm:$0xf] }
 0x20b   :  { %4048 = vmatpush.bf16.msrb.mxu1 %v7612_v59  ;;  %4009 = vmatpush.bf16.msrb.mxu3 %v6556_v61  ;;  %v7128_v59 = vor.u32 %v8924_v51, %v7127_v50  ;;  %v7393_v61 = vld [vmem:[#allocation8 + $0xaf4] sm:$0xf0]  ;;  %v6997_v50 = vld [vmem:[#allocation8 + $0x7dc] sm:$0xf0]  ;;  %v8952_v56 = vld [vmem:[#allocation8 + $0x9c4] sm:$0xf] }
 0x20c   :  { %4027 = vmatmul.bf16.vlgmr.msra.gmra.mxu0 %v9897_v34  ;;  %v8919_v48 = vld [vmem:[#allocation8 + $0x8bc] sm:$0xf]  ;;  %v7129_v49 = vld [vmem:[#allocation8 + $0x8e4] sm:$0xf0] }
 0x20d   :  { %4071 = vmatpush.bf16.msrb.mxu0 %v6340_v60  ;;  %v8985_v60 = vld [vmem:[#allocation8 + $0xacc] sm:$0xf] }
 0x20e   :  { %4036 = vmatpush.bf16.msrb.mxu2 %v7216_v25  ;;  %v7396_v5 = vor.u32 %v8985_v60, %v7393_v61  ;;  %v6692_v25 = vor.u32 %v8809_v6, %v6689_v7  ;;  %v9073_v60 = vld [vmem:[#allocation8 + $0xd8c] sm:$0xf]  ;;  %v7745_v61 = vld [vmem:[#allocation8 + $0xdb4] sm:$0xf0]  ;;  %v6956_v6 = vor.u32 %v8875_v45, %v6953_v62  ;;  %v9062_v7 = vld [vmem:[#allocation8 + $0xd34] sm:$0xf] }
 0x20f   :  { %4049 = vmatpush.bf16.msrb.mxu1 %v7568_v16  ;;  %4010 = vmatpush.bf16.msrb.mxu3 %v6512_v11  ;;  %v8666_v16 = vld [vmem:[#allocation8 + $0xd4] sm:$0xf]  ;;  %v7832_v11 = vor.u32 %v9100_v1, %v7831_v0  ;;  %v7264_v0 = vor.u32 %v8952_v56, %v7261_v57  ;;  %v7748_v1 = vor.u32 %v9073_v60, %v7745_v61  ;;  %v6425_v56 = vld [vmem:[#allocation8 + $0x364] sm:$0xf0]  ;;  %v8908_v61 = vld [vmem:[#allocation8 + $0x864] sm:$0xf] }
 0x210   :  { %v8842_v57 = vld [vmem:[#allocation8 + $0x654] sm:$0xf]  ;;  %v7132_v60 = vor.u32 %v8919_v48, %v7129_v49  ;;  %v7569_v45 = vld [vmem:[#allocation8 + $0xc54] sm:$0xf0]  ;;  %v9007_v49 = vld [vmem:[#allocation8 + $0xb7c] sm:$0xf] }
 0x211   :  { %4072 = vmatpush.bf16.msrb.mxu0 %v6296_v18  ;;  %v3755_v18 = vpop.f32.mrf.mxu3 }
 0x212   :  { %4037 = vmatpush.bf16.msrb.mxu2 %v7172_v42  ;;  %v9999_v19 = vadd.f32 %v3755_v18, %v3743_v13  ;;  %v7305_v42 = vld [vmem:[#allocation8 + $0xa44] sm:$0xf0]  ;;  %v10004_v13 = vpop.f32.mrf.mxu1 }
 0x213   :  { %4050 = vmatpush.bf16.msrb.mxu1 %v7524_v31  ;;  %4011 = vmatpush.bf16.msrb.mxu3 %v6468_v38  ;;  %v6120_v31 = vor.u32 %v8666_v16, %v6117_v20  ;;  %v8655_v38 = vld [vmem:[#allocation8 + $0x7c] sm:$0xf]  ;;  %v8864_v20 = vld [vmem:[#allocation8 + $0x704] sm:$0xf] }
 0x214   :  { %v6076_v51 = vor.u32 %v8655_v38, %v6073_v22  ;;  %v8853_v22 = vld [vmem:[#allocation8 + $0x6ac] sm:$0xf] }
 0x215   :  { %4073 = vmatpush.bf16.msrb.mxu0 %v6252_v35  ;;  %v7352_v35 = vor.u32 %v8974_v21, %v7349_v23  ;;  %v6909_v21 = vld [vmem:[#allocation8 + $0x72c] sm:$0xf0] }
 0x216   :  { %4038 = vmatpush.bf16.msrb.mxu2 %v7128_v59  ;;  %v7000_v59 = vor.u32 %v8886_v44, %v6997_v50  ;;  %v6912_v33 = vor.u32 %v8864_v20, %v6909_v21  ;;  %v9018_v21 = vld [vmem:[#allocation8 + $0xbd4] sm:$0xf] }
 0x217   :  { %4051 = vmatpush.bf16.msrb.mxu1 %v7480_v52  ;;  %4012 = vmatpush.bf16.msrb.mxu3 %v6424_v55  ;;  %v7308_v52 = vor.u32 %v8963_v41, %v7305_v42  ;;  %v6029_v55 = vld [vmem:[#allocation8 + $0x4c] sm:$0xf0]  ;;  %v6865_v41 = vld [vmem:[#allocation8 + $0x6d4] sm:$0xf0] }
 0x219   :  { %4074 = vmatpush.bf16.msrb.mxu0 %v6208_v54  ;;  %v3757_v54 = vpop.f32.mrf.mxu3 }
 0x21a   :  { %4039 = vmatpush.bf16.msrb.mxu2 %v7084_v15  ;;  %v8765_v15 = vld [vmem:[#allocation8 + $0x3ec] sm:$0xf]  ;;  %v3781_v16 = vpop.f32.mrf.mxu2  ;;  %v3809_v18 = vpop.f32.mrf.mxu1  ;;  %v8743_v54 = vld [vmem:[#allocation8 + $0x33c] sm:$0xf] }
 0x21b   :  { %4052 = vmatpush.bf16.msrb.mxu1 %v7436_v63  ;;  %4013 = vmatpush.bf16.msrb.mxu3 %v6380_v12  ;;  %v6032_v63 = vor.u32 %v8644_v53, %v6029_v55  ;;  %v7701_v12 = vld [vmem:[#allocation8 + $0xd5c] sm:$0xf0]  ;;  %v3782_v23 = vadd.f32 %v3781_v16, %v9996_v32  ;;  %v7613_v53 = vld [vmem:[#allocation8 + $0xcac] sm:$0xf0]  ;;  %v6428_v62 = vor.u32 %v8743_v54, %v6425_v56  ;;  %v9095_v16 = vld [vmem:[#allocation8 + $0xe3c] sm:$0xf] }
 0x21c   :  { %v7704_v26 = vor.u32 %v9062_v7, %v7701_v12  ;;  %v6777_v7 = vld [vmem:[#allocation8 + $0x624] sm:$0xf0]  ;;  %v8716_v56 = vld [vmem:[#allocation8 + $0x260] sm:$0xf0] }
 0x21d   :  { %4075 = vmatpush.bf16.msrb.mxu0 %v6164_v4  ;;  %4040 = vmatmul.bf16.vlgmr.msrb.gmra.mxu2 %v9899_v40  ;;  %v7217_v4 = vld [vmem:[#allocation8 + $0x994] sm:$0xf0]  ;;  %v7833_v18 = vld [vmem:[#allocation8 + $0xe64] sm:$0xf0] }
 0x21e   :  { %4053 = vmatmul.bf16.vlgmr.msrb.gmra.mxu1 %v9904_v10  ;;  %4084 = vmatpush.bf16.msra.mxu2 %v6692_v25  ;;  %v7220_v25 = vor.u32 %v8941_v3, %v7217_v4  ;;  %v8732_v3 = vld [vmem:[#allocation8 + $0x2e4] sm:$0xf] }
 0x21f   :  { %4110 = vmatpush.bf16.msra.mxu1 %v7396_v5  ;;  %4064 = vmatpush.bf16.msra.mxu3 %v7832_v11  ;;  %v6560_v5 = vor.u32 %v8776_v46, %v6557_v37  ;;  %v6513_v11 = vld [vmem:[#allocation8 + $0x414] sm:$0xf0]  ;;  %v9029_v37 = vld [vmem:[#allocation8 + $0xc2c] sm:$0xf] }
 0x220   :  { %4014 = vmatmul.bf16.vlgmr.msrb.gmra.mxu3 %v9890_v8  ;;  %v6516_v29 = vor.u32 %v8765_v15, %v6513_v11  ;;  %v7572_v11 = vor.u32 %v9029_v37, %v7569_v45  ;;  %v6563_v37 = vld [vmem:[#allocation8 + $0x448] sm:$0xf] }
 0x221   :  { %4076 = vmatpush.bf16.msrb.mxu0 %v6120_v31  ;;  %v7657_v31 = vld [vmem:[#allocation8 + $0xd04] sm:$0xf0]  ;;  %v3794_v38 = vpop.f32.mrf.mxu3  ;;  %v3820_v42 = vpop.f32.mrf.mxu0 }
 0x222   :  { %4085 = vmatpush.bf16.msra.mxu2 %v6648_v43  ;;  %v3795_v32 = vadd.f32 %v3794_v38, %v3782_v23  ;;  %v7176_v43 = vor.u32 %v8930_v27, %v7173_v28  ;;  %v3783_v55 = vpop.f32.mrf.mxu2  ;;  %v6651_v27 = vld [vmem:[#allocation8 + $0x4f8] sm:$0xf]  ;;  %v8804_v28 = vld [vmem:[#allocation8 + $0x520] sm:$0xf0] }
 0x223   :  { %4111 = vmatpush.bf16.msra.mxu1 %v7352_v35  ;;  %4065 = vmatpush.bf16.msra.mxu3 %v7788_v39  ;;  %v8754_v35 = vld [vmem:[#allocation8 + $0x394] sm:$0xf]  ;;  %v6469_v39 = vld [vmem:[#allocation8 + $0x3bc] sm:$0xf0]  ;;  %v6299_v55 = vld [vmem:[#allocation8 + $0x238] sm:$0xf] }
 0x224   :  { %v3808_v44 = vadd.f32 %v10004_v13, %v3795_v32  ;;  %v6472_v50 = vor.u32 %v8754_v35, %v6469_v39  ;;  %v7085_v13 = vld [vmem:[#allocation8 + $0x88c] sm:$0xf0]  ;;  %v9084_v35 = vld [vmem:[#allocation8 + $0xde4] sm:$0xf] }
 0x225   :  { %4077 = vmatpush.bf16.msrb.mxu0 %v6076_v51  ;;  %v6868_v51 = vor.u32 %v8853_v22, %v6865_v41  ;;  %v7088_v15 = vor.u32 %v8908_v61, %v7085_v13  ;;  %v7789_v39 = vld [vmem:[#allocation8 + $0xe0c] sm:$0xf0]  ;;  %v8727_v41 = vld [vmem:[#allocation8 + $0x2b8] sm:$0xf0] }
 0x226   :  { %4086 = vmatpush.bf16.msra.mxu2 %v6604_v58  ;;  %v6821_v58 = vld [vmem:[#allocation8 + $0x67c] sm:$0xf0]  ;;  %v6343_v22 = vld [vmem:[#allocation8 + $0x290] sm:$0xf] }
 0x227   :  { %4097 = vmatpush.bf16.msrb.mxu3 %v7044_v47  ;;  %4112 = vmatpush.bf16.msra.mxu1 %v7308_v52  ;;  %v7660_v47 = vor.u32 %v9051_v24, %v7657_v31  ;;  %v9040_v52 = vld [vmem:[#allocation8 + $0xc84] sm:$0xf]  ;;  %v6733_v31 = vld [vmem:[#allocation8 + $0x5cc] sm:$0xf0] }
 0x228   :  { %v7616_v46 = vor.u32 %v9040_v52, %v7613_v53  ;;  %v8820_v24 = vld [vmem:[#allocation8 + $0x5a4] sm:$0xf]  ;;  %v6607_v52 = vld [vmem:[#allocation8 + $0x4a0] sm:$0xf]  ;;  %v8793_v53 = vld [vmem:[#allocation8 + $0x4c8] sm:$0xf0] }
 0x229   :  { %4078 = vmatpush.bf16.msrb.mxu0 %v6032_v63  ;;  %v6824_v63 = vor.u32 %v8842_v57, %v6821_v58  ;;  %v3796_v4 = vpop.f32.mrf.mxu3  ;;  %v3822_v12 = vpop.f32.mrf.mxu0  ;;  %v6736_v48 = vor.u32 %v8820_v24, %v6733_v31  ;;  %v6608_v61 = vor.u32 %v8793_v53, %v6607_v52  ;;  %v7437_v13 = vld [vmem:[#allocation8 + $0xb4c] sm:$0xf0]  ;;  %v8859_v52 = vld [vmem:[#allocation8 + $0x6d8] sm:$0xf0] }
 0x22a   :  { %4087 = vmatpush.bf16.msra.mxu2 %v6560_v5  ;;  %v6381_v5 = vld [vmem:[#allocation8 + $0x30c] sm:$0xf0]  ;;  %v6255_v4 = vld [vmem:[#allocation8 + $0x1e0] sm:$0xf]  ;;  %v8881_v12 = vld [vmem:[#allocation8 + $0x788] sm:$0xf0] }
 0x22b   :  { %4098 = vmatpush.bf16.msrb.mxu3 %v7000_v59  ;;  %4113 = vmatpush.bf16.msra.mxu1 %v7264_v0  ;;  %v3821_v59 = vadd.f32 %v3820_v42, %v3808_v44  ;;  %v6695_v0 = vld [vmem:[#allocation8 + $0x550] sm:$0xf]  ;;  %v6384_v23 = vor.u32 %v8732_v3, %v6381_v5  ;;  %v7481_v44 = vld [vmem:[#allocation8 + $0xba4] sm:$0xf0]  ;;  %v8705_v5 = vld [vmem:[#allocation8 + $0x208] sm:$0xf0] }
 0x22c   :  { %4079 = vmatmul.bf16.vlgmr.msrb.gmra.mxu0 %v9887_v2  ;;  %v7047_v42 = vld [vmem:[#allocation8 + $0x810] sm:$0xf]  ;;  %v7484_v58 = vor.u32 %v9007_v49, %v7481_v44 }
 0x22d   :  { %4123 = vmatpush.bf16.msra.mxu0 %v7748_v1  ;;  %v8815_v1 = vld [vmem:[#allocation8 + $0x578] sm:$0xf0] }
 0x22e   :  { %4088 = vmatpush.bf16.msra.mxu2 %v6516_v29  ;;  %v6696_v20 = vor.u32 %v8815_v1, %v6695_v0  ;;  %v3833_v29 = vpop.f32.mrf.mxu2  ;;  %v7399_v0 = vld [vmem:[#allocation8 + $0xad0] sm:$0xf]  ;;  %v8991_v1 = vld [vmem:[#allocation8 + $0xaf8] sm:$0xf0] }
 0x22f   :  { %4099 = vmatpush.bf16.msrb.mxu3 %v6956_v6  ;;  %4114 = vmatpush.bf16.msra.mxu1 %v7220_v25  ;;  %v8831_v6 = vld [vmem:[#allocation8 + $0x5fc] sm:$0xf]  ;;  %v10011_v38 = vadd.f32 %v3833_v29, %v3821_v59  ;;  %v7003_v59 = vld [vmem:[#allocation8 + $0x7b8] sm:$0xf]  ;;  %v6915_v29 = vld [vmem:[#allocation8 + $0x708] sm:$0xf] }
 0x230   :  { %7849 = vmatmul.msk.bf16.vlgmr.msra.gmra.mxu3 %vm3365_vm2, %v9906_v14  ;;  %v6780_v25 = vor.u32 %v8831_v6, %v6777_v7  ;;  %v6959_v7 = vld [vmem:[#allocation8 + $0x760] sm:$0xf] }
 0x231   :  { %4124 = vmatpush.bf16.msra.mxu0 %v7704_v26  ;;  %v7525_v26 = vld [vmem:[#allocation8 + $0xbfc] sm:$0xf0] }
 0x232   :  { %4089 = vmatpush.bf16.msra.mxu2 %v6472_v50  ;;  %v7528_v32 = vor.u32 %v9018_v21, %v7525_v26  ;;  %v7792_v50 = vor.u32 %v9084_v35, %v7789_v39  ;;  %v7355_v21 = vld [vmem:[#allocation8 + $0xa78] sm:$0xf]  ;;  %v6211_v26 = vld [vmem:[#allocation8 + $0x188] sm:$0xf] }
 0x233   :  { %4100 = vmatpush.bf16.msrb.mxu3 %v6912_v33  ;;  %4115 = vmatpush.bf16.msra.mxu1 %v7176_v43  ;;  %v7836_v33 = vor.u32 %v9095_v16, %v7833_v18  ;;  %v8903_v43 = vld [vmem:[#allocation8 + $0x838] sm:$0xf0]  ;;  %v3859_v57 = vpop.f32.mrf.mxu1  ;;  %v7400_v16 = vor.u32 %v8991_v1, %v7399_v0  ;;  %v6519_v18 = vld [vmem:[#allocation8 + $0x3f0] sm:$0xf]  ;;  %v6475_v35 = vld [vmem:[#allocation8 + $0x398] sm:$0xf] }
 0x234   :  { %v7048_v54 = vor.u32 %v8903_v43, %v7047_v42 }
 0x235   :  { %4125 = vmatpush.bf16.msra.mxu0 %v7660_v47  ;;  %v6652_v47 = vor.u32 %v8804_v28, %v6651_v27  ;;  %v8694_v27 = vld [vmem:[#allocation8 + $0x1b0] sm:$0xf0] }
 0x236   :  { %4090 = vmatpush.bf16.msra.mxu2 %v6428_v62  ;;  %v3835_v45 = vpop.f32.mrf.mxu2  ;;  %v6300_v62 = vor.u32 %v8716_v56, %v6299_v55  ;;  %v6212_v39 = vor.u32 %v8694_v27, %v6211_v26  ;;  %v6431_v55 = vld [vmem:[#allocation8 + $0x340] sm:$0xf]  ;;  %v8837_v26 = vld [vmem:[#allocation8 + $0x628] sm:$0xf0] }
 0x237   :  { %4101 = vmatpush.bf16.msrb.mxu3 %v6868_v51  ;;  %4116 = vmatpush.bf16.msra.mxu1 %v7132_v60  ;;  %v6344_v51 = vor.u32 %v8727_v41, %v6343_v22  ;;  %v8892_v60 = vld [vmem:[#allocation8 + $0x7e0] sm:$0xf0]  ;;  %v7311_v41 = vld [vmem:[#allocation8 + $0xa20] sm:$0xf] }
 0x238   :  { %v7004_v3 = vor.u32 %v8892_v60, %v7003_v59  ;;  %v8760_v22 = vld [vmem:[#allocation8 + $0x3c0] sm:$0xf0]  ;;  %v8749_v59 = vld [vmem:[#allocation8 + $0x368] sm:$0xf0]  ;;  %v7267_v60 = vld [vmem:[#allocation8 + $0x9c8] sm:$0xf] }
 0x239   :  { %4126 = vmatpush.bf16.msra.mxu0 %v7616_v46  ;;  %v8996_v46 = vld [vmem:[#allocation8 + $0xb24] sm:$0xf]  ;;  %v6476_v53 = vor.u32 %v8760_v22, %v6475_v35  ;;  %v6432_v0 = vor.u32 %v8749_v59, %v6431_v55  ;;  %v7795_v35 = vld [vmem:[#allocation8 + $0xde8] sm:$0xf]  ;;  %v8038_v22 = vld [vmem:[#allocation13 + $0x170] sm:$0xf] }
 0x23a   :  { %4091 = vmatpush.bf16.msra.mxu2 %v6384_v23  ;;  %v7440_v6 = vor.u32 %v8996_v46, %v7437_v13  ;;  %v8980_v23 = vld [vmem:[#allocation8 + $0xaa0] sm:$0xf0]  ;;  %v6123_v13 = vld [vmem:[#allocation8 + $0xd8] sm:$0xf] }
 0x23b   :  { %4102 = vmatpush.bf16.msrb.mxu3 %v6824_v63  ;;  %4117 = vmatpush.bf16.msra.mxu1 %v7088_v15  ;;  %v8782_v63 = vld [vmem:[#allocation8 + $0x470] sm:$0xf0]  ;;  %v3861_v28 = vpop.f32.mrf.mxu1  ;;  %v7356_v31 = vor.u32 %v8980_v23, %v7355_v21 }
 0x23c   :  { %v6564_v15 = vor.u32 %v8782_v63, %v6563_v37  ;;  %v8672_v37 = vld [vmem:[#allocation8 + $0x100] sm:$0xf0] }
 0x23d   :  { %4127 = vmatpush.bf16.msra.mxu0 %v7572_v11  ;;  %4092 = vmatmul.bf16.vlgmr.msra.gmra.mxu2 %v9890_v8  ;;  %v6256_v11 = vor.u32 %v8705_v5, %v6255_v4  ;;  %v8848_v63 = vld [vmem:[#allocation8 + $0x680] sm:$0xf0]  ;;  %v8738_v4 = vld [vmem:[#allocation8 + $0x310] sm:$0xf0]  ;;  %v6124_v5 = vor.u32 %v8672_v37, %v6123_v13  ;;  %v8030_v13 = vld [vmem:[#allocation13 + $0x160] sm:$0xf] }
 0x23e   :  { %4118 = vmatmul.bf16.vlgmr.msra.gmra.mxu1 %v9899_v40  ;;  %4142 = vmatpush.bf16.msrb.mxu2 %v7836_v33  ;;  %v8870_v33 = vld [vmem:[#allocation8 + $0x730] sm:$0xf0]  ;;  %v9147_v37 = vld [vmem:[#allocation13 + $0x164] sm:$0xf0] }
 0x23f   :  { %4162 = vmatpush.bf16.msrb.mxu1 %v6696_v20  ;;  %4103 = vmatpush.bf16.msrb.mxu3 %v6780_v25  ;;  %v8771_v20 = vld [vmem:[#allocation8 + $0x418] sm:$0xf0]  ;;  %v6960_v25 = vor.u32 %v8881_v12, %v6959_v7  ;;  %v6916_v43 = vor.u32 %v8870_v33, %v6915_v29  ;;  %v7839_v12 = vld [vmem:[#allocation8 + $0xe40] sm:$0xf]  ;;  %v7179_v29 = vld [vmem:[#allocation8 + $0x918] sm:$0xf] }
 0x240   :  { %v6520_v24 = vor.u32 %v8771_v20, %v6519_v18  ;;  %v3872_v44 = vpop.f32.mrf.mxu2  ;;  %v8947_v7 = vld [vmem:[#allocation8 + $0x998] sm:$0xf0]  ;;  %v9101_v18 = vld [vmem:[#allocation8 + $0xe68] sm:$0xf0]  ;;  %v8936_v33 = vld [vmem:[#allocation8 + $0x940] sm:$0xf0] }
 0x241   :  { %4128 = vmatpush.bf16.msra.mxu0 %v7528_v32  ;;  %v8969_v32 = vld [vmem:[#allocation8 + $0xa48] sm:$0xf0]  ;;  %v3846_v42 = vpop.f32.mrf.mxu3 }
 0x242   :  { %4143 = vmatpush.bf16.msrb.mxu2 %v7792_v50  ;;  %v3860_v49 = vadd.f32 %v3859_v57, %v3846_v42  ;;  %v3885_v50 = vpop.f32.mrf.mxu0  ;;  %v8661_v20 = vld [vmem:[#allocation8 + $0xa8] sm:$0xf0]  ;;  %v6035_v42 = vld [vmem:[#allocation8 + $0x28] sm:$0xf] }
 0x243   :  { %4163 = vmatpush.bf16.msrb.mxu1 %v6652_v47  ;;  %4104 = vmatpush.bf16.msrb.mxu3 %v6736_v48  ;;  %v6167_v47 = vld [vmem:[#allocation8 + $0x130] sm:$0xf]  ;;  %v8683_v48 = vld [vmem:[#allocation8 + $0x158] sm:$0xf0]  ;;  %v10021_v45 = vpop.f32.mrf.mxu1 }
 0x244   :  { %v3873_v56 = vadd.f32 %v3872_v44, %v3860_v49  ;;  %v8826_v49 = vld [vmem:[#allocation8 + $0x5d0] sm:$0xf0]  ;;  %v7751_v44 = vld [vmem:[#allocation8 + $0xd90] sm:$0xf] }
 0x245   :  { %4129 = vmatpush.bf16.msra.mxu0 %v7484_v58  ;;  %v6168_v58 = vor.u32 %v8683_v48, %v6167_v47  ;;  %v6739_v48 = vld [vmem:[#allocation8 + $0x5a8] sm:$0xf] }
 0x246   :  { %4175 = vmatpush.bf16.msra.mxu2 %v7048_v54  ;;  %4105 = vmatmul.bf16.vlgmr.msrb.gmra.mxu3 %v9897_v34  ;;  %v7312_v54 = vor.u32 %v8969_v32, %v7311_v41  ;;  %v10017_v57 = vadd.f32 %v3885_v50, %v3873_v56  ;;  %v9149_v32 = vld [vmem:[#allocation13 + $0x174] sm:$0xf0]  ;;  %v7180_v50 = vor.u32 %v8936_v33, %v7179_v29  ;;  %v7966_v29 = vld [vmem:[#allocation13 + $0xe0] sm:$0xf]  ;;  %v9131_v33 = vld [vmem:[#allocation13 + $0xe4] sm:$0xf0] }
 0x247   :  { %4149 = vmatpush.bf16.msra.mxu3 %v6344_v51  ;;  %4164 = vmatpush.bf16.msrb.mxu1 %v6608_v61  ;;  %v6871_v51 = vld [vmem:[#allocation8 + $0x6b0] sm:$0xf]  ;;  %v8958_v61 = vld [vmem:[#allocation8 + $0x9f0] sm:$0xf0]  ;;  %v7135_v56 = vld [vmem:[#allocation8 + $0x8c0] sm:$0xf]  ;;  %v8039_v59 = vor.u32 %v9149_v32, %v8038_v22 }
 0x248   :  { %v6872_v46 = vor.u32 %v8859_v52, %v6871_v51  ;;  %v7268_v1 = vor.u32 %v8958_v61, %v7267_v60  ;;  %v3874_v21 = vpop.f32.mrf.mxu2  ;;  %v9079_v51 = vld [vmem:[#allocation8 + $0xdb8] sm:$0xf0]  ;;  %v7910_v52 = vld [vmem:[#allocation13 + $0x70] sm:$0xf]  ;;  %v6740_v60 = vor.u32 %v8826_v49, %v6739_v48  ;;  %v9046_v22 = vld [vmem:[#allocation8 + $0xcb0] sm:$0xf0] }
 0x249   :  { %4130 = vmatpush.bf16.msra.mxu0 %v7440_v6  ;;  %v7223_v6 = vld [vmem:[#allocation8 + $0x970] sm:$0xf]  ;;  %v7752_v61 = vor.u32 %v9079_v51, %v7751_v44  ;;  %v9057_v21 = vld [vmem:[#allocation8 + $0xd08] sm:$0xf0]  ;;  %v8006_v49 = vld [vmem:[#allocation13 + $0x130] sm:$0xf] }
 0x24a   :  { %4176 = vmatpush.bf16.msra.mxu2 %v7004_v3  ;;  %v6387_v3 = vld [vmem:[#allocation8 + $0x2e8] sm:$0xf]  ;;  %v3887_v23 = vpop.f32.mrf.mxu0  ;;  %v7224_v28 = vor.u32 %v8947_v7, %v7223_v6  ;;  %v8031_v6 = vor.u32 %v9147_v37, %v8030_v13  ;;  %v7974_v7 = vld [vmem:[#allocation13 + $0xf0] sm:$0xf]  ;;  %v9111_v32 = vld [vmem:[#allocation13 + $0x44] sm:$0xf0] }
 0x24b   :  { %4150 = vmatpush.bf16.msra.mxu3 %v6300_v62  ;;  %4165 = vmatpush.bf16.msrb.mxu1 %v6564_v15  ;;  %v6827_v62 = vld [vmem:[#allocation8 + $0x658] sm:$0xf]  ;;  %v3848_v15 = vpop.f32.mrf.mxu3  ;;  %v6388_v27 = vor.u32 %v8738_v4, %v6387_v3  ;;  %v3913_v47 = vpop.f32.mrf.mxu1  ;;  %v9115_v3 = vld [vmem:[#allocation13 + $0x64] sm:$0xf0]  ;;  %v7091_v4 = vld [vmem:[#allocation8 + $0x868] sm:$0xf] }
 0x24c   :  { %4131 = vmatmul.bf16.vlgmr.msra.gmra.mxu0 %v9904_v10  ;;  %v9129_v47 = vld [vmem:[#allocation13 + $0xd4] sm:$0xf0]  ;;  %v7950_v13 = vld [vmem:[#allocation13 + $0xc0] sm:$0xf]  ;;  %v9127_v37 = vld [vmem:[#allocation13 + $0xc4] sm:$0xf0] }
 0x24d   :  { %4188 = vmatpush.bf16.msrb.mxu0 %v7400_v16  ;;  %7850 = vmatmul.msk.bf16.vlgmr.msrb.gmra.mxu2 %vm3365_vm2, %v9906_v14  ;;  %v6828_v16 = vor.u32 %v8848_v63, %v6827_v62  ;;  %v7707_v62 = vld [vmem:[#allocation8 + $0xd38] sm:$0xf]  ;;  %v9141_v44 = vld [vmem:[#allocation13 + $0x134] sm:$0xf0] }
 0x24e   :  { %4177 = vmatpush.bf16.msra.mxu2 %v6960_v25  ;;  %v6783_v25 = vld [vmem:[#allocation8 + $0x600] sm:$0xf] }
 0x24f   :  { %4151 = vmatpush.bf16.msra.mxu3 %v6256_v11  ;;  %4166 = vmatpush.bf16.msrb.mxu1 %v6520_v24  ;;  %v6079_v11 = vld [vmem:[#allocation8 + $0x80] sm:$0xf]  ;;  %v7840_v24 = vor.u32 %v9101_v18, %v7839_v12  ;;  %v6784_v41 = vor.u32 %v8837_v26, %v6783_v25  ;;  %v7894_v26 = vld [vmem:[#allocation13 + $0x50] sm:$0xf] }
 0x250   :  { %v9133_v12 = vld [vmem:[#allocation13 + $0xf4] sm:$0xf0] }
 0x251   :  { %4189 = vmatpush.bf16.msrb.mxu0 %v7356_v31  ;;  %v6080_v31 = vor.u32 %v8661_v20, %v6079_v11  ;;  %v9145_v18 = vld [vmem:[#allocation13 + $0x154] sm:$0xf0]  ;;  %v7975_v25 = vor.u32 %v9133_v12, %v7974_v7  ;;  %v7951_v7 = vor.u32 %v9127_v37, %v7950_v13  ;;  %v7870_v12 = vld [vmem:[#allocation13 + $0x20] sm:$0xf]  ;;  %v8166_v13 = vld [vmem:[#allocation13 + $0x270] sm:$0xf] }
 0x252   :  { %4178 = vmatpush.bf16.msra.mxu2 %v6916_v43  ;;  %v8650_v43 = vld [vmem:[#allocation8 + $0x50] sm:$0xf0]  ;;  %v7663_v20 = vld [vmem:[#allocation8 + $0xce0] sm:$0xf] }
 0x253   :  { %4152 = vmatpush.bf16.msra.mxu3 %v6212_v39  ;;  %4167 = vmatpush.bf16.msrb.mxu1 %v6476_v53  ;;  %v9090_v39 = vld [vmem:[#allocation8 + $0xe10] sm:$0xf0]  ;;  %v9117_v53 = vld [vmem:[#allocation13 + $0x74] sm:$0xf0]  ;;  %v6036_v55 = vor.u32 %v8650_v43, %v6035_v42  ;;  %v7958_v43 = vld [vmem:[#allocation13 + $0xd0] sm:$0xf] }
 0x254   :  { %v9181_v37 = vld [vmem:[#allocation13 + $0x274] sm:$0xf0] }
 0x255   :  { %4190 = vmatpush.bf16.msrb.mxu0 %v7312_v54  ;;  %v7796_v54 = vor.u32 %v9090_v39, %v7795_v35  ;;  %v9143_v35 = vld [vmem:[#allocation13 + $0x144] sm:$0xf0]  ;;  %v7619_v39 = vld [vmem:[#allocation8 + $0xc88] sm:$0xf] }
 0x256   :  { %4179 = vmatpush.bf16.msra.mxu2 %v6872_v46  ;;  %v7911_v46 = vor.u32 %v9117_v53, %v7910_v52  ;;  %v7620_v48 = vor.u32 %v9046_v22, %v7619_v39  ;;  %v7575_v52 = vld [vmem:[#allocation8 + $0xc30] sm:$0xf]  ;;  %v9035_v53 = vld [vmem:[#allocation8 + $0xc58] sm:$0xf0]  ;;  %v7862_v39 = vld [vmem:[#allocation13 + $0x10] sm:$0xf] }
 0x257   :  { %4153 = vmatpush.bf16.msra.mxu3 %v6168_v58  ;;  %4168 = vmatpush.bf16.msrb.mxu1 %v6432_v0  ;;  %v8925_v58 = vld [vmem:[#allocation8 + $0x8e8] sm:$0xf0]  ;;  %v9068_v0 = vld [vmem:[#allocation8 + $0xd60] sm:$0xf0]  ;;  %v9105_v22 = vld [vmem:[#allocation13 + $0x14] sm:$0xf0] }
 0x258   :  { %v7136_v63 = vor.u32 %v8925_v58, %v7135_v56  ;;  %v7959_v58 = vor.u32 %v9129_v47, %v7958_v43 }
 0x259   :  { %4191 = vmatpush.bf16.msrb.mxu0 %v7268_v1  ;;  %v7902_v1 = vld [vmem:[#allocation13 + $0x60] sm:$0xf] }
 0x25a   :  { %4180 = vmatpush.bf16.msra.mxu2 %v6828_v16  ;;  %v7903_v15 = vor.u32 %v9115_v3, %v7902_v1  ;;  %v8022_v16 = vld [vmem:[#allocation13 + $0x150] sm:$0xf]  ;;  %v9139_v1 = vld [vmem:[#allocation13 + $0x124] sm:$0xf0] }
 0x25b   :  { %4154 = vmatpush.bf16.msra.mxu3 %v6124_v5  ;;  %4169 = vmatpush.bf16.msrb.mxu1 %v6388_v27  ;;  %v8914_v5 = vld [vmem:[#allocation8 + $0x890] sm:$0xf0]  ;;  %v10026_v23 = vpop.f32.mrf.mxu1  ;;  %v9113_v27 = vld [vmem:[#allocation13 + $0x54] sm:$0xf0] }
 0x25c   :  { %v7092_v11 = vor.u32 %v8914_v5, %v7091_v4  ;;  %v7531_v4 = vld [vmem:[#allocation8 + $0xbd8] sm:$0xf]  ;;  %v9024_v5 = vld [vmem:[#allocation8 + $0xc00] sm:$0xf0] }
 0x25d   :  { %4192 = vmatpush.bf16.msrb.mxu0 %v7224_v28  ;;  %v8023_v28 = vor.u32 %v9145_v18, %v8022_v16  ;;  %v9125_v16 = vld [vmem:[#allocation13 + $0xb4] sm:$0xf0] }
 0x25e   :  { %4181 = vmatpush.bf16.msra.mxu2 %v6784_v41  ;;  %4170 = vmatmul.bf16.vlgmr.msrb.gmra.mxu1 %v9890_v8  ;;  %v7708_v8 = vor.u32 %v9068_v0, %v7707_v62  ;;  %v7886_v41 = vld [vmem:[#allocation13 + $0x40] sm:$0xf] }
 0x25f   :  { %4220 = vmatpush.bf16.msra.mxu1 %v7840_v24  ;;  %4155 = vmatpush.bf16.msra.mxu3 %v6080_v31  ;;  %v7664_v24 = vor.u32 %v9057_v21, %v7663_v20  ;;  %v8014_v31 = vld [vmem:[#allocation13 + $0x140] sm:$0xf]  ;;  %v7887_v51 = vor.u32 %v9111_v32, %v7886_v41  ;;  %v7532_v20 = vor.u32 %v9024_v5, %v7531_v4  ;;  %v7990_v21 = vld [vmem:[#allocation13 + $0x110] sm:$0xf]  ;;  %v9123_v32 = vld [vmem:[#allocation13 + $0xa4] sm:$0xf0] }
 0x260   :  { %v8015_v42 = vor.u32 %v9143_v35, %v8014_v31  ;;  %v7998_v0 = vld [vmem:[#allocation13 + $0x120] sm:$0xf]  ;;  %v9121_v4 = vld [vmem:[#allocation13 + $0x94] sm:$0xf0] }
 0x261   :  { %4193 = vmatpush.bf16.msrb.mxu0 %v7180_v50  ;;  %v10032_v56 = vpop.f32.mrf.mxu0  ;;  %v7934_v41 = vld [vmem:[#allocation13 + $0xa0] sm:$0xf] }
 0x262   :  { %4182 = vmatpush.bf16.msra.mxu2 %v6740_v60  ;;  %v9109_v60 = vld [vmem:[#allocation13 + $0x34] sm:$0xf0] }
 0x263   :  { %4221 = vmatpush.bf16.msra.mxu1 %v7796_v54  ;;  %4156 = vmatpush.bf16.msra.mxu3 %v6036_v55  ;;  %v3898_v50 = vpop.f32.mrf.mxu3  ;;  %v10030_v55 = vpop.f32.mrf.mxu2 }
 0x264   :  { %v3899_v54 = vadd.f32 %v3898_v50, %v10017_v57  ;;  %v7443_v50 = vld [vmem:[#allocation8 + $0xb28] sm:$0xf] }
 0x265   :  { %4194 = vmatpush.bf16.msrb.mxu0 %v7136_v63  ;;  %4183 = vmatmul.bf16.vlgmr.msra.gmra.mxu2 %v9897_v34  ;;  %v7967_v34 = vor.u32 %v9131_v33, %v7966_v29  ;;  %v7576_v63 = vor.u32 %v9035_v53, %v7575_v52  ;;  %v9013_v29 = vld [vmem:[#allocation8 + $0xba8] sm:$0xf0]  ;;  %v7854_v52 = vld [vmem:[#allocation13] sm:$0xf] }
 0x266   :  { %5335 = vmatpush.bf16.msrb.mxu2 %v7911_v46  ;;  %4157 = vmatmul.bf16.vlgmr.msra.gmra.mxu3 %v9887_v2  ;;  %v7895_v2 = vor.u32 %v9113_v27, %v7894_v26  ;;  %v8007_v46 = vor.u32 %v9141_v44, %v8006_v49  ;;  %v10040_v57 = vadd.f32 %v10021_v45, %v3899_v54  ;;  %v7942_v45 = vld [vmem:[#allocation13 + $0xb0] sm:$0xf]  ;;  %v9213_v49 = vld [vmem:[#allocation13 + $0x374] sm:$0xf0] }
 0x267   :  { %5361 = vmatpush.bf16.msrb.mxu1 %v8039_v59  ;;  %4201 = vmatpush.bf16.msrb.mxu3 %v7752_v61  ;;  %v7878_v59 = vld [vmem:[#allocation13 + $0x30] sm:$0xf]  ;;  %v3952_v61 = vpop.f32.mrf.mxu1  ;;  %v7863_v44 = vor.u32 %v9105_v22, %v7862_v39  ;;  %v7935_v54 = vor.u32 %v9123_v32, %v7934_v41  ;;  %v9161_v22 = vld [vmem:[#allocation13 + $0x1d4] sm:$0xf0] }
 0x268   :  { %v7879_v3 = vor.u32 %v9109_v60, %v7878_v59  ;;  %v8102_v59 = vld [vmem:[#allocation13 + $0x1f0] sm:$0xf]  ;;  %v9165_v60 = vld [vmem:[#allocation13 + $0x1f4] sm:$0xf0] }
 0x269   :  { %4195 = vmatpush.bf16.msrb.mxu0 %v7092_v11  ;;  %v8086_v39 = vld [vmem:[#allocation13 + $0x1d0] sm:$0xf] }
 0x26a   :  { %5336 = vmatpush.bf16.msrb.mxu2 %v7903_v15  ;;  %v10043_v15 = vld [vmem:[#allocation11] sm:$0xff]  ;;  %v8150_v32 = vld [vmem:[#allocation13 + $0x250] sm:$0xf] }
 0x26b   :  { %5362 = vmatpush.bf16.msrb.mxu1 %v8031_v6  ;;  %4202 = vmatpush.bf16.msrb.mxu3 %v7708_v8  ;;  %v9107_v8 = vld [vmem:[#allocation13 + $0x24] sm:$0xf0]  ;;  %v4270_v11 = vperm.slane %v10043_v15, 2  ;;  %v3900_v26 = vpop.f32.mrf.mxu3  ;;  %v3926_v35 = vpop.f32.mrf.mxu2  ;;  %v4269_v61 = vperm.slane %v10043_v15, 1 }
 0x26c   :  { %4196 = vmatmul.bf16.vlgmr.msrb.gmra.mxu0 %v9899_v40  ;;  %v10034_v40 = vld [vmem:[#allocation10] sm:$0xff]  ;;  %v7871_v27 = vor.u32 %v9107_v8, %v7870_v12  ;;  %v9209_v35 = vld [vmem:[#allocation13 + $0x354] sm:$0xf0] }
 0x26d   :  { %5348 = vmatpush.bf16.msra.mxu0 %v7975_v25  ;;  %v4233_v62 = vperm.slane %v10034_v40, 2  ;;  %v4231_v6 = vperm.slane %v10034_v40, 0  ;;  %v9137_v25 = vld [vmem:[#allocation13 + $0x114] sm:$0xf0]  ;;  %v4232_v31 = vperm.slane %v10034_v40, 1 }
 0x26e   :  { %5337 = vmatpush.bf16.msrb.mxu2 %v7895_v2  ;;  %7851 = vmatmul.msk.bf16.vlgmr.msra.gmra.mxu1 %vm3365_vm2, %v9906_v14  ;;  %v7999_v14 = vor.u32 %v9139_v1, %v7998_v0  ;;  %v7943_v2 = vor.u32 %v9125_v16, %v7942_v45  ;;  %v9211_v12 = vld [vmem:[#allocation13 + $0x364] sm:$0xf0]  ;;  %v8167_v45 = vor.u32 %v9181_v37, %v8166_v13  ;;  %v8094_v16 = vld [vmem:[#allocation13 + $0x1e0] sm:$0xf]  ;;  %v8214_v13 = vld [vmem:[#allocation13 + $0x2d0] sm:$0xf] }
 0x26f   :  { %5363 = vmatpush.bf16.msrb.mxu1 %v8023_v28  ;;  %4203 = vmatpush.bf16.msrb.mxu3 %v7664_v24  ;;  %v4255_v18 = vmul.f32 %v4233_v62, %v9968_v17  ;;  %v7487_v28 = vld [vmem:[#allocation8 + $0xb80] sm:$0xf]  ;;  %v4253_v33 = vmul.f32 %v4231_v6, %v9935_v9  ;;  %v4268_v24 = vperm.slane %v10043_v15, 0  ;;  %v3939_v17 = vpop.f32.mrf.mxu0  ;;  %v8294_v9 = vld [vmem:[#allocation13 + $0x370] sm:$0xf]  ;;  %v4254_v62 = vmul.f32 %v4232_v31, %v9945_v36 }
 0x270   :  { %v7488_v47 = vor.u32 %v9013_v29, %v7487_v28  ;;  %v8295_v0 = vor.u32 %v9213_v49, %v8294_v9  ;;  %v8103_v6 = vor.u32 %v9165_v60, %v8102_v59  ;;  %v9119_v28 = vld [vmem:[#allocation13 + $0x84] sm:$0xf0]  ;;  %v8230_v29 = vld [vmem:[#allocation13 + $0x2f0] sm:$0xf]  ;;  %v8222_v9 = vld [vmem:[#allocation13 + $0x2e0] sm:$0xf]  ;;  %v8087_v49 = vor.u32 %v9161_v22, %v8086_v39 }
 0x271   :  { %5349 = vmatpush.bf16.msra.mxu0 %v7967_v34  ;;  %v7991_v34 = vor.u32 %v9137_v25, %v7990_v21  ;;  %v4292_v43 = vadd.f32 %v4270_v11, %v4255_v18  ;;  %v4290_v53 = vadd.f32 %v4268_v24, %v4253_v33  ;;  %v9163_v18 = vld [vmem:[#allocation13 + $0x1e4] sm:$0xf0]  ;;  %v8158_v11 = vld [vmem:[#allocation13 + $0x260] sm:$0xf]  ;;  %v4291_v21 = vadd.f32 %v4269_v61, %v4254_v62  ;;  %v9197_v24 = vld [vmem:[#allocation13 + $0x2f4] sm:$0xf0] }
 0x272   :  { %5338 = vmatpush.bf16.msrb.mxu2 %v7887_v51  ;;  %v9002_v51 = vld [vmem:[#allocation8 + $0xb50] sm:$0xf0]  ;;  %v8095_v33 = vor.u32 %v9163_v18, %v8094_v16  ;;  %v8278_v31 = vld [vmem:[#allocation13 + $0x350] sm:$0xf]  ;;  %v9175_v59 = vld [vmem:[#allocation13 + $0x244] sm:$0xf0] }
 0x273   :  { %5364 = vmatpush.bf16.msrb.mxu1 %v8015_v42  ;;  %4204 = vmatpush.bf16.msrb.mxu3 %v7620_v48  ;;  %v7982_v42 = vld [vmem:[#allocation13 + $0x100] sm:$0xf]  ;;  %v9135_v48 = vld [vmem:[#allocation13 + $0x104] sm:$0xf0]  ;;  %v7444_v1 = vor.u32 %v9002_v51, %v7443_v50  ;;  %v4301_v8 = vmax.f32 %v4290_v53, 0.0 }
 0x274   :  { %v8270_v50 = vld [vmem:[#allocation13 + $0x340] sm:$0xf]  ;;  %v9207_v51 = vld [vmem:[#allocation13 + $0x344] sm:$0xf0]  ;;  %v9193_v62 = vld [vmem:[#allocation13 + $0x2d4] sm:$0xf0] }
 0x275   :  { %5350 = vmatpush.bf16.msra.mxu0 %v7959_v58  ;;  %v9103_v58 = vld [vmem:[#allocation13 + $0x4] sm:$0xf0]  ;;  %v10056_v17 = vpack.c.bf16 %v4301_v8, %v4301_v8  ;;  %v8078_v53 = vld [vmem:[#allocation13 + $0x1c0] sm:$0xf]  ;;  %v4237_v8 = vperm.slane %v10034_v40, 6  ;;  %v8215_v16 = vor.u32 %v9193_v62, %v8214_v13 }
 0x276   :  { %5339 = vmatpush.bf16.msrb.mxu2 %v7879_v3  ;;  %v7926_v3 = vld [vmem:[#allocation13 + $0x90] sm:$0xf]  ;;  %v7855_v5 = vor.u32 %v9103_v58, %v7854_v52  ;;  %v8142_v58 = vld [vmem:[#allocation13 + $0x240] sm:$0xf] }
 0x277   :  { %5365 = vmatpush.bf16.msrb.mxu1 %v8007_v46  ;;  %4205 = vmatpush.bf16.msrb.mxu3 %v7576_v63  ;;  %v7983_v46 = vor.u32 %v9135_v48, %v7982_v42  ;;  %v4303_v63 = vmax.f32 %v4292_v43, 0.0  ;;  %v7927_v36 = vor.u32 %v9121_v4, %v7926_v3  ;;  %v9177_v42 = vld [vmem:[#allocation13 + $0x254] sm:$0xf0]  ;;  %v4302_v43 = vmax.f32 %v4291_v21, 0.0  ;;  %v8070_v3 = vld [vmem:[#allocation13 + $0x1b0] sm:$0xf] }
 0x278   :  { %v8279_v48 = vor.u32 %v9209_v35, %v8278_v31  ;;  %v9157_v4 = vld [vmem:[#allocation13 + $0x1b4] sm:$0xf0]  ;;  %v8254_v21 = vld [vmem:[#allocation13 + $0x320] sm:$0xf]  ;;  %v9171_v35 = vld [vmem:[#allocation13 + $0x224] sm:$0xf0] }
 0x279   :  { %5351 = vmatpush.bf16.msra.mxu0 %v7951_v7  ;;  %v8286_v7 = vld [vmem:[#allocation13 + $0x360] sm:$0xf]  ;;  %v10054_v25 = vpack.c.bf16 %v4303_v63, %v4303_v63  ;;  %v10063_v60 = vpack.c.bf16 %v4302_v43, %v4302_v43  ;;  %v8262_v63 = vld [vmem:[#allocation13 + $0x330] sm:$0xf] }
 0x27a   :  { %5340 = vmatpush.bf16.msrb.mxu2 %v7871_v27  ;;  %v8287_v26 = vor.u32 %v9211_v12, %v8286_v7  ;;  %v7918_v27 = vld [vmem:[#allocation13 + $0x80] sm:$0xf]  ;;  %v8134_v7 = vld [vmem:[#allocation13 + $0x230] sm:$0xf]  ;;  %v9173_v12 = vld [vmem:[#allocation13 + $0x234] sm:$0xf0] }
 0x27b   :  { %5366 = vmatpush.bf16.msrb.mxu1 %v7999_v14  ;;  %4206 = vmatpush.bf16.msrb.mxu3 %v7532_v20  ;;  %v10052_v14 = vpop.f32.mrf.mxu0  ;;  %v9179_v20 = vld [vmem:[#allocation13 + $0x264] sm:$0xf0]  ;;  %v7919_v41 = vor.u32 %v9119_v28, %v7918_v27  ;;  %v4234_v27 = vperm.slane %v10034_v40, 3  ;;  %v8135_v28 = vor.u32 %v9173_v12, %v8134_v7  ;;  %v8126_v31 = vld [vmem:[#allocation13 + $0x220] sm:$0xf] }
 0x27c   :  { %v8190_v13 = vld [vmem:[#allocation13 + $0x2a0] sm:$0xf]  ;;  %v9151_v7 = vld [vmem:[#allocation13 + $0x184] sm:$0xf0] }
 0x27d   :  { %5352 = vmatpush.bf16.msra.mxu0 %v7943_v2  ;;  %v8159_v2 = vor.u32 %v9179_v20, %v8158_v11  ;;  %v8071_v11 = vor.u32 %v9157_v4, %v8070_v3  ;;  %v9191_v20 = vld [vmem:[#allocation13 + $0x2c4] sm:$0xf0]  ;;  %v8046_v4 = vld [vmem:[#allocation13 + $0x180] sm:$0xf] }
 0x27e   :  { %5341 = vmatpush.bf16.msrb.mxu2 %v7863_v44  ;;  %v9195_v44 = vld [vmem:[#allocation13 + $0x2e4] sm:$0xf0]  ;;  %v8110_v12 = vld [vmem:[#allocation13 + $0x200] sm:$0xf] }
 0x27f   :  { %5367 = vmatpush.bf16.msrb.mxu1 %v7991_v34  ;;  %4207 = vmatpush.bf16.msrb.mxu3 %v7488_v47  ;;  %v10060_v34 = vpop.f32.mrf.mxu1  ;;  %v8231_v47 = vor.u32 %v9197_v24, %v8230_v29  ;;  %v8223_v61 = vor.u32 %v9195_v44, %v8222_v9  ;;  %v8062_v29 = vld [vmem:[#allocation13 + $0x1a0] sm:$0xf]  ;;  %v4235_v24 = vperm.slane %v10034_v40, 4  ;;  %v9201_v9 = vld [vmem:[#allocation13 + $0x314] sm:$0xf0]  ;;  %v4271_v44 = vperm.slane %v10043_v15, 3 }
 0x281   :  { %5353 = vmatpush.bf16.msra.mxu0 %v7935_v54  ;;  %v9159_v54 = vld [vmem:[#allocation13 + $0x1c4] sm:$0xf0] }
 0x282   :  { %5342 = vmatpush.bf16.msrb.mxu2 %v7855_v5  ;;  %v8079_v37 = vor.u32 %v9159_v54, %v8078_v53  ;;  %v4272_v53 = vperm.slane %v10043_v15, 4 }
 0x283   :  { %5368 = vmatpush.bf16.msrb.mxu1 %v7983_v46  ;;  %4208 = vmatpush.bf16.msrb.mxu3 %v7444_v1  ;;  %v3991_v52 = vpop.f32.mrf.mxu0  ;;  %v8271_v46 = vor.u32 %v9207_v51, %v8270_v50  ;;  %v8143_v1 = vor.u32 %v9175_v59, %v8142_v58  ;;  %v10066_v5 = vpop.f32.mrf.mxu3  ;;  %v8127_v50 = vor.u32 %v9171_v35, %v8126_v31  ;;  %v8054_v51 = vld [vmem:[#allocation13 + $0x190] sm:$0xf]  ;;  %v9169_v59 = vld [vmem:[#allocation13 + $0x214] sm:$0xf0] }
 0x284   :  { %v9153_v52 = vld [vmem:[#allocation13 + $0x194] sm:$0xf0]  ;;  %v8118_v58 = vld [vmem:[#allocation13 + $0x210] sm:$0xf] }
 0x285   :  { %5354 = vmatpush.bf16.msra.mxu0 %v7927_v36  ;;  %5343 = vmatmul.bf16.vlgmr.msrb.gmra.mxu2 %v10056_v17  ;;  %v8206_v36 = vld [vmem:[#allocation13 + $0x2c0] sm:$0xf]  ;;  %v8055_v62 = vor.u32 %v9153_v52, %v8054_v51  ;;  %v8119_v3 = vor.u32 %v9169_v59, %v8118_v58  ;;  %v9185_v31 = vld [vmem:[#allocation13 + $0x294] sm:$0xf0]  ;;  %v9183_v51 = vld [vmem:[#allocation13 + $0x284] sm:$0xf0] }
 0x286   :  { %5369 = vmatmul.bf16.vlgmr.msrb.gmra.mxu1 %v10054_v25  ;;  %5387 = vmatpush.bf16.msra.mxu2 %v8167_v45  ;;  %v8207_v39 = vor.u32 %v9191_v20, %v8206_v36  ;;  %v8422_v20 = vld [vmem:[#allocation13 + $0x470] sm:$0xf] }
 0x287   :  { %5413 = vmatpush.bf16.msra.mxu1 %v8295_v0  ;;  %5374 = vmatpush.bf16.msra.mxu3 %v8103_v6  ;;  %v9205_v0 = vld [vmem:[#allocation13 + $0x334] sm:$0xf0]  ;;  %v10068_v6 = vpop.f32.mrf.mxu2  ;;  %v4004_v45 = vpop.f32.mrf.mxu1  ;;  %v8342_v59 = vld [vmem:[#allocation13 + $0x3d0] sm:$0xf] }
 0x288   :  { %4209 = vmatmul.bf16.vlgmr.msrb.gmra.mxu3 %v9904_v10  ;;  %v8151_v10 = vor.u32 %v9177_v42, %v8150_v32  ;;  %v8263_v18 = vor.u32 %v9205_v0, %v8262_v63  ;;  %v4259_v32 = vmul.f32 %v4237_v8, %v10040_v57  ;;  %v9187_v63 = vld [vmem:[#allocation13 + $0x2a4] sm:$0xf0]  ;;  %v8238_v0 = vld [vmem:[#allocation13 + $0x300] sm:$0xf] }
 0x289   :  { %5355 = vmatpush.bf16.msra.mxu0 %v7919_v41  ;;  %v8198_v41 = vld [vmem:[#allocation13 + $0x2b0] sm:$0xf]  ;;  %v9167_v45 = vld [vmem:[#allocation13 + $0x204] sm:$0xf0]  ;;  %v8191_v36 = vor.u32 %v9187_v63, %v8190_v13 }
 0x28a   :  { %5388 = vmatpush.bf16.msra.mxu2 %v8159_v2  ;;  %v4274_v2 = vperm.slane %v10043_v15, 6 }
 0x28b   :  { %5414 = vmatpush.bf16.msra.mxu1 %v8287_v26  ;;  %5375 = vmatpush.bf16.msra.mxu3 %v8095_v33  ;;  %v9203_v26 = vld [vmem:[#allocation13 + $0x324] sm:$0xf0]  ;;  %v10075_v42 = vpop.f32.mrf.mxu0  ;;  %v3965_v57 = vpop.f32.mrf.mxu3 }
 0x28c   :  { %5356 = vmatmul.bf16.vlgmr.msra.gmra.mxu0 %v10063_v60  ;;  %v9155_v33 = vld [vmem:[#allocation13 + $0x1a4] sm:$0xf0]  ;;  %v8255_v22 = vor.u32 %v9203_v26, %v8254_v21  ;;  %v9245_v21 = vld [vmem:[#allocation13 + $0x474] sm:$0xf0] }
 0x28d   :  { %5400 = vmatpush.bf16.msrb.mxu0 %v8231_v47  ;;  %v8063_v43 = vor.u32 %v9155_v33, %v8062_v29  ;;  %v9189_v47 = vld [vmem:[#allocation13 + $0x2b4] sm:$0xf0]  ;;  %v8047_v33 = vor.u32 %v9151_v7, %v8046_v4  ;;  %v8334_v4 = vld [vmem:[#allocation13 + $0x3c0] sm:$0xf]  ;;  %v9223_v7 = vld [vmem:[#allocation13 + $0x3c4] sm:$0xf0] }
 0x28e   :  { %5389 = vmatpush.bf16.msra.mxu2 %v8151_v10  ;;  %v4257_v10 = vmul.f32 %v4235_v24, %v9999_v19  ;;  %v8182_v24 = vld [vmem:[#allocation13 + $0x290] sm:$0xf]  ;;  %v9261_v57 = vld [vmem:[#allocation13 + $0x4f4] sm:$0xf0] }
 0x28f   :  { %5415 = vmatpush.bf16.msra.mxu1 %v8279_v48  ;;  %5376 = vmatpush.bf16.msra.mxu3 %v8087_v49  ;;  %v8246_v48 = vld [vmem:[#allocation13 + $0x310] sm:$0xf]  ;;  %v4256_v49 = vmul.f32 %v4234_v27, %v9982_v30  ;;  %v3978_v54 = vpop.f32.mrf.mxu2  ;;  %v4273_v27 = vperm.slane %v10043_v15, 5 }
 0x290   :  { %v8247_v30 = vor.u32 %v9201_v9, %v8246_v48  ;;  %v4294_v8 = vadd.f32 %v4272_v53, %v4257_v10  ;;  %v9243_v48 = vld [vmem:[#allocation13 + $0x464] sm:$0xf0]  ;;  %v8486_v53 = vld [vmem:[#allocation13 + $0x4f0] sm:$0xf] }
 0x291   :  { %5401 = vmatpush.bf16.msrb.mxu0 %v8223_v61  ;;  %v4236_v61 = vperm.slane %v10034_v40, 5  ;;  %v4293_v19 = vadd.f32 %v4271_v44, %v4256_v49  ;;  %v3938_v44 = vadd.f32 %v10032_v56, %v10030_v55  ;;  %v8406_v56 = vld [vmem:[#allocation13 + $0x450] sm:$0xf] }
 0x292   :  { %5390 = vmatpush.bf16.msra.mxu2 %v8143_v1  ;;  %v9199_v1 = vld [vmem:[#allocation13 + $0x304] sm:$0xf0] }
 0x293   :  { %5416 = vmatpush.bf16.msra.mxu1 %v8271_v46  ;;  %5377 = vmatpush.bf16.msra.mxu3 %v8079_v37  ;;  %v8199_v46 = vor.u32 %v9189_v47, %v8198_v41  ;;  %v4296_v37 = vadd.f32 %v4274_v2, %v4259_v32  ;;  %v4258_v26 = vmul.f32 %v4236_v61, %v10011_v38  ;;  %v4030_v29 = vpop.f32.mrf.mxu0  ;;  %v4304_v35 = vmax.f32 %v4293_v19, 0.0  ;;  %v8350_v32 = vld [vmem:[#allocation13 + $0x3e0] sm:$0xf]  ;;  %v9225_v61 = vld [vmem:[#allocation13 + $0x3d4] sm:$0xf0] }
 0x294   :  { %v8111_v2 = vor.u32 %v9167_v45, %v8110_v12  ;;  %v8423_v41 = vor.u32 %v9245_v21, %v8422_v20  ;;  %v8183_v47 = vor.u32 %v9185_v31, %v8182_v24  ;;  %v8414_v38 = vld [vmem:[#allocation13 + $0x460] sm:$0xf]  ;;  %v3951_v13 = vadd.f32 %v10026_v23, %v3938_v44  ;;  %v8326_v20 = vld [vmem:[#allocation13 + $0x3b0] sm:$0xf]  ;;  %v9221_v21 = vld [vmem:[#allocation13 + $0x3b4] sm:$0xf0] }
 0x295   :  { %5402 = vmatpush.bf16.msrb.mxu0 %v8215_v16  ;;  %v8358_v16 = vld [vmem:[#allocation13 + $0x3f0] sm:$0xf]  ;;  %v4295_v9 = vadd.f32 %v4273_v27, %v4258_v26  ;;  %v10088_v52 = vpack.c.bf16 %v4304_v35, %v4304_v35  ;;  %v8415_v58 = vor.u32 %v9243_v48, %v8414_v38  ;;  %v8343_v63 = vor.u32 %v9225_v61, %v8342_v59  ;;  %v8398_v12 = vld [vmem:[#allocation13 + $0x440] sm:$0xf]  ;;  %v9237_v27 = vld [vmem:[#allocation13 + $0x434] sm:$0xf0] }
 0x296   :  { %5391 = vmatpush.bf16.msra.mxu2 %v8135_v28  ;;  %v4307_v28 = vmax.f32 %v4296_v37, 0.0  ;;  %v3964_v19 = vadd.f32 %v10066_v5, %v3951_v13  ;;  %v8390_v26 = vld [vmem:[#allocation13 + $0x430] sm:$0xf]  ;;  %v8327_v31 = vor.u32 %v9221_v21, %v8326_v20  ;;  %v8462_v35 = vld [vmem:[#allocation13 + $0x4c0] sm:$0xf] }
 0x297   :  { %5417 = vmatpush.bf16.msra.mxu1 %v8263_v18  ;;  %5378 = vmatpush.bf16.msra.mxu3 %v8071_v11  ;;  %v9229_v18 = vld [vmem:[#allocation13 + $0x3f4] sm:$0xf0]  ;;  %v8239_v11 = vor.u32 %v9199_v1, %v8238_v0  ;;  %v8478_v0 = vld [vmem:[#allocation13 + $0x4e0] sm:$0xf]  ;;  %v9259_v1 = vld [vmem:[#allocation13 + $0x4e4] sm:$0xf0] }
 0x298   :  { %v10084_v49 = vpack.c.bf16 %v4307_v28, %v4307_v28  ;;  %v8479_v23 = vor.u32 %v9259_v1, %v8478_v0  ;;  %v9235_v38 = vld [vmem:[#allocation13 + $0x424] sm:$0xf0]  ;;  %v8454_v44 = vld [vmem:[#allocation13 + $0x4b0] sm:$0xf]  ;;  %v9233_v59 = vld [vmem:[#allocation13 + $0x414] sm:$0xf0] }
 0x299   :  { %5403 = vmatpush.bf16.msrb.mxu0 %v8207_v39  ;;  %v8359_v39 = vor.u32 %v9229_v18, %v8358_v16  ;;  %v8335_v16 = vor.u32 %v9223_v7, %v8334_v4  ;;  %v8470_v18 = vld [vmem:[#allocation13 + $0x4d0] sm:$0xf]  ;;  %v9251_v13 = vld [vmem:[#allocation13 + $0x4a4] sm:$0xf0]  ;;  %v8366_v1 = vld [vmem:[#allocation13 + $0x400] sm:$0xf] }
 0x29a   :  { %5392 = vmatpush.bf16.msra.mxu2 %v8127_v50  ;;  %v8174_v50 = vld [vmem:[#allocation13 + $0x280] sm:$0xf]  ;;  %v9215_v0 = vld [vmem:[#allocation13 + $0x384] sm:$0xf0]  ;;  %v9116_v4 = vld [vmem:[#allocation13 + $0x74] sm:$0xf] }
 0x29b   :  { %5418 = vmatpush.bf16.msra.mxu1 %v8255_v22  ;;  %5379 = vmatpush.bf16.msra.mxu3 %v8063_v43  ;;  %v4305_v22 = vmax.f32 %v4294_v8, 0.0  ;;  %v9227_v43 = vld [vmem:[#allocation13 + $0x3e4] sm:$0xf0]  ;;  %v8175_v55 = vor.u32 %v9183_v51, %v8174_v50  ;;  %v10096_v37 = vpop.f32.mrf.mxu1  ;;  %v9253_v50 = vld [vmem:[#allocation13 + $0x4b4] sm:$0xf0] }
 0x29c   :  { %v8351_v10 = vor.u32 %v9227_v43, %v8350_v32  ;;  %v9239_v8 = vld [vmem:[#allocation13 + $0x444] sm:$0xf0]  ;;  %v10110_v7 = vld [vmem:[#allocation10 + $0x8] sm:$0x7]  ;;  %v10112_v20 = vld [vmem:[#allocation11 + $0x8] sm:$0x7] }
 0x29d   :  { %5404 = vmatpush.bf16.msrb.mxu0 %v8199_v46  ;;  %v10090_v54 = vpack.c.bf16 %v4305_v22, %v4305_v22  ;;  %v9241_v46 = vld [vmem:[#allocation13 + $0x454] sm:$0xf0]  ;;  %v8399_v5 = vor.u32 %v9239_v8, %v8398_v12  ;;  %v8391_v22 = vor.u32 %v9237_v27, %v8390_v26  ;;  %v9219_v32 = vld [vmem:[#allocation13 + $0x3a4] sm:$0xf0]  ;;  %v9148_v12 = vld [vmem:[#allocation13 + $0x174] sm:$0xf] }
 0x29e   :  { %5393 = vmatpush.bf16.msra.mxu2 %v8119_v3  ;;  %v8407_v3 = vor.u32 %v9241_v46, %v8406_v56  ;;  %v8455_v56 = vor.u32 %v9253_v50, %v8454_v44  ;;  %v8040_v8 = vld [vmem:[#allocation13 + $0x178] sm:$0xf0]  ;;  %v9112_v44 = vld [vmem:[#allocation13 + $0x54] sm:$0xf] }
 0x29f   :  { %5419 = vmatpush.bf16.msra.mxu1 %v8247_v30  ;;  %5380 = vmatpush.bf16.msra.mxu3 %v8055_v62  ;;  %v4306_v30 = vmax.f32 %v4295_v9, 0.0  ;;  %v8487_v62 = vor.u32 %v9261_v57, %v8486_v53  ;;  %v8310_v53 = vld [vmem:[#allocation13 + $0x390] sm:$0xf]  ;;  %v9217_v57 = vld [vmem:[#allocation13 + $0x394] sm:$0xf0] }
 0x2a0   :  { %v4041_v29 = vpop.f32.mrf.mxu2  ;;  %v8311_v46 = vor.u32 %v9217_v57, %v8310_v53  ;;  %v7896_v50 = vld [vmem:[#allocation13 + $0x58] sm:$0xf0] }
 0x2a1   :  { %5405 = vmatpush.bf16.msrb.mxu0 %v8191_v36  ;;  %v10099_v45 = vpack.c.bf16 %v4306_v30, %v4306_v30  ;;  %v9257_v36 = vld [vmem:[#allocation13 + $0x4d4] sm:$0xf0]  ;;  %v8446_v30 = vld [vmem:[#allocation13 + $0x4a0] sm:$0xf] }
 0x2a2   :  { %5394 = vmatpush.bf16.msra.mxu2 %v8111_v2  ;;  %v9255_v2 = vld [vmem:[#allocation13 + $0x4c4] sm:$0xf0] }
 0x2a3   :  { %5420 = vmatpush.bf16.msra.mxu1 %v8239_v11  ;;  %5381 = vmatpush.bf16.msra.mxu3 %v8047_v33  ;;  %v3977_v11 = vadd.f32 %v10068_v6, %v3964_v19  ;;  %v4015_v28 = vpop.f32.mrf.mxu3  ;;  %v8471_v33 = vor.u32 %v9257_v36, %v8470_v18  ;;  %v4056_v24 = vpop.f32.mrf.mxu1  ;;  %v4238_v6 = vperm.slane %v10034_v40, 7  ;;  %v8463_v48 = vor.u32 %v9255_v2, %v8462_v35  ;;  %v8438_v18 = vld [vmem:[#allocation13 + $0x490] sm:$0xf]  ;;  %v9249_v36 = vld [vmem:[#allocation13 + $0x494] sm:$0xf0] }
 0x2a4   :  { %v4016_v43 = vadd.f32 %v4015_v28, %v10060_v34  ;;  %v8374_v34 = vld [vmem:[#allocation13 + $0x410] sm:$0xf]  ;;  %v4239_v28 = vperm.slane %v10110_v7, 0  ;;  %v7904_v24 = vld [vmem:[#allocation13 + $0x68] sm:$0xf0] }
 0x2a5   :  { %5406 = vmatpush.bf16.msrb.mxu0 %v8183_v47  ;;  %5395 = vmatmul.bf16.vlgmr.msra.gmra.mxu2 %v10090_v54  ;;  %v8382_v47 = vld [vmem:[#allocation13 + $0x420] sm:$0xf]  ;;  %v9146_v35 = vld [vmem:[#allocation13 + $0x164] sm:$0xf]  ;;  %v8032_v2 = vld [vmem:[#allocation13 + $0x168] sm:$0xf0] }
 0x2a6   :  { %5421 = vmatmul.bf16.vlgmr.msra.gmra.mxu1 %v10084_v49  ;;  %5439 = vmatpush.bf16.msrb.mxu2 %v8423_v41  ;;  %v8318_v41 = vld [vmem:[#allocation13 + $0x3a0] sm:$0xf]  ;;  %v8383_v40 = vor.u32 %v9235_v38, %v8382_v47  ;;  %v9164_v47 = vld [vmem:[#allocation13 + $0x1f4] sm:$0xf]  ;;  %v8104_v38 = vld [vmem:[#allocation13 + $0x1f8] sm:$0xf0] }
 0x2a7   :  { %5426 = vmatpush.bf16.msrb.mxu3 %v8359_v39  ;;  %v3990_v39 = vadd.f32 %v10052_v14, %v3977_v11  ;;  %v8319_v9 = vor.u32 %v9219_v32, %v8318_v41  ;;  %v8430_v41 = vld [vmem:[#allocation13 + $0x480] sm:$0xf]  ;;  %v9247_v32 = vld [vmem:[#allocation13 + $0x484] sm:$0xf0]  ;;  %v8107_v57 = vor.u32 %v9164_v47, %v8104_v38 }
 0x2a8   :  { %5382 = vmatmul.bf16.vlgmr.msra.gmra.mxu3 %v10088_v52 }
 0x2a9   :  { %5407 = vmatpush.bf16.msrb.mxu0 %v8175_v55  ;;  %v4260_v51 = vmul.f32 %v4238_v6, %v3990_v39  ;;  %v10107_v14 = vpop.f32.mrf.mxu0  ;;  %v4043_v55 = vpop.f32.mrf.mxu2  ;;  %v8439_v39 = vor.u32 %v9249_v36, %v8438_v18  ;;  %v9158_v18 = vld [vmem:[#allocation13 + $0x1c4] sm:$0xf] }
 0x2aa   :  { %5440 = vmatpush.bf16.msrb.mxu2 %v8415_v58  ;;  %v4029_v58 = vadd.f32 %v10075_v42, %v4016_v43  ;;  %v7912_v42 = vld [vmem:[#allocation13 + $0x78] sm:$0xf0] }
 0x2ab   :  { %5427 = vmatpush.bf16.msrb.mxu3 %v8351_v10  ;;  %v4275_v10 = vperm.slane %v10043_v15, 7  ;;  %v4017_v61 = vpop.f32.mrf.mxu3  ;;  %v8375_v15 = vor.u32 %v9233_v59, %v8374_v34  ;;  %v7915_v26 = vor.u32 %v9116_v4, %v7912_v42  ;;  %v7899_v34 = vor.u32 %v9112_v44, %v7896_v50  ;;  %v9162_v59 = vld [vmem:[#allocation13 + $0x1e4] sm:$0xf]  ;;  %v9108_v42 = vld [vmem:[#allocation13 + $0x34] sm:$0xf] }
 0x2ac   :  { %5408 = vmatmul.bf16.vlgmr.msrb.gmra.mxu0 %v10099_v45  ;;  %v4042_v19 = vadd.f32 %v4041_v29, %v4029_v58  ;;  %v8043_v29 = vor.u32 %v9148_v12, %v8040_v8  ;;  %v8096_v61 = vld [vmem:[#allocation13 + $0x1e8] sm:$0xf0]  ;;  %v7880_v12 = vld [vmem:[#allocation13 + $0x38] sm:$0xf0]  ;;  %v9140_v8 = vld [vmem:[#allocation13 + $0x134] sm:$0xf] }
 0x2ad   :  { %5452 = vmatpush.bf16.msra.mxu0 %v8487_v62  ;;  %v4297_v62 = vadd.f32 %v4275_v10, %v4260_v51  ;;  %v9144_v51 = vld [vmem:[#allocation13 + $0x154] sm:$0xf]  ;;  %v8024_v10 = vld [vmem:[#allocation13 + $0x158] sm:$0xf0] }
 0x2ae   :  { %5441 = vmatpush.bf16.msrb.mxu2 %v8407_v3  ;;  %v9231_v3 = vld [vmem:[#allocation13 + $0x404] sm:$0xf0]  ;;  %v4055_v27 = vadd.f32 %v10096_v37, %v4042_v19  ;;  %v9160_v19 = vld [vmem:[#allocation13 + $0x1d4] sm:$0xf]  ;;  %v7864_v44 = vld [vmem:[#allocation13 + $0x18] sm:$0xf0] }
 0x2af   :  { %5428 = vmatpush.bf16.msrb.mxu3 %v8343_v63  ;;  %v8302_v63 = vld [vmem:[#allocation13 + $0x380] sm:$0xf]  ;;  %v4308_v11 = vmax.f32 %v4297_v62, 0.0  ;;  %v8367_v21 = vor.u32 %v9231_v3, %v8366_v1  ;;  %v9142_v62 = vld [vmem:[#allocation13 + $0x144] sm:$0xf] }
 0x2b0   :  { %v8088_v3 = vld [vmem:[#allocation13 + $0x1d8] sm:$0xf0] }
 0x2b1   :  { %5453 = vmatpush.bf16.msra.mxu0 %v8479_v23  ;;  %v8447_v23 = vor.u32 %v9251_v13, %v8446_v30  ;;  %v10117_v43 = vpack.c.bf16 %v4308_v11, %v4308_v11  ;;  %v7888_v30 = vld [vmem:[#allocation13 + $0x48] sm:$0xf0] }
 0x2b2   :  { %5442 = vmatpush.bf16.msrb.mxu2 %v8399_v5  ;;  %v4082_v5 = vpop.f32.mrf.mxu0 }
 0x2b3   :  { %5429 = vmatpush.bf16.msrb.mxu3 %v8335_v16  ;;  %v8303_v16 = vor.u32 %v9215_v0, %v8302_v63  ;;  %v8099_v0 = vor.u32 %v9162_v59, %v8096_v61  ;;  %v7883_v5 = vor.u32 %v9108_v42, %v7880_v12  ;;  %v8064_v61 = vld [vmem:[#allocation13 + $0x1a8] sm:$0xf0]  ;;  %v9152_v12 = vld [vmem:[#allocation13 + $0x194] sm:$0xf] }
 0x2b5   :  { %5454 = vmatpush.bf16.msra.mxu0 %v8471_v33  ;;  %v9114_v33 = vld [vmem:[#allocation13 + $0x64] sm:$0xf] }
 0x2b6   :  { %5443 = vmatpush.bf16.msrb.mxu2 %v8391_v22  ;;  %v4276_v22 = vperm.slane %v10112_v20, 0  ;;  %v7907_v37 = vor.u32 %v9114_v33, %v7904_v24  ;;  %v7872_v33 = vld [vmem:[#allocation13 + $0x28] sm:$0xf0] }
 0x2b7   :  { %5430 = vmatpush.bf16.msrb.mxu3 %v8327_v31  ;;  %v4067_v31 = vpop.f32.mrf.mxu3 }
 0x2b8   :  { %v4068_v6 = vadd.f32 %v4067_v31, %v4055_v27  ;;  %v9269_v27 = vld [vmem:[#allocation13 + $0x534] sm:$0xf0]  ;;  %v9138_v31 = vld [vmem:[#allocation13 + $0x124] sm:$0xf] }
 0x2b9   :  { %5455 = vmatpush.bf16.msra.mxu0 %v8463_v48 }
 0x2ba   :  { %5444 = vmatpush.bf16.msrb.mxu2 %v8383_v40  ;;  %v4261_v48 = vmul.f32 %v4239_v28, %v4068_v6  ;;  %v8431_v40 = vor.u32 %v9247_v32, %v8430_v41  ;;  %v8072_v41 = vld [vmem:[#allocation13 + $0x1b8] sm:$0xf0]  ;;  %v8510_v32 = vld [vmem:[#allocation13 + $0x520] sm:$0xf] }
 0x2bb   :  { %5431 = vmatpush.bf16.msrb.mxu3 %v8319_v9  ;;  %v8035_v9 = vor.u32 %v9146_v35, %v8032_v2  ;;  %v10120_v58 = vpop.f32.mrf.mxu1  ;;  %v8000_v35 = vld [vmem:[#allocation13 + $0x128] sm:$0xf0] }
 0x2bc   :  { %v4298_v53 = vadd.f32 %v4276_v22, %v4261_v48  ;;  %v8003_v48 = vor.u32 %v9138_v31, %v8000_v35  ;;  %v4240_v31 = vperm.slane %v10110_v7, 1  ;;  %v9210_v35 = vld [vmem:[#allocation13 + $0x364] sm:$0xf] }
 0x2bd   :  { %5456 = vmatpush.bf16.msra.mxu0 %v8455_v56  ;;  %v8027_v56 = vor.u32 %v9144_v51, %v8024_v10  ;;  %v9136_v51 = vld [vmem:[#allocation13 + $0x114] sm:$0xf]  ;;  %v7992_v10 = vld [vmem:[#allocation13 + $0x118] sm:$0xf0] }
 0x2be   :  { %5445 = vmatpush.bf16.msrb.mxu2 %v8375_v15  ;;  %v4309_v55 = vmax.f32 %v4298_v53, 0.0  ;;  %v8016_v15 = vld [vmem:[#allocation13 + $0x148] sm:$0xf0] }
 0x2bf   :  { %5432 = vmatpush.bf16.msrb.mxu3 %v8311_v46  ;;  %v9110_v46 = vld [vmem:[#allocation13 + $0x44] sm:$0xf]  ;;  %v4069_v13 = vpop.f32.mrf.mxu3  ;;  %v8019_v4 = vor.u32 %v9142_v62, %v8016_v15  ;;  %v7984_v15 = vld [vmem:[#allocation13 + $0x108] sm:$0xf0] }
 0x2c0   :  { %v10122_v63 = vpack.c.bf16 %v4309_v55, %v4309_v55  ;;  %v7891_v1 = vor.u32 %v9110_v46, %v7888_v30  ;;  %v4093_v36 = vpop.f32.mrf.mxu2  ;;  %v8502_v55 = vld [vmem:[#allocation13 + $0x510] sm:$0xf]  ;;  %v9102_v46 = vld [vmem:[#allocation13 + $0x4] sm:$0xf]  ;;  %v7856_v30 = vld [vmem:[#allocation13 + $0x8] sm:$0xf0] }
 0x2c1   :  { %5457 = vmatpush.bf16.msra.mxu0 %v8447_v23  ;;  %v8008_v23 = vld [vmem:[#allocation13 + $0x138] sm:$0xf0]  ;;  %v4094_v47 = vadd.f32 %v4093_v36, %v10107_v14  ;;  %v7995_v14 = vor.u32 %v9136_v51, %v7992_v10  ;;  %v9134_v13 = vld [vmem:[#allocation13 + $0x104] sm:$0xf]  ;;  %v9263_v36 = vld [vmem:[#allocation13 + $0x504] sm:$0xf0] }
 0x2c2   :  { %5446 = vmatpush.bf16.msrb.mxu2 %v8367_v21  ;;  %v8080_v21 = vld [vmem:[#allocation13 + $0x1c8] sm:$0xf0]  ;;  %v8011_v28 = vor.u32 %v9140_v8, %v8008_v23  ;;  %v7859_v23 = vor.u32 %v9102_v46, %v7856_v30  ;;  %v8152_v51 = vld [vmem:[#allocation13 + $0x258] sm:$0xf0] }
 0x2c3   :  { %5433 = vmatpush.bf16.msrb.mxu3 %v8303_v16  ;;  %v8091_v16 = vor.u32 %v9160_v19, %v8088_v3  ;;  %v4121_v11 = vpop.f32.mrf.mxu1  ;;  %v8083_v2 = vor.u32 %v9158_v18, %v8080_v21  ;;  %v9212_v3 = vld [vmem:[#allocation13 + $0x374] sm:$0xf]  ;;  %v8494_v18 = vld [vmem:[#allocation13 + $0x500] sm:$0xf]  ;;  %v7960_v46 = vld [vmem:[#allocation13 + $0xd8] sm:$0xf0] }
 0x2c5   :  { %5458 = vmatpush.bf16.msra.mxu0 %v8439_v39  ;;  %5447 = vmatmul.bf16.vlgmr.msrb.gmra.mxu2 %v10122_v63  ;;  %v9156_v39 = vld [vmem:[#allocation13 + $0x1b4] sm:$0xf] }
 0x2c6   :  { %5504 = vmatpush.bf16.msra.mxu2 %v8043_v29  ;;  %5434 = vmatmul.bf16.vlgmr.msrb.gmra.mxu3 %v10117_v43  ;;  %v9106_v29 = vld [vmem:[#allocation13 + $0x24] sm:$0xf]  ;;  %v8075_v53 = vor.u32 %v9156_v39, %v8072_v41 }
 0x2c7   :  { %5478 = vmatpush.bf16.msra.mxu3 %v7915_v26  ;;  %v8518_v26 = vld [vmem:[#allocation13 + $0x530] sm:$0xf]  ;;  %v7875_v22 = vor.u32 %v9106_v29, %v7872_v33  ;;  %v8160_v29 = vld [vmem:[#allocation13 + $0x268] sm:$0xf0]  ;;  %v7976_v33 = vld [vmem:[#allocation13 + $0xf8] sm:$0xf0] }
 0x2c8   :  { %v8519_v24 = vor.u32 %v9269_v27, %v8518_v26  ;;  %v8495_v26 = vor.u32 %v9263_v36, %v8494_v18  ;;  %v9132_v27 = vld [vmem:[#allocation13 + $0xf4] sm:$0xf]  ;;  %v9150_v41 = vld [vmem:[#allocation13 + $0x184] sm:$0xf] }
 0x2c9   :  { %5459 = vmatpush.bf16.msra.mxu0 %v8431_v40  ;;  %v4106_v6 = vpop.f32.mrf.mxu3  ;;  %v4132_v38 = vpop.f32.mrf.mxu0  ;;  %v9172_v36 = vld [vmem:[#allocation13 + $0x234] sm:$0xf] }
 0x2ca   :  { %5505 = vmatpush.bf16.msra.mxu2 %v8035_v9  ;;  %5469 = vmatpush.bf16.msrb.mxu1 %v8519_v24  ;;  %v9104_v9 = vld [vmem:[#allocation13 + $0x14] sm:$0xf]  ;;  %v4107_v40 = vadd.f32 %v4106_v6, %v4094_v47  ;;  %v7979_v6 = vor.u32 %v9132_v27, %v7976_v33  ;;  %v4277_v47 = vperm.slane %v10112_v20, 1  ;;  %v9170_v33 = vld [vmem:[#allocation13 + $0x224] sm:$0xf] }
 0x2cb   :  { %5479 = vmatpush.bf16.msra.mxu3 %v7907_v37  ;;  %v9267_v37 = vld [vmem:[#allocation13 + $0x524] sm:$0xf0]  ;;  %v7867_v59 = vor.u32 %v9104_v9, %v7864_v44  ;;  %v9130_v9 = vld [vmem:[#allocation13 + $0xe4] sm:$0xf] }
 0x2cc   :  { %v8511_v50 = vor.u32 %v9267_v37, %v8510_v32  ;;  %v4120_v19 = vadd.f32 %v10120_v58, %v4107_v40  ;;  %v9178_v58 = vld [vmem:[#allocation13 + $0x264] sm:$0xf]  ;;  %v8048_v32 = vld [vmem:[#allocation13 + $0x188] sm:$0xf0] }
 0x2cd   :  { %5517 = vmatpush.bf16.msrb.mxu0 %v8107_v57  ;;  %v9154_v57 = vld [vmem:[#allocation13 + $0x1a4] sm:$0xf] }
 0x2ce   :  { %5506 = vmatpush.bf16.msra.mxu2 %v8027_v56  ;;  %5470 = vmatpush.bf16.msrb.mxu1 %v8511_v50  ;;  %v9265_v56 = vld [vmem:[#allocation13 + $0x514] sm:$0xf0]  ;;  %v8067_v42 = vor.u32 %v9154_v57, %v8064_v61  ;;  %v4133_v24 = vadd.f32 %v4132_v38, %v4120_v19  ;;  %v7968_v38 = vld [vmem:[#allocation13 + $0xe8] sm:$0xf0]  ;;  %v9176_v50 = vld [vmem:[#allocation13 + $0x254] sm:$0xf] }
 0x2cf   :  { %5480 = vmatpush.bf16.msra.mxu3 %v7899_v34  ;;  %v4095_v34 = vpop.f32.mrf.mxu2  ;;  %v8503_v62 = vor.u32 %v9265_v56, %v8502_v55  ;;  %v7971_v10 = vor.u32 %v9130_v9, %v7968_v38  ;;  %v8280_v57 = vld [vmem:[#allocation13 + $0x358] sm:$0xf0]  ;;  %v8155_v55 = vor.u32 %v9176_v50, %v8152_v51  ;;  %v8272_v19 = vld [vmem:[#allocation13 + $0x348] sm:$0xf0]  ;;  %v9168_v38 = vld [vmem:[#allocation13 + $0x214] sm:$0xf] }
 0x2d0   :  { %v8051_v34 = vor.u32 %v9150_v41, %v8048_v32  ;;  %v8360_v56 = vld [vmem:[#allocation13 + $0x3f8] sm:$0xf0]  ;;  %v8336_v9 = vld [vmem:[#allocation13 + $0x3c8] sm:$0xf0] }
 0x2d1   :  { %5518 = vmatpush.bf16.msrb.mxu0 %v8099_v0  ;;  %v9180_v0 = vld [vmem:[#allocation13 + $0x274] sm:$0xf]  ;;  %v4108_v8 = vpop.f32.mrf.mxu3  ;;  %v4134_v11 = vpop.f32.mrf.mxu0 }
 0x2d2   :  { %5507 = vmatpush.bf16.msra.mxu2 %v8019_v4  ;;  %v8296_v4 = vld [vmem:[#allocation13 + $0x378] sm:$0xf0]  ;;  %5471 = vmatpush.bf16.msrb.mxu1 %v8503_v62  ;;  %v9174_v62 = vld [vmem:[#allocation13 + $0x244] sm:$0xf]  ;;  %v8352_v8 = vld [vmem:[#allocation13 + $0x3e8] sm:$0xf0] }
 0x2d3   :  { %5481 = vmatpush.bf16.msra.mxu3 %v7891_v1  ;;  %v8168_v1 = vld [vmem:[#allocation13 + $0x278] sm:$0xf0] }
 0x2d4   :  { %v8171_v21 = vor.u32 %v9180_v0, %v8168_v1  ;;  %v9206_v1 = vld [vmem:[#allocation13 + $0x344] sm:$0xf]  ;;  %v8136_v11 = vld [vmem:[#allocation13 + $0x238] sm:$0xf0] }
 0x2d5   :  { %5519 = vmatpush.bf16.msrb.mxu0 %v8091_v16  ;;  %v8056_v16 = vld [vmem:[#allocation13 + $0x198] sm:$0xf0]  ;;  %v8275_v18 = vor.u32 %v9206_v1, %v8272_v19  ;;  %v8240_v19 = vld [vmem:[#allocation13 + $0x308] sm:$0xf0] }
 0x2d6   :  { %5508 = vmatpush.bf16.msra.mxu2 %v8011_v28  ;;  %v8299_v28 = vor.u32 %v9212_v3, %v8296_v4  ;;  %v8059_v39 = vor.u32 %v9152_v12, %v8056_v16  ;;  %5472 = vmatpush.bf16.msrb.mxu1 %v8495_v26  ;;  %v9226_v4 = vld [vmem:[#allocation13 + $0x3e4] sm:$0xf]  ;;  %v7952_v16 = vld [vmem:[#allocation13 + $0xc8] sm:$0xf0]  ;;  %v8264_v26 = vld [vmem:[#allocation13 + $0x338] sm:$0xf0] }
 0x2d7   :  { %5482 = vmatpush.bf16.msra.mxu3 %v7883_v5  ;;  %v7987_v5 = vor.u32 %v9134_v13, %v7984_v15  ;;  %v8144_v15 = vld [vmem:[#allocation13 + $0x248] sm:$0xf0]  ;;  %v8355_v27 = vor.u32 %v9226_v4, %v8352_v8  ;;  %v7928_v1 = vld [vmem:[#allocation13 + $0x98] sm:$0xf0]  ;;  %v9268_v8 = vld [vmem:[#allocation13 + $0x534] sm:$0xf] }
 0x2d8   :  { %v8147_v12 = vor.u32 %v9174_v62, %v8144_v15 }
 0x2d9   :  { %5520 = vmatpush.bf16.msrb.mxu0 %v8083_v2  ;;  %v8288_v2 = vld [vmem:[#allocation13 + $0x368] sm:$0xf0] }
 0x2da   :  { %5509 = vmatpush.bf16.msra.mxu2 %v8003_v48  ;;  %v8163_v48 = vor.u32 %v9178_v58, %v8160_v29  ;;  %v8291_v44 = vor.u32 %v9210_v35, %v8288_v2  ;;  %5491 = vmatpush.bf16.msra.mxu1 %v7979_v6  ;;  %v9224_v58 = vld [vmem:[#allocation13 + $0x3d4] sm:$0xf]  ;;  %v8344_v29 = vld [vmem:[#allocation13 + $0x3d8] sm:$0xf0]  ;;  %v8128_v35 = vld [vmem:[#allocation13 + $0x228] sm:$0xf0] }
 0x2db   :  { %5483 = vmatpush.bf16.msra.mxu3 %v7875_v22  ;;  %v4145_v22 = vpop.f32.mrf.mxu2  ;;  %v10131_v30 = vpop.f32.mrf.mxu1  ;;  %v9124_v2 = vld [vmem:[#allocation13 + $0xb4] sm:$0xf]  ;;  %v9202_v6 = vld [vmem:[#allocation13 + $0x324] sm:$0xf]  ;;  %v8347_v32 = vor.u32 %v9224_v58, %v8344_v29  ;;  %v7920_v58 = vld [vmem:[#allocation13 + $0x88] sm:$0xf0] }
 0x2dc   :  { %v4146_v37 = vadd.f32 %v4145_v22, %v4133_v24  ;;  %v8256_v22 = vld [vmem:[#allocation13 + $0x328] sm:$0xf0]  ;;  %v9242_v29 = vld [vmem:[#allocation13 + $0x464] sm:$0xf] }
 0x2dd   :  { %5521 = vmatpush.bf16.msrb.mxu0 %v8075_v53  ;;  %v9208_v53 = vld [vmem:[#allocation13 + $0x354] sm:$0xf]  ;;  %v8259_v51 = vor.u32 %v9202_v6, %v8256_v22  ;;  %v8312_v22 = vld [vmem:[#allocation13 + $0x398] sm:$0xf0] }
 0x2de   :  { %5510 = vmatpush.bf16.msra.mxu2 %v7995_v14  ;;  %v4262_v40 = vmul.f32 %v4240_v31, %v4146_v37  ;;  %v9128_v14 = vld [vmem:[#allocation13 + $0xd4] sm:$0xf]  ;;  %v8283_v13 = vor.u32 %v9208_v53, %v8280_v57  ;;  %5492 = vmatpush.bf16.msra.mxu1 %v7971_v10  ;;  %v8120_v10 = vld [vmem:[#allocation13 + $0x218] sm:$0xf0]  ;;  %v7936_v53 = vld [vmem:[#allocation13 + $0xa8] sm:$0xf0] }
 0x2df   :  { %5484 = vmatpush.bf16.msra.mxu3 %v7867_v59  ;;  %v9228_v59 = vld [vmem:[#allocation13 + $0x3f4] sm:$0xf] }
 0x2e0   :  { %v4299_v61 = vadd.f32 %v4277_v47, %v4262_v40  ;;  %v8363_v3 = vor.u32 %v9228_v59, %v8360_v56  ;;  %v8131_v47 = vor.u32 %v9170_v33, %v8128_v35  ;;  %v9122_v40 = vld [vmem:[#allocation13 + $0xa4] sm:$0xf]  ;;  %v9200_v57 = vld [vmem:[#allocation13 + $0x314] sm:$0xf]  ;;  %v8123_v56 = vor.u32 %v9168_v38, %v8120_v10  ;;  %v8416_v33 = vld [vmem:[#allocation13 + $0x468] sm:$0xf0] }
 0x2e1   :  { %5522 = vmatpush.bf16.msrb.mxu0 %v8067_v42  ;;  %v7939_v59 = vor.u32 %v9122_v40, %v7936_v53  ;;  %v9216_v6 = vld [vmem:[#allocation13 + $0x394] sm:$0xf]  ;;  %v9214_v10 = vld [vmem:[#allocation13 + $0x384] sm:$0xf]  ;;  %v8304_v40 = vld [vmem:[#allocation13 + $0x388] sm:$0xf0] }
 0x2e2   :  { %5511 = vmatpush.bf16.msra.mxu2 %v7987_v5  ;;  %v4310_v0 = vmax.f32 %v4299_v61, 0.0  ;;  %v9264_v38 = vld [vmem:[#allocation13 + $0x514] sm:$0xf] }
 0x2e3   :  { %5485 = vmatpush.bf16.msra.mxu3 %v7859_v23  ;;  %v9126_v23 = vld [vmem:[#allocation13 + $0xc4] sm:$0xf]  ;;  %v4173_v24 = vpop.f32.mrf.mxu1 }
 0x2e4   :  { %v10133_v42 = vpack.c.bf16 %v4310_v0, %v4310_v0  ;;  %v7955_v5 = vor.u32 %v9126_v23, %v7952_v16  ;;  %v9120_v0 = vld [vmem:[#allocation13 + $0x94] sm:$0xf]  ;;  %v8520_v23 = vld [vmem:[#allocation13 + $0x538] sm:$0xf0] }
 0x2e5   :  { %5523 = vmatpush.bf16.msrb.mxu0 %v8059_v39  ;;  %5512 = vmatmul.bf16.vlgmr.msra.gmra.mxu2 %v10054_v25  ;;  %v4147_v25 = vpop.f32.mrf.mxu2  ;;  %v7944_v39 = vld [vmem:[#allocation13 + $0xb8] sm:$0xf0]  ;;  %v7931_v4 = vor.u32 %v9120_v0, %v7928_v1  ;;  %v8523_v24 = vor.u32 %v9268_v8, %v8520_v23  ;;  %v9234_v1 = vld [vmem:[#allocation13 + $0x424] sm:$0xf]  ;;  %v4241_v8 = vperm.slane %v10110_v7, 2 }
 0x2e6   :  { %5556 = vmatpush.bf16.msrb.mxu2 %v8299_v28  ;;  %5486 = vmatmul.bf16.vlgmr.msra.gmra.mxu3 %v10056_v17  ;;  %v7963_v17 = vor.u32 %v9128_v14, %v7960_v46  ;;  %v8139_v28 = vor.u32 %v9172_v36, %v8136_v11  ;;  %v7947_v41 = vor.u32 %v9124_v2, %v7944_v39  ;;  %v8328_v14 = vld [vmem:[#allocation13 + $0x3b8] sm:$0xf0]  ;;  %v9166_v46 = vld [vmem:[#allocation13 + $0x204] sm:$0xf]  ;;  %v9244_v25 = vld [vmem:[#allocation13 + $0x474] sm:$0xf] }
 0x2e7   :  { %5530 = vmatpush.bf16.msrb.mxu3 %v8171_v21  ;;  %5460 = vmatmul.bf16.vlgmr.msra.gmra.mxu0 %v10133_v42  ;;  %v9204_v21 = vld [vmem:[#allocation13 + $0x334] sm:$0xf]  ;;  %v9218_v36 = vld [vmem:[#allocation13 + $0x3a4] sm:$0xf]  ;;  %v8320_v11 = vld [vmem:[#allocation13 + $0x3a8] sm:$0xf0] }
 0x2e8   :  { %5493 = vmatpush.bf16.msra.mxu1 %v7963_v17  ;;  %v8267_v31 = vor.u32 %v9204_v21, %v8264_v26  ;;  %v9198_v17 = vld [vmem:[#allocation13 + $0x304] sm:$0xf]  ;;  %v8323_v35 = vor.u32 %v9218_v36, %v8320_v11  ;;  %v8512_v39 = vld [vmem:[#allocation13 + $0x528] sm:$0xf0] }
 0x2e9   :  { %5524 = vmatpush.bf16.msrb.mxu0 %v8051_v34  ;;  %v10136_v37 = vpop.f32.mrf.mxu3  ;;  %v10140_v50 = vpop.f32.mrf.mxu0  ;;  %v8248_v34 = vld [vmem:[#allocation13 + $0x318] sm:$0xf0]  ;;  %v8243_v26 = vor.u32 %v9198_v17, %v8240_v19  ;;  %v9266_v2 = vld [vmem:[#allocation13 + $0x524] sm:$0xf]  ;;  %v8384_v19 = vld [vmem:[#allocation13 + $0x428] sm:$0xf0] }
 0x2ea   :  { %5557 = vmatpush.bf16.msrb.mxu2 %v8291_v44  ;;  %v8251_v15 = vor.u32 %v9200_v57, %v8248_v34  ;;  %v9238_v57 = vld [vmem:[#allocation13 + $0x444] sm:$0xf]  ;;  %v8400_v34 = vld [vmem:[#allocation13 + $0x448] sm:$0xf0] }
 0x2eb   :  { %5531 = vmatpush.bf16.msrb.mxu3 %v8163_v48  ;;  %v9222_v48 = vld [vmem:[#allocation13 + $0x3c4] sm:$0xf]  ;;  %v10142_v62 = vpop.f32.mrf.mxu1 }
 0x2ec   :  { %5494 = vmatpush.bf16.msra.mxu1 %v7955_v5  ;;  %v8339_v61 = vor.u32 %v9222_v48, %v8336_v9  ;;  %v8408_v48 = vld [vmem:[#allocation13 + $0x458] sm:$0xf0]  ;;  %v8515_v9 = vor.u32 %v9266_v2, %v8512_v39  ;;  %v8224_v2 = vld [vmem:[#allocation13 + $0x2e8] sm:$0xf0] }
 0x2ed   :  { %5569 = vmatpush.bf16.msra.mxu0 %v8363_v3  ;;  %v10138_v44 = vpop.f32.mrf.mxu2  ;;  %v8424_v3 = vld [vmem:[#allocation13 + $0x478] sm:$0xf0] }
 0x2ee   :  { %5558 = vmatpush.bf16.msrb.mxu2 %v8283_v13  ;;  %v8112_v13 = vld [vmem:[#allocation13 + $0x208] sm:$0xf0] }
 0x2ef   :  { %5532 = vmatpush.bf16.msrb.mxu3 %v8155_v55  ;;  %v9220_v55 = vld [vmem:[#allocation13 + $0x3b4] sm:$0xf] }
 0x2f0   :  { %5495 = vmatpush.bf16.msra.mxu1 %v7947_v41 }
 0x2f1   :  { %5570 = vmatpush.bf16.msra.mxu0 %v8355_v27  ;;  %v4160_v16 = vpop.f32.mrf.mxu3  ;;  %v4199_v21 = vpop.f32.mrf.mxu0  ;;  %v8427_v27 = vor.u32 %v9244_v25, %v8424_v3  ;;  %v9232_v3 = vld [vmem:[#allocation13 + $0x414] sm:$0xf] }
 0x2f2   :  { %5559 = vmatpush.bf16.msrb.mxu2 %v8275_v18  ;;  %v8115_v18 = vor.u32 %v9166_v46, %v8112_v13  ;;  %v9236_v46 = vld [vmem:[#allocation13 + $0x434] sm:$0xf]  ;;  %v8392_v13 = vld [vmem:[#allocation13 + $0x438] sm:$0xf0] }
 0x2f3   :  { %5533 = vmatpush.bf16.msrb.mxu3 %v8147_v12  ;;  %v8331_v12 = vor.u32 %v9220_v55, %v8328_v14  ;;  %v4225_v41 = vpop.f32.mrf.mxu1  ;;  %v9262_v55 = vld [vmem:[#allocation13 + $0x504] sm:$0xf]  ;;  %v8403_v14 = vor.u32 %v9238_v57, %v8400_v34  ;;  %v8395_v0 = vor.u32 %v9236_v46, %v8392_v13 }
 0x2f4   :  { %5496 = vmatpush.bf16.msra.mxu1 %v7939_v59  ;;  %v9182_v13 = vld [vmem:[#allocation13 + $0x284] sm:$0xf] }
 0x2f5   :  { %5571 = vmatpush.bf16.msra.mxu0 %v8347_v32  ;;  %v4186_v5 = vpop.f32.mrf.mxu2  ;;  %v8419_v32 = vor.u32 %v9242_v29, %v8416_v33  ;;  %v8232_v29 = vld [vmem:[#allocation13 + $0x2f8] sm:$0xf0] }
 0x2f6   :  { %5560 = vmatpush.bf16.msrb.mxu2 %v8267_v31  ;;  %v9230_v5 = vld [vmem:[#allocation13 + $0x404] sm:$0xf] }
 0x2f7   :  { %5534 = vmatpush.bf16.msrb.mxu3 %v8139_v28  ;;  %v9118_v28 = vld [vmem:[#allocation13 + $0x84] sm:$0xf]  ;;  %5525 = vmatmul.bf16.vlgmr.msrb.gmra.mxu0 %v10088_v52  ;;  %v8315_v52 = vor.u32 %v9216_v6, %v8312_v22  ;;  %v9192_v6 = vld [vmem:[#allocation13 + $0x2d4] sm:$0xf]  ;;  %v8216_v22 = vld [vmem:[#allocation13 + $0x2d8] sm:$0xf0] }
 0x2f8   :  { %5497 = vmatpush.bf16.msra.mxu1 %v7931_v4  ;;  %v7923_v31 = vor.u32 %v9118_v28, %v7920_v58  ;;  %v8376_v4 = vld [vmem:[#allocation13 + $0x418] sm:$0xf0]  ;;  %v9196_v58 = vld [vmem:[#allocation13 + $0x2f4] sm:$0xf]  ;;  %v8219_v41 = vor.u32 %v9192_v6, %v8216_v22 }
 0x2f9   :  { %5572 = vmatpush.bf16.msra.mxu0 %v8339_v61  ;;  %v8307_v61 = vor.u32 %v9214_v10, %v8304_v40  ;;  %v8379_v11 = vor.u32 %v9232_v3, %v8376_v4  ;;  %v9186_v10 = vld [vmem:[#allocation13 + $0x2a4] sm:$0xf]  ;;  %v8192_v40 = vld [vmem:[#allocation13 + $0x2a8] sm:$0xf0]  ;;  %v9276_v22 = vld [vmem:[#allocation17 + $0x30] sm:$0xff] }
 0x2fa   :  { %5561 = vmatpush.bf16.msrb.mxu2 %v8259_v51  ;;  %v8504_v51 = vld [vmem:[#allocation13 + $0x518] sm:$0xf0]  ;;  %v8480_v3 = vld [vmem:[#allocation13 + $0x4e8] sm:$0xf0] }
 0x2fb   :  { %5535 = vmatpush.bf16.msrb.mxu3 %v8131_v47  ;;  %v9240_v47 = vld [vmem:[#allocation13 + $0x454] sm:$0xf]  ;;  %v8507_v59 = vor.u32 %v9264_v38, %v8504_v51  ;;  %v8200_v38 = vld [vmem:[#allocation13 + $0x2b8] sm:$0xf0] }
 0x2fc   :  { %5498 = vmatpush.bf16.msra.mxu1 %v7923_v31  ;;  %v8411_v53 = vor.u32 %v9240_v47, %v8408_v48  ;;  %v8208_v47 = vld [vmem:[#allocation13 + $0x2c8] sm:$0xf0] }
 0x2fd   :  { %5573 = vmatpush.bf16.msra.mxu0 %v8331_v12 }
 0x2fe   :  { %5562 = vmatpush.bf16.msrb.mxu2 %v8251_v15 }
 0x2ff   :  { %5536 = vmatpush.bf16.msrb.mxu3 %v8123_v56  ;;  %v8496_v56 = vld [vmem:[#allocation13 + $0x508] sm:$0xf0] }
 0x301   :  { %5574 = vmatpush.bf16.msra.mxu0 %v8323_v35  ;;  %v8235_v35 = vor.u32 %v9196_v58, %v8232_v29  ;;  %v8440_v58 = vld [vmem:[#allocation13 + $0x498] sm:$0xf0]  ;;  %v9246_v29 = vld [vmem:[#allocation13 + $0x484] sm:$0xf] }
 0x302   :  { %5563 = vmatpush.bf16.msrb.mxu2 %v8243_v26 }
 0x303   :  { %5537 = vmatpush.bf16.msrb.mxu3 %v8115_v18  ;;  %v5370_v15 = vpop.f32.mrf.mxu1 }
 0x305   :  { %5564 = vmatmul.bf16.vlgmr.msrb.gmra.mxu2 %v10084_v49  ;;  %5575 = vmatpush.bf16.msra.mxu0 %v8315_v52  ;;  %v8499_v49 = vor.u32 %v9262_v55, %v8496_v56  ;;  %v9188_v52 = vld [vmem:[#allocation13 + $0x2b4] sm:$0xf]  ;;  %v8184_v56 = vld [vmem:[#allocation13 + $0x298] sm:$0xf0] }
 0x306   :  { %5612 = vmatpush.bf16.msra.mxu2 %v8523_v24  ;;  %5538 = vmatmul.bf16.vlgmr.msrb.gmra.mxu3 %v10090_v54  ;;  %v4172_v54 = vadd.f32 %v10131_v30, %v10136_v37  ;;  %v8387_v30 = vor.u32 %v9234_v1, %v8384_v19  ;;  %v8203_v51 = vor.u32 %v9188_v52, %v8200_v38  ;;  %v9184_v55 = vld [vmem:[#allocation13 + $0x294] sm:$0xf]  ;;  %v9273_v52 = vld [vmem:[#allocation17 + $0x18] sm:$0xff] }
 0x307   :  { %5582 = vmatpush.bf16.msra.mxu3 %v8427_v27  ;;  %v8187_v46 = vor.u32 %v9184_v55, %v8184_v56  ;;  %v5621_v55 = vld [vmem:[#allocation14] sm:$0x3]  ;;  %v5629_v56 = vld [vmem:[#allocation16] sm:$0x3] }
 0x308   :  { %v4185_v17 = vadd.f32 %v10138_v44, %v4172_v54  ;;  %v5344_v23 = vpop.f32.mrf.mxu2 }
 0x309   :  { %5576 = vmatpush.bf16.msra.mxu0 %v8307_v61  ;;  %v5357_v16 = vpop.f32.mrf.mxu0 }
 0x30a   :  { %5613 = vmatpush.bf16.msra.mxu2 %v8515_v9  ;;  %v4198_v25 = vadd.f32 %v10140_v50, %v4185_v17  ;;  %v5358_v44 = vadd.f32 %v5357_v16, %v5344_v23  ;;  %v8368_v50 = vld [vmem:[#allocation13 + $0x408] sm:$0xf0]  ;;  %v8488_v17 = vld [vmem:[#allocation13 + $0x4f8] sm:$0xf0]  ;;  %v9254_v16 = vld [vmem:[#allocation13 + $0x4c4] sm:$0xf] }
 0x30b   :  { %5583 = vmatpush.bf16.msra.mxu3 %v8419_v32  ;;  %v4210_v37 = vpop.f32.mrf.mxu3  ;;  %v5372_v18 = vpop.f32.mrf.mxu1  ;;  %v8371_v28 = vor.u32 %v9230_v5, %v8368_v50  ;;  %v9190_v32 = vld [vmem:[#allocation13 + $0x2c4] sm:$0xf]  ;;  %v8448_v50 = vld [vmem:[#allocation13 + $0x4a8] sm:$0xf0] }
 0x30c   :  { %5577 = vmatmul.bf16.vlgmr.msra.gmra.mxu0 %v10117_v43  ;;  %v4211_v12 = vadd.f32 %v4210_v37, %v4198_v25  ;;  %v4278_v43 = vperm.slane %v10112_v20, 2  ;;  %v5371_v21 = vadd.f32 %v5370_v15, %v5358_v44  ;;  %v9194_v20 = vld [vmem:[#allocation13 + $0x2e4] sm:$0xf]  ;;  %v8211_v9 = vor.u32 %v9190_v32, %v8208_v47  ;;  %v9260_v15 = vld [vmem:[#allocation13 + $0x4f4] sm:$0xf] }
 0x30d   :  { %v8227_v39 = vor.u32 %v9194_v20, %v8224_v2  ;;  %v9258_v37 = vld [vmem:[#allocation13 + $0x4e4] sm:$0xf]  ;;  %v8464_v44 = vld [vmem:[#allocation13 + $0x4c8] sm:$0xf0]  ;;  %v9277_v20 = vld [vmem:[#allocation17 + $0x38] sm:$0xff] }
 0x30e   :  { %5614 = vmatpush.bf16.msra.mxu2 %v8507_v59  ;;  %v4224_v36 = vadd.f32 %v10142_v62, %v4211_v12  ;;  %v8195_v59 = vor.u32 %v9186_v10, %v8192_v40  ;;  %v8483_v4 = vor.u32 %v9258_v37, %v8480_v3  ;;  %v9256_v12 = vld [vmem:[#allocation13 + $0x4d4] sm:$0xf]  ;;  %v8467_v18 = vor.u32 %v9254_v16, %v8464_v44  ;;  %v9250_v5 = vld [vmem:[#allocation13 + $0x4a4] sm:$0xf] }
 0x30f   :  { %5584 = vmatpush.bf16.msra.mxu3 %v8411_v53  ;;  %5769 = vmatpush.bf16.msrb.mxu0 %v9277_v20  ;;  %v9270_v40 = vld [vmem:[#allocation17] sm:$0xff]  ;;  %v9284_v37 = vld [vmem:[#allocation17 + $0x70] sm:$0xff] }
 0x310   :  { %v4263_v26 = vmul.f32 %v4241_v8, %v4224_v36  ;;  %v5346_v24 = vpop.f32.mrf.mxu2  ;;  %v8472_v8 = vld [vmem:[#allocation13 + $0x4d8] sm:$0xf0]  ;;  %v9252_v36 = vld [vmem:[#allocation13 + $0x4b4] sm:$0xf]  ;;  %v9282_v16 = vld [vmem:[#allocation17 + $0x60] sm:$0xff] }
 0x311   :  { %v5359_v31 = vpop.f32.mrf.mxu0  ;;  %v8475_v23 = vor.u32 %v9256_v12, %v8472_v8 }
 0x312   :  { %5615 = vmatpush.bf16.msra.mxu2 %v8499_v49  ;;  %v4300_v27 = vadd.f32 %v4278_v43, %v4263_v26  ;;  %v8176_v49 = vld [vmem:[#allocation13 + $0x288] sm:$0xf0]  ;;  %v8456_v43 = vld [vmem:[#allocation13 + $0x4b8] sm:$0xf0] }
 0x313   :  { %5585 = vmatpush.bf16.msra.mxu3 %v8403_v14  ;;  %v4212_v7 = vpop.f32.mrf.mxu3  ;;  %v8179_v25 = vor.u32 %v9182_v13, %v8176_v49  ;;  %5770 = vmatpush.bf16.msrb.mxu0 %v9276_v22  ;;  %v5631_v49 = vperm.slane %v5629_v56, 0  ;;  %v9293_v22 = vld [vmem:[#allocation22 + $0x38] sm:$0xff] }
 0x314   :  { %v4311_v33 = vmax.f32 %v4300_v27, 0.0  ;;  %v8451_v27 = vor.u32 %v9250_v5, %v8448_v50  ;;  %v8432_v7 = vld [vmem:[#allocation13 + $0x488] sm:$0xf0]  ;;  %v9280_v5 = vld [vmem:[#allocation17 + $0x50] sm:$0xff] }
 0x316   :  { %v4322_v62 = vpack.c.bf16 %v4311_v33, %v4311_v33 }
 0x317   :  { %5586 = vmatpush.bf16.msra.mxu3 %v8395_v0 }
 0x318   :  { %8524 = vmatmul.msk.bf16.vlgmr.msrb.gmra.mxu1 %vm5331_vm3, %v4322_v62  ;;  %8525 = vmatmul.msk.bf16.vlgmr.msra.gmra.mxu2 %vm5331_vm3, %v4322_v62 }
 0x319   :  { %5543 = vmatpush.bf16.msrb.mxu1 %v8235_v35  ;;  %v8435_v35 = vor.u32 %v9246_v29, %v8432_v7 }
 0x31b   :  { %5587 = vmatpush.bf16.msra.mxu3 %v8387_v30  ;;  %v8491_v30 = vor.u32 %v9260_v15, %v8488_v17 }
 0x31d   :  { %5544 = vmatpush.bf16.msrb.mxu1 %v8227_v39 }
 0x31f   :  { %5588 = vmatpush.bf16.msra.mxu3 %v8379_v11  ;;  %v8459_v11 = vor.u32 %v9252_v36, %v8456_v43  ;;  %v9281_v36 = vld [vmem:[#allocation17 + $0x58] sm:$0xff] }
 0x321   :  { %5545 = vmatpush.bf16.msrb.mxu1 %v8219_v41  ;;  %v9275_v41 = vld [vmem:[#allocation17 + $0x28] sm:$0xff] }
 0x322   :  { %5771 = vmatpush.bf16.msrb.mxu0 %v9275_v41  ;;  %v9292_v41 = vld [vmem:[#allocation22 + $0x30] sm:$0xff] }
 0x323   :  { %5589 = vmatpush.bf16.msra.mxu3 %v8371_v28  ;;  %v5422_v48 = vpop.f32.mrf.mxu1  ;;  %v9248_v28 = vld [vmem:[#allocation13 + $0x494] sm:$0xf] }
 0x325   :  { %5546 = vmatpush.bf16.msrb.mxu1 %v8211_v9  ;;  %v9274_v9 = vld [vmem:[#allocation17 + $0x20] sm:$0xff] }
 0x326   :  { %5590 = vmatmul.bf16.vlgmr.msra.gmra.mxu3 %v10122_v63  ;;  %5772 = vmatpush.bf16.msrb.mxu0 %v9274_v9 }
 0x327   :  { %5875 = vmatpush.bf16.msrb.mxu3 %v9293_v22 }
 0x328   :  { %5499 = vmatmul.bf16.vlgmr.msra.gmra.mxu1 %v10063_v60  ;;  %v5396_v57 = vpop.f32.mrf.mxu2 }
 0x329   :  { %v5409_v34 = vpop.f32.mrf.mxu0  ;;  %5547 = vmatpush.bf16.msrb.mxu1 %v8203_v51  ;;  %v9272_v51 = vld [vmem:[#allocation17 + $0x10] sm:$0xff] }
 0x32a   :  { %5773 = vmatpush.bf16.msrb.mxu0 %v9273_v52 }
 0x32b   :  { %v5383_v53 = vpop.f32.mrf.mxu3  ;;  %v5424_v61 = vpop.f32.mrf.mxu1  ;;  %5876 = vmatpush.bf16.msrb.mxu3 %v9292_v41 }
 0x32c   :  { %v5384_v63 = vadd.f32 %v5383_v53, %v5371_v21 }
 0x32d   :  { %5548 = vmatpush.bf16.msrb.mxu1 %v8195_v59 }
 0x32e   :  { %v5397_v54 = vadd.f32 %v5396_v57, %v5384_v63  ;;  %5774 = vmatpush.bf16.msrb.mxu0 %v9272_v51  ;;  %v9287_v51 = vld [vmem:[#allocation22 + $0x8] sm:$0xff] }
 0x330   :  { %v5410_v14 = vadd.f32 %v5409_v34, %v5397_v54  ;;  %v5398_v19 = vpop.f32.mrf.mxu2 }
 0x331   :  { %v5411_v60 = vpop.f32.mrf.mxu0  ;;  %5549 = vmatpush.bf16.msrb.mxu1 %v8187_v46 }
 0x332   :  { %v5423_v0 = vadd.f32 %v5422_v48, %v5410_v14  ;;  %v5623_v14 = vperm.slane %v5621_v55, 0 }
 0x333   :  { %v5385_v1 = vpop.f32.mrf.mxu3 }
 0x335   :  { %5550 = vmatpush.bf16.msrb.mxu1 %v8179_v25  ;;  %v9285_v25 = vld [vmem:[#allocation17 + $0x78] sm:$0xff] }
 0x336   :  { %5782 = vmatpush.bf16.msrb.mxu2 %v9285_v25 }
 0x338   :  { %5551 = vmatmul.bf16.vlgmr.msrb.gmra.mxu1 %v10099_v45  ;;  %v8443_v45 = vor.u32 %v9248_v28, %v8440_v58  ;;  %v9278_v58 = vld [vmem:[#allocation17 + $0x40] sm:$0xff] }
 0x339   :  { %5595 = vmatpush.bf16.msra.mxu1 %v8491_v30 }
 0x33a   :  { %5783 = vmatpush.bf16.msrb.mxu2 %v9284_v37 }
 0x33d   :  { %5596 = vmatpush.bf16.msra.mxu1 %v8483_v4  ;;  %v9283_v4 = vld [vmem:[#allocation17 + $0x68] sm:$0xff] }
 0x33e   :  { %5784 = vmatpush.bf16.msrb.mxu2 %v9283_v4 }
 0x341   :  { %5597 = vmatpush.bf16.msra.mxu1 %v8475_v23 }
 0x342   :  { %5785 = vmatpush.bf16.msrb.mxu2 %v9282_v16 }
 0x345   :  { %5598 = vmatpush.bf16.msra.mxu1 %v8467_v18 }
 0x346   :  { %5786 = vmatpush.bf16.msrb.mxu2 %v9281_v36 }
 0x348   :  { %v5448_v24 = vpop.f32.mrf.mxu2 }
 0x349   :  { %v5435_v21 = vpop.f32.mrf.mxu3  ;;  %5599 = vmatpush.bf16.msra.mxu1 %v8459_v11 }
 0x34a   :  { %v5436_v26 = vadd.f32 %v5435_v21, %v5423_v0  ;;  %5787 = vmatpush.bf16.msrb.mxu2 %v9280_v5 }
 0x34c   :  { %v5449_v31 = vadd.f32 %v5448_v24, %v5436_v26  ;;  %v9279_v26 = vld [vmem:[#allocation17 + $0x48] sm:$0xff]  ;;  %v5624_v24 = vperm.slane %v5621_v55, 1 }
 0x34d   :  { %5600 = vmatpush.bf16.msra.mxu1 %v8451_v27 }
 0x34e   :  { %5788 = vmatpush.bf16.msrb.mxu2 %v9279_v26 }
 0x350   :  { %v5450_v62 = vpop.f32.mrf.mxu2 }
 0x351   :  { %v5437_v33 = vpop.f32.mrf.mxu3  ;;  %5601 = vmatpush.bf16.msra.mxu1 %v8443_v45 }
 0x352   :  { %5789 = vmatpush.bf16.msrb.mxu2 %v9278_v58 }
 0x355   :  { %5602 = vmatpush.bf16.msra.mxu1 %v8435_v35  ;;  %v5632_v35 = vperm.slane %v5629_v56, 1  ;;  %v9321_v56 = vld [vmem:[#allocation23] ss:$0 sm:$0xff] }
 0x358   :  { %5603 = vmatmul.bf16.vlgmr.msra.gmra.mxu1 %v10133_v42  ;;  %v9271_v42 = vld [vmem:[#allocation17 + $0x8] sm:$0xff] }
 0x359   :  { %5775 = vmatpush.bf16.msrb.mxu0 %v9271_v42  ;;  %v9286_v42 = vld [vmem:[#allocation22] sm:$0xff] }
 0x35d   :  { %5776 = vmatpush.bf16.msrb.mxu0 %v9270_v40 }
 0x364   :  { %v5461_v6 = vpop.f32.mrf.mxu0 }
 0x365   :  { %v5462_v54 = vadd.f32 %v5461_v6, %v5449_v31 }
 0x368   :  { %v5513_v39 = vpop.f32.mrf.mxu2 }
 0x369   :  { %v5487_v2 = vpop.f32.mrf.mxu3 }
 0x36c   :  { %v5463_v48 = vpop.f32.mrf.mxu0 }
 0x36d   :  { %v9289_v48 = vld [vmem:[#allocation22 + $0x18] sm:$0xff] }
 0x370   :  { %v5515_v47 = vpop.f32.mrf.mxu2 }
 0x371   :  { %v5489_v32 = vpop.f32.mrf.mxu3  ;;  %v9290_v47 = vld [vmem:[#allocation22 + $0x20] sm:$0xff] }
 0x372   :  { %v9291_v32 = vld [vmem:[#allocation22 + $0x28] sm:$0xff] }
 0x373   :  { %5877 = vmatpush.bf16.msrb.mxu3 %v9291_v32 }
 0x374   :  { %v5526_v38 = vpop.f32.mrf.mxu0 }
 0x377   :  { %5878 = vmatpush.bf16.msrb.mxu3 %v9290_v47 }
 0x37b   :  { %5879 = vmatpush.bf16.msrb.mxu3 %v9289_v48 }
 0x37c   :  { %v5528_v10 = vpop.f32.mrf.mxu0 }
 0x37d   :  { %v9319_v10 = vld [vmem:[#allocation19] ss:$0 sm:$0xff] }
 0x388   :  { %v5565_v63 = vpop.f32.mrf.mxu2 }
 0x389   :  { %v5539_v53 = vpop.f32.mrf.mxu3  ;;  %v5578_v57 = vpop.f32.mrf.mxu0 }
 0x390   :  { %v5567_v59 = vpop.f32.mrf.mxu2 }
 0x391   :  { %v5541_v34 = vpop.f32.mrf.mxu3  ;;  %v5580_v61 = vpop.f32.mrf.mxu0 }
 0x395   :  { %v5474_v46 = vpop.f32.mrf.mxu1 }
 0x396   :  { %v5475_v13 = vadd.f32 %v5474_v46, %v5462_v54 }
 0x398   :  { %v5627_v15 = vmul.f32 %v5623_v14, %v5475_v13 }
 0x39a   :  { %v5635_v17 = vadd.f32 %v5631_v49, %v5627_v15 }
 0x39b   :  { %v5617_v0 = vpop.f32.mrf.mxu2 }
 0x39c   :  { %v5637_v1 = vmax.f32 %v5635_v17, 0.0 }
 0x39d   :  { %v5476_v60 = vpop.f32.mrf.mxu1 }
 0x39e   :  { %v5639_v30 = vpack.c.bf16 %v5637_v1, %v5637_v1 }
 0x3a0   :  { %5777 = vmatmul.bf16.vlgmr.msrb.gmra.mxu0 %v5639_v30 }
 0x3a3   :  { %v5619_v3 = vpop.f32.mrf.mxu2 }
 0x3a5   :  { %v5500_v8 = vpop.f32.mrf.mxu1 }
 0x3a6   :  { %v5501_v23 = vadd.f32 %v5500_v8, %v5487_v2 }
 0x3a8   :  { %v5514_v44 = vadd.f32 %v5513_v39, %v5501_v23 }
 0x3a9   :  { %v5591_v19 = vpop.f32.mrf.mxu3 }
 0x3aa   :  { %v5527_v18 = vadd.f32 %v5526_v38, %v5514_v44  ;;  %v9288_v38 = vld [vmem:[#allocation22 + $0x10] sm:$0xff] }
 0x3ab   :  { %5880 = vmatpush.bf16.msrb.mxu3 %v9288_v38 }
 0x3ac   :  { %v5540_v43 = vadd.f32 %v5539_v53, %v5527_v18 }
 0x3ad   :  { %v5502_v11 = vpop.f32.mrf.mxu1 }
 0x3af   :  { %5881 = vmatpush.bf16.msrb.mxu3 %v9287_v51 }
 0x3b1   :  { %v5593_v12 = vpop.f32.mrf.mxu3 }
 0x3b3   :  { %5882 = vmatpush.bf16.msrb.mxu3 %v9286_v42 }
 0x3b5   :  { %v5552_v50 = vpop.f32.mrf.mxu1 }
 0x3b6   :  { %v5553_v21 = vadd.f32 %v5552_v50, %v5540_v43 }
 0x3b8   :  { %v5566_v27 = vadd.f32 %v5565_v63, %v5553_v21  ;;  %v9320_v63 = vld [vmem:[#allocation20] ss:$0 sm:$0xff] }
 0x3ba   :  { %v5579_v28 = vadd.f32 %v5578_v57, %v5566_v27 }
 0x3bc   :  { %v5592_v29 = vadd.f32 %v5591_v19, %v5579_v28 }
 0x3bd   :  { %v5554_v45 = vpop.f32.mrf.mxu1 }
 0x3d5   :  { %v5604_v7 = vpop.f32.mrf.mxu1 }
 0x3d6   :  { %v5605_v33 = vadd.f32 %v5604_v7, %v5592_v29 }
 0x3d8   :  { %v5618_v31 = vadd.f32 %v5617_v0, %v5605_v33 }
 0x3da   :  { %v5628_v62 = vmul.f32 %v5624_v24, %v5618_v31 }
 0x3dc   :  { %v5636_v20 = vadd.f32 %v5632_v35, %v5628_v62 }
 0x3dd   :  { %v5606_v2 = vpop.f32.mrf.mxu1 }
 0x3de   :  { %v5638_v39 = vmax.f32 %v5636_v20, 0.0 }
 0x3e0   :  { %v5640_v6 = vpack.c.bf16 %v5638_v39, %v5638_v39 }
 0x3e2   :  { %5790 = vmatmul.bf16.vlgmr.msrb.gmra.mxu2 %v5640_v6 }
 0x41d   :  { %v5778_v9 = vpop.f32.mrf.mxu0 }
 0x425   :  { %v5780_v52 = vpop.f32.mrf.mxu0 }
 0x465   :  { %v5791_v40 = vpop.f32.mrf.mxu2 }
 0x466   :  { %v5792_v53 = vadd.f32 %v5791_v40, %v5778_v9 }
 0x468   :  { %v5799_v57 = vmul.f32 %v9319_v10, %v5792_v53 }
 0x46a   :  { %v5804_v34 = vadd.f32 %v9320_v63, %v5799_v57 }
 0x46c   :  { %v5805_v59 = vmax.f32 %v5804_v34, 0.0 }
 0x46d   :  { %v5793_v61 = vpop.f32.mrf.mxu2 }
 0x46e   :  { %v5806_v55 = vpack.c.bf16 %v5805_v59, %v5805_v59 }
 0x470   :  { %5883 = vmatmul.bf16.vlgmr.msrb.gmra.mxu3 %v5806_v55 }
 0x4f3   :  { %v5884_v54 = vpop.f32.mrf.mxu3 }
 0x4f4   :  { %v5885_v14 = vadd.f32 %v9321_v56, %v5884_v54 }
 0x4f6   :  { %5888 = vst [vmem:[#allocation25] sm:$0xff] %v5885_v14 }
 0x4fb   :  { %v5886_v46 = vpop.f32.mrf.mxu3 }
 0x4fc   :  { %5892 = vsyncadd [#allocation4], 96  ;;  %s5895_s8 = sshll.u32 %s10177_s15, 4  ;;  %s9722_s2 = smov [#allocation25]   ;;  %s5896_s8 = int_to_ptr.hbm [resolvable:$true] %s5895_s8 }
 0x4fd   :  { %s5893_s3 = sshll.u32 %s9722_s2, 4  ;;  %s9723_s10 = smov 32   ;;  %s5894_s3 = int_to_ptr.vmem [resolvable:$true] %s5893_s3 }
 0x4fe   :  { %s9724_s17 = smov 2  }
 0x4ff   :  { %5901 = dma.vmem_to_hbm [thread:$0]  %s5894_s3, 32, %s5896_s8, [#allocation4], %s9723_s10, %s9723_s10, %s9724_s17  }
 0x500   :  { %9698 = dma.done.wait [#allocation4], 128  }
 0x501   :  { %9699 = vsyncadd [#allocation4], 4294967168 }
 0x502   :  { %5906 = vsyncpa [#allocation3], 1 }
 0x503   :  { %5907 = vsyncpa [#allocation6], 1 }
 0x504   :  { %5908 = vsyncpa [#allocation9], 1 }
 0x505   :  { %5909 = vsyncpa [#allocation12], 1 }
 0x506   :  { %5910 = vsyncpa [#allocation15], 1 }
 0x507   :  { %5911 = vsyncpa [#allocation18], 1 }
 0x508   :  { %5912 = vsyncpa [#allocation21], 1 }
 0x509   :  { %5913 = vsyncpa [#allocation24], 1 }
 0x50a   :  { %5914 = vsyncpa [#allocation4], 1 }

</bundles_post_ra>
